<compile_context>
chip_gen: v6e
topology: v6e:2x2x1
jax: 0.10.0
libtpu: 0.0.40
codegen_flags: <defaults>
</compile_context>

<pallas_src>
import functools

import jax
import jax.numpy as jnp
from jax import lax
from jax.experimental import pallas as pl
from jax.experimental.pallas import tpu as pltpu

# ----- module hyper-parameters (mirroring Attention1.__init__ defaults) -----
NUM_HEADS = 6
MID_DIM = 12
HEAD_DIM = MID_DIM // NUM_HEADS       # = 2
N_TOKENS = 128                        # hard-coded in the PyTorch forward
SCALE = MID_DIM ** (-0.5)             # qk_scale = None -> mid_dim ** -0.5

# dot_general dimension numbers for "A @ B.T" (flash-attention style; avoids
# an explicit in-kernel transpose of the narrow K operand).
_NT_DIMS = (((1,), (1,)), ((), ()))


def _attention1_kernel(x_ref, wqkv_ref, wblk_ref, bproj_ref, o_ref, qkv_ref):
    """One grid step processes TB batch elements (TB*128 tokens).

    x_ref    : (TB*128, C)       f32   input tokens
    wqkv_ref : (C, 3*MID)        bf16  qkv weight^T, q-columns pre-scaled
    wblk_ref : (MID, H*C)        bf16  block-diag proj weight:
                                       wblk[2h:2h+2, h*C:(h+1)*C] = Wproj^T[2h:2h+2, :]
    bproj_ref: (1, C)            f32   proj bias
    o_ref    : (TB*128, C)       f32   output tokens
    qkv_ref  : (TB*128, 3*MID)   bf16  VMEM scratch holding the qkv projection
    """
    C = o_ref.shape[1]
    tb = o_ref.shape[0] // N_TOKENS

    # qkv projection over the whole super-block (no bias: qkv_bias=False).
    # bf16 MXU operands, f32 accumulation, bf16 scratch.
    qkv_ref[...] = jnp.dot(
        x_ref[...].astype(jnp.bfloat16), wqkv_ref[...],
        preferred_element_type=jnp.float32).astype(jnp.bfloat16)

    wblk = wblk_ref[...]                      # (MID, H*C) bf16
    bias = bproj_ref[...]                     # (1, C)     f32

    def block_body(b, carry):
        off = pl.multiple_of(b * N_TOKENS, N_TOKENS)
        blk = qkv_ref[pl.ds(off, N_TOKENS), :]            # (128, 3*MID) bf16

        # All six per-head (V_h @ Wproj_h) blocks in ONE matmul against the
        # block-diagonal proj weight: (128, 12) @ (12, H*C) -> (128, H*C).
        v = blk[:, 2 * MID_DIM:3 * MID_DIM]               # (128, MID) bf16
        vw = jnp.dot(v, wblk, preferred_element_type=jnp.float32)
        vw = vw.astype(jnp.bfloat16)                       # (128, H*C) bf16

        acc = jnp.zeros((N_TOKENS, C), jnp.float32)
        for h in range(NUM_HEADS):                         # static unroll
            lo = h * HEAD_DIM
            q_h = blk[:, lo:lo + HEAD_DIM]                 # (128, 2) bf16, pre-scaled
            k_h = blk[:, MID_DIM + lo:MID_DIM + lo + HEAD_DIM]

            # scores: q_h @ k_h^T, bf16 MXU operands, f32 accumulation.
            # TODO(synk): optional `mask` argument of the PyTorch forward is
            # not plumbed through (call sites use mask=None).
            s = lax.dot_general(q_h, k_h, _NT_DIMS,
                                preferred_element_type=jnp.float32)  # (128,128)

            # Softmax kept in f32 (v5e VPU/EUP have no bf16; on v5e the exp
            # path on the single EUP may be the binding unit, so keep it lean).
            m = jnp.max(s, axis=-1, keepdims=True)
            e = jnp.exp(s - m)
            denom = jnp.sum(e, axis=-1, keepdims=True)

            # Denominator folded into the narrow (128, C) head output instead
            # of normalizing the (128, 128) probabilities.
            u = jnp.dot(e.astype(jnp.bfloat16), vw[:, h * C:(h + 1) * C],
                        preferred_element_type=jnp.float32)          # (128, C)
            acc = acc + u * pl.reciprocal(denom, approx=True)

        # TODO(synk): C=32 -> masked 32-lane stores; a bf16 / lane-packed output
        # slab would make these lane-dense, but the consumer expects (B*128, C)
        # f32, so we keep the module's layout.
        o_ref[pl.ds(off, N_TOKENS), :] = acc + bias
        return carry

    lax.fori_loop(0, tb, block_body, 0)


@functools.partial(jax.jit, static_argnames=("block_batch",))
def attention1_forward(x, w_qkv_t, w_proj_t, b_proj, *, block_batch=64):
    """x: (B*128, C) f32 -> (B*128, C) f32 (Attention1.forward, mask=None)."""
    BN, C = x.shape
    assert BN % N_TOKENS == 0
    B = BN // N_TOKENS

    # Super-block size: big enough to amortize the ~0.35 us per-grid-step
    # overhead, but always >= 2 grid steps when B >= 2 so the "parallel" axis
    # can be sharded across both TensorCores on v7x (harmless on v5e/v6e).
    # VMEM per batch element: ~2x16 KB (x, dbl-buffered) + 2x16 KB (out) +
    # ~9 KB (bf16 qkv scratch) ~= 73 KB -> block_batch=64 ~= 4.7 MB, well under
    # the 16 MiB (v5e) / 32 MiB (v6e, v7x) default scoped VMEM limits.
    tb = max(1, min(block_batch, pl.cdiv(B, 2)))
    n_steps = pl.cdiv(B, tb)
    B_pad = n_steps * tb
    if B_pad != B:
        # padded rows are zero tokens; their (finite) outputs are discarded
        x = jnp.pad(x, ((0, (B_pad - B) * N_TOKENS), (0, 0)))

    # Fold the softmax scale into the q-columns of the qkv weight; cast the
    # weights to bf16 once on the host (MXU is bf16-native on v5e/v6e/v7x).
    col_scale = jnp.concatenate([
        jnp.full((MID_DIM,), SCALE, dtype=w_qkv_t.dtype),
        jnp.ones((2 * MID_DIM,), dtype=w_qkv_t.dtype),
    ])
    w_qkv_bf = (w_qkv_t * col_scale[None, :]).astype(jnp.bfloat16)

    # Block-diagonal proj weight so all six per-head V_h @ Wproj_h matmuls
    # fuse into one (128, MID) @ (MID, H*C) matmul in the kernel.
    wblk = jnp.zeros((MID_DIM, NUM_HEADS * C), dtype=jnp.float32)
    for h in range(NUM_HEADS):
        wblk = wblk.at[h * HEAD_DIM:(h + 1) * HEAD_DIM, h * C:(h + 1) * C].set(
            w_proj_t[h * HEAD_DIM:(h + 1) * HEAD_DIM, :])
    wblk_bf = wblk.astype(jnp.bfloat16)

    b_proj2d = b_proj.reshape(1, C).astype(jnp.float32)

    rows = tb * N_TOKENS
    grid_spec = pltpu.PrefetchScalarGridSpec(
        num_scalar_prefetch=0,
        grid=(n_steps,),
        in_specs=[
            pl.BlockSpec((rows, C), lambda i: (i, 0)),                 # x slab
            pl.BlockSpec((C, 3 * MID_DIM), lambda i: (0, 0)),          # Wqkv^T (bf16, scaled)
            pl.BlockSpec((MID_DIM, NUM_HEADS * C), lambda i: (0, 0)),  # block-diag Wproj^T
            pl.BlockSpec((1, C), lambda i: (0, 0)),                    # bias
        ],
        out_specs=pl.BlockSpec((rows, C), lambda i: (i, 0)),
        scratch_shapes=[pltpu.VMEM((rows, 3 * MID_DIM), jnp.bfloat16)],
    )

    out = pl.pallas_call(
        _attention1_kernel,
        out_shape=jax.ShapeDtypeStruct((B_pad * N_TOKENS, C), jnp.float32),
        grid_spec=grid_spec,
        compiler_params=pltpu.CompilerParams(
            dimension_semantics=("parallel",)),
    )(x, w_qkv_bf, wblk_bf, b_proj2d)

    return out[:BN]


def _reference_forward(x, w_qkv_t, w_proj_t, b_proj):
    """Pure-JAX f32 reference mirroring the PyTorch forward exactly."""
    BN, C = x.shape
    B = BN // N_TOKENS
    qkv = x @ w_qkv_t                                                # (BN, 3*MID)
    qkv = qkv.reshape(B, N_TOKENS, 3, NUM_HEADS, HEAD_DIM)
    qkv = jnp.transpose(qkv, (2, 0, 3, 1, 4))                        # (3,B,H,N,dh)
    q, k, v = qkv[0], qkv[1], qkv[2]
    attn = jnp.einsum("bhnd,bhmd->bhnm", q, k) * SCALE
    attn = jax.nn.softmax(attn, axis=-1)
    out = jnp.einsum("bhnm,bhmd->bhnd", attn, v)                     # (B,H,N,dh)
    out = jnp.transpose(out, (0, 2, 1, 3)).reshape(B * N_TOKENS, MID_DIM)
    return out @ w_proj_t + b_proj


if __name__ == "__main__":
    key = jax.random.PRNGKey(0)
    k_x, k_qkv, k_proj, k_bias = jax.random.split(key, 4)

    B = 4
    C = 32  # "dim" of the module

    # torch Linear weight is (out, in); we store the transpose (in, out) so the
    # kernel computes x @ W.
    x = jax.random.normal(k_x, (B * N_TOKENS, C), dtype=jnp.float32)
    w_qkv_t = jax.random.normal(k_qkv, (C, 3 * MID_DIM), dtype=jnp.float32) * 0.05
    w_proj_t = jax.random.normal(k_proj, (MID_DIM, C), dtype=jnp.float32) * 0.05
    b_proj = jax.random.normal(k_bias, (C,), dtype=jnp.float32) * 0.01

    out = jax.block_until_ready(attention1_forward(x, w_qkv_t, w_proj_t, b_proj))
    ref = _reference_forward(x, w_qkv_t, w_proj_t, b_proj)
    assert out.shape == (B * N_TOKENS, C)
    # bf16 MXU operands + approx reciprocal perturb numerics vs the f32 ref
    err = float(jnp.max(jnp.abs(out - ref)))
    assert err < 2e-2, err

    # exercise the padded path (B not divisible by the per-step super-block)
    B2 = 3
    x2 = jax.random.normal(k_x, (B2 * N_TOKENS, C), dtype=jnp.float32)
    out2 = jax.block_until_ready(
        attention1_forward(x2, w_qkv_t, w_proj_t, b_proj, block_batch=2))
    ref2 = _reference_forward(x2, w_qkv_t, w_proj_t, b_proj)
    err2 = float(jnp.max(jnp.abs(out2 - ref2)))
    assert out2.shape == (B2 * N_TOKENS, C)
    assert err2 < 2e-2, err2

    print("KERNEL_OK")
</pallas_src>

<mosaic_0001>
module attributes {stable_mosaic.version = 11 : i64} {
  func.func @_attention1_kernel(%arg0: i32, %arg1: memref<256x32xf32, #tpu.memory_space<vmem>>, %arg2: memref<32x36xbf16, #tpu.memory_space<vmem>>, %arg3: memref<12x192xbf16, #tpu.memory_space<vmem>>, %arg4: memref<1x32xf32, #tpu.memory_space<vmem>>, %arg5: memref<256x32xf32, #tpu.memory_space<vmem>>, %arg6: memref<256x36xbf16, #tpu.memory_space<vmem>>) attributes {dimension_semantics = [#tpu.dimension_semantics<parallel>], iteration_bounds = array<i64: 2>, scalar_prefetch = 0 : i64, scratch_operands = 1 : i64, tpu.core_type = #tpu.core_type<tc>, window_params = [{transform_indices = @transform_0, window_bounds = array<i64: 256, 32>}, {pipeline_mode = #tpu.pipeline_mode<synchronous>, transform_indices = @transform_1, window_bounds = array<i64: 32, 36>}, {pipeline_mode = #tpu.pipeline_mode<synchronous>, transform_indices = @transform_2, window_bounds = array<i64: 12, 192>}, {pipeline_mode = #tpu.pipeline_mode<synchronous>, transform_indices = @transform_3, window_bounds = array<i64: 1, 32>}, {transform_indices = @transform_4, window_bounds = array<i64: 256, 32>}]} {
    %c0 = arith.constant 0 : index
    %c0_0 = arith.constant 0 : index
    %0 = vector.load %arg1[%c0, %c0_0] : memref<256x32xf32, #tpu.memory_space<vmem>>, vector<256x32xf32>
    %1 = arith.truncf %0 : vector<256x32xf32> to vector<256x32xbf16>
    %c0_1 = arith.constant 0 : index
    %c0_2 = arith.constant 0 : index
    %2 = vector.load %arg2[%c0_1, %c0_2] : memref<32x36xbf16, #tpu.memory_space<vmem>>, vector<32x36xbf16>
    %cst = arith.constant dense<0.000000e+00> : vector<256x36xf32>
    %3 = tpu.matmul %1, %2, %cst {dimension_numbers = #tpu.dot_dimension_numbers<[1], [0], [0], [1], [0, 0, 1, 1], [], []>} : vector<256x32xbf16>, vector<32x36xbf16>, vector<256x36xf32> -> vector<256x36xf32>
    %4 = arith.truncf %3 : vector<256x36xf32> to vector<256x36xbf16>
    %c0_3 = arith.constant 0 : index
    %c0_4 = arith.constant 0 : index
    %5 = vector.load %arg6[%c0_3, %c0_4] : memref<256x36xbf16, #tpu.memory_space<vmem>>, vector<256x36xbf16>
    tpu.vector_store %arg6[%c0_3, %c0_4], %4 {strides = array<i32>} : memref<256x36xbf16, #tpu.memory_space<vmem>>, vector<256x36xbf16>,
    %c0_5 = arith.constant 0 : index
    %c0_6 = arith.constant 0 : index
    %6 = vector.load %arg3[%c0_5, %c0_6] : memref<12x192xbf16, #tpu.memory_space<vmem>>, vector<12x192xbf16>
    %c0_7 = arith.constant 0 : index
    %c0_8 = arith.constant 0 : index
    %7 = vector.load %arg4[%c0_7, %c0_8] : memref<1x32xf32, #tpu.memory_space<vmem>>, vector<1x32xf32>
    %c0_i32 = arith.constant 0 : i32
    %c2_i32 = arith.constant 2 : i32
    %8 = arith.addi %c0_i32, %c2_i32 : i32
    %c1_i32 = arith.constant 1 : i32
    scf.for %arg7 = %c0_i32 to %8 step %c1_i32  : i32 {
      %c128_i32 = arith.constant 128 : i32
      %9 = arith.muli %arg7, %c128_i32 : i32
      %10 = tpu.assume_multiple %9, 128 : i32
      %11 = arith.index_cast %10 : i32 to index
      %c0_10 = arith.constant 0 : index
      %12 = vector.load %arg6[%11, %c0_10] : memref<256x36xbf16, #tpu.memory_space<vmem>>, vector<128x36xbf16>
      %13 = vector.extract_strided_slice %12 {offsets = [0, 24], sizes = [128, 12], strides = [1, 1]} : vector<128x36xbf16> to vector<128x12xbf16>
      %cst_11 = arith.constant dense<0.000000e+00> : vector<128x192xf32>
      %14 = tpu.matmul %13, %6, %cst_11 {dimension_numbers = #tpu.dot_dimension_numbers<[1], [0], [0], [1], [0, 0, 1, 1], [], []>} : vector<128x12xbf16>, vector<12x192xbf16>, vector<128x192xf32> -> vector<128x192xf32>
      %15 = arith.truncf %14 : vector<128x192xf32> to vector<128x192xbf16>
      %cst_12 = arith.constant 0.000000e+00 : f32
      %16 = vector.broadcast %cst_12 : f32 to vector<128x32xf32>
      %17 = vector.extract_strided_slice %12 {offsets = [0, 0], sizes = [128, 2], strides = [1, 1]} : vector<128x36xbf16> to vector<128x2xbf16>
      %18 = vector.extract_strided_slice %12 {offsets = [0, 12], sizes = [128, 2], strides = [1, 1]} : vector<128x36xbf16> to vector<128x2xbf16>
      %cst_13 = arith.constant dense<0.000000e+00> : vector<128x128xf32>
      %19 = tpu.matmul %17, %18, %cst_13 {dimension_numbers = #tpu.dot_dimension_numbers<[1], [1], [0], [0], [0, 0, 1, 0], [], []>} : vector<128x2xbf16>, vector<128x2xbf16>, vector<128x128xf32> -> vector<128x128xf32>
      %cst_14 = arith.constant dense<0xFF800000> : vector<128xf32>
      %20 = vector.multi_reduction <maximumf>, %19, %cst_14 [1] : vector<128x128xf32> to vector<128xf32>
      %21 = vector.shape_cast %20 : vector<128xf32> to vector<128x1xf32>
      %22 = vector.broadcast %21 : vector<128x1xf32> to vector<128x128xf32>
      %23 = arith.subf %19, %22 : vector<128x128xf32>
      %24 = math.exp %23 : vector<128x128xf32>
      %cst_15 = arith.constant dense<0.000000e+00> : vector<128xf32>
      %25 = vector.multi_reduction <add>, %24, %cst_15 [1] : vector<128x128xf32> to vector<128xf32>
      %26 = vector.shape_cast %25 : vector<128xf32> to vector<128x1xf32>
      %27 = arith.truncf %24 : vector<128x128xf32> to vector<128x128xbf16>
      %28 = vector.extract_strided_slice %15 {offsets = [0, 0], sizes = [128, 32], strides = [1, 1]} : vector<128x192xbf16> to vector<128x32xbf16>
      %cst_16 = arith.constant dense<0.000000e+00> : vector<128x32xf32>
      %29 = tpu.matmul %27, %28, %cst_16 {dimension_numbers = #tpu.dot_dimension_numbers<[1], [0], [0], [1], [0, 0, 1, 1], [], []>} : vector<128x128xbf16>, vector<128x32xbf16>, vector<128x32xf32> -> vector<128x32xf32>
      %30 = tpu.reciprocal %26 {approx = true} : vector<128x1xf32> -> vector<128x1xf32>
      %31 = vector.broadcast %30 : vector<128x1xf32> to vector<128x32xf32>
      %32 = arith.mulf %29, %31 : vector<128x32xf32>
      %33 = arith.addf %16, %32 : vector<128x32xf32>
      %34 = vector.extract_strided_slice %12 {offsets = [0, 2], sizes = [128, 2], strides = [1, 1]} : vector<128x36xbf16> to vector<128x2xbf16>
      %35 = vector.extract_strided_slice %12 {offsets = [0, 14], sizes = [128, 2], strides = [1, 1]} : vector<128x36xbf16> to vector<128x2xbf16>
      %cst_17 = arith.constant dense<0.000000e+00> : vector<128x128xf32>
      %36 = tpu.matmul %34, %35, %cst_17 {dimension_numbers = #tpu.dot_dimension_numbers<[1], [1], [0], [0], [0, 0, 1, 0], [], []>} : vector<128x2xbf16>, vector<128x2xbf16>, vector<128x128xf32> -> vector<128x128xf32>
      %cst_18 = arith.constant dense<0xFF800000> : vector<128xf32>
      %37 = vector.multi_reduction <maximumf>, %36, %cst_18 [1] : vector<128x128xf32> to vector<128xf32>
      %38 = vector.shape_cast %37 : vector<128xf32> to vector<128x1xf32>
      %39 = vector.broadcast %38 : vector<128x1xf32> to vector<128x128xf32>
      %40 = arith.subf %36, %39 : vector<128x128xf32>
      %41 = math.exp %40 : vector<128x128xf32>
      %cst_19 = arith.constant dense<0.000000e+00> : vector<128xf32>
      %42 = vector.multi_reduction <add>, %41, %cst_19 [1] : vector<128x128xf32> to vector<128xf32>
      %43 = vector.shape_cast %42 : vector<128xf32> to vector<128x1xf32>
      %44 = arith.truncf %41 : vector<128x128xf32> to vector<128x128xbf16>
      %45 = vector.extract_strided_slice %15 {offsets = [0, 32], sizes = [128, 32], strides = [1, 1]} : vector<128x192xbf16> to vector<128x32xbf16>
      %cst_20 = arith.constant dense<0.000000e+00> : vector<128x32xf32>
      %46 = tpu.matmul %44, %45, %cst_20 {dimension_numbers = #tpu.dot_dimension_numbers<[1], [0], [0], [1], [0, 0, 1, 1], [], []>} : vector<128x128xbf16>, vector<128x32xbf16>, vector<128x32xf32> -> vector<128x32xf32>
      %47 = tpu.reciprocal %43 {approx = true} : vector<128x1xf32> -> vector<128x1xf32>
      %48 = vector.broadcast %47 : vector<128x1xf32> to vector<128x32xf32>
      %49 = arith.mulf %46, %48 : vector<128x32xf32>
      %50 = arith.addf %33, %49 : vector<128x32xf32>
      %51 = vector.extract_strided_slice %12 {offsets = [0, 4], sizes = [128, 2], strides = [1, 1]} : vector<128x36xbf16> to vector<128x2xbf16>
      %52 = vector.extract_strided_slice %12 {offsets = [0, 16], sizes = [128, 2], strides = [1, 1]} : vector<128x36xbf16> to vector<128x2xbf16>
      %cst_21 = arith.constant dense<0.000000e+00> : vector<128x128xf32>
      %53 = tpu.matmul %51, %52, %cst_21 {dimension_numbers = #tpu.dot_dimension_numbers<[1], [1], [0], [0], [0, 0, 1, 0], [], []>} : vector<128x2xbf16>, vector<128x2xbf16>, vector<128x128xf32> -> vector<128x128xf32>
      %cst_22 = arith.constant dense<0xFF800000> : vector<128xf32>
      %54 = vector.multi_reduction <maximumf>, %53, %cst_22 [1] : vector<128x128xf32> to vector<128xf32>
      %55 = vector.shape_cast %54 : vector<128xf32> to vector<128x1xf32>
      %56 = vector.broadcast %55 : vector<128x1xf32> to vector<128x128xf32>
      %57 = arith.subf %53, %56 : vector<128x128xf32>
      %58 = math.exp %57 : vector<128x128xf32>
      %cst_23 = arith.constant dense<0.000000e+00> : vector<128xf32>
      %59 = vector.multi_reduction <add>, %58, %cst_23 [1] : vector<128x128xf32> to vector<128xf32>
      %60 = vector.shape_cast %59 : vector<128xf32> to vector<128x1xf32>
      %61 = arith.truncf %58 : vector<128x128xf32> to vector<128x128xbf16>
      %62 = vector.extract_strided_slice %15 {offsets = [0, 64], sizes = [128, 32], strides = [1, 1]} : vector<128x192xbf16> to vector<128x32xbf16>
      %cst_24 = arith.constant dense<0.000000e+00> : vector<128x32xf32>
      %63 = tpu.matmul %61, %62, %cst_24 {dimension_numbers = #tpu.dot_dimension_numbers<[1], [0], [0], [1], [0, 0, 1, 1], [], []>} : vector<128x128xbf16>, vector<128x32xbf16>, vector<128x32xf32> -> vector<128x32xf32>
      %64 = tpu.reciprocal %60 {approx = true} : vector<128x1xf32> -> vector<128x1xf32>
      %65 = vector.broadcast %64 : vector<128x1xf32> to vector<128x32xf32>
      %66 = arith.mulf %63, %65 : vector<128x32xf32>
      %67 = arith.addf %50, %66 : vector<128x32xf32>
      %68 = vector.extract_strided_slice %12 {offsets = [0, 6], sizes = [128, 2], strides = [1, 1]} : vector<128x36xbf16> to vector<128x2xbf16>
      %69 = vector.extract_strided_slice %12 {offsets = [0, 18], sizes = [128, 2], strides = [1, 1]} : vector<128x36xbf16> to vector<128x2xbf16>
      %cst_25 = arith.constant dense<0.000000e+00> : vector<128x128xf32>
      %70 = tpu.matmul %68, %69, %cst_25 {dimension_numbers = #tpu.dot_dimension_numbers<[1], [1], [0], [0], [0, 0, 1, 0], [], []>} : vector<128x2xbf16>, vector<128x2xbf16>, vector<128x128xf32> -> vector<128x128xf32>
      %cst_26 = arith.constant dense<0xFF800000> : vector<128xf32>
      %71 = vector.multi_reduction <maximumf>, %70, %cst_26 [1] : vector<128x128xf32> to vector<128xf32>
      %72 = vector.shape_cast %71 : vector<128xf32> to vector<128x1xf32>
      %73 = vector.broadcast %72 : vector<128x1xf32> to vector<128x128xf32>
      %74 = arith.subf %70, %73 : vector<128x128xf32>
      %75 = math.exp %74 : vector<128x128xf32>
      %cst_27 = arith.constant dense<0.000000e+00> : vector<128xf32>
      %76 = vector.multi_reduction <add>, %75, %cst_27 [1] : vector<128x128xf32> to vector<128xf32>
      %77 = vector.shape_cast %76 : vector<128xf32> to vector<128x1xf32>
      %78 = arith.truncf %75 : vector<128x128xf32> to vector<128x128xbf16>
      %79 = vector.extract_strided_slice %15 {offsets = [0, 96], sizes = [128, 32], strides = [1, 1]} : vector<128x192xbf16> to vector<128x32xbf16>
      %cst_28 = arith.constant dense<0.000000e+00> : vector<128x32xf32>
      %80 = tpu.matmul %78, %79, %cst_28 {dimension_numbers = #tpu.dot_dimension_numbers<[1], [0], [0], [1], [0, 0, 1, 1], [], []>} : vector<128x128xbf16>, vector<128x32xbf16>, vector<128x32xf32> -> vector<128x32xf32>
      %81 = tpu.reciprocal %77 {approx = true} : vector<128x1xf32> -> vector<128x1xf32>
      %82 = vector.broadcast %81 : vector<128x1xf32> to vector<128x32xf32>
      %83 = arith.mulf %80, %82 : vector<128x32xf32>
      %84 = arith.addf %67, %83 : vector<128x32xf32>
      %85 = vector.extract_strided_slice %12 {offsets = [0, 8], sizes = [128, 2], strides = [1, 1]} : vector<128x36xbf16> to vector<128x2xbf16>
      %86 = vector.extract_strided_slice %12 {offsets = [0, 20], sizes = [128, 2], strides = [1, 1]} : vector<128x36xbf16> to vector<128x2xbf16>
      %cst_29 = arith.constant dense<0.000000e+00> : vector<128x128xf32>
      %87 = tpu.matmul %85, %86, %cst_29 {dimension_numbers = #tpu.dot_dimension_numbers<[1], [1], [0], [0], [0, 0, 1, 0], [], []>} : vector<128x2xbf16>, vector<128x2xbf16>, vector<128x128xf32> -> vector<128x128xf32>
      %cst_30 = arith.constant dense<0xFF800000> : vector<128xf32>
      %88 = vector.multi_reduction <maximumf>, %87, %cst_30 [1] : vector<128x128xf32> to vector<128xf32>
      %89 = vector.shape_cast %88 : vector<128xf32> to vector<128x1xf32>
      %90 = vector.broadcast %89 : vector<128x1xf32> to vector<128x128xf32>
      %91 = arith.subf %87, %90 : vector<128x128xf32>
      %92 = math.exp %91 : vector<128x128xf32>
      %cst_31 = arith.constant dense<0.000000e+00> : vector<128xf32>
      %93 = vector.multi_reduction <add>, %92, %cst_31 [1] : vector<128x128xf32> to vector<128xf32>
      %94 = vector.shape_cast %93 : vector<128xf32> to vector<128x1xf32>
      %95 = arith.truncf %92 : vector<128x128xf32> to vector<128x128xbf16>
      %96 = vector.extract_strided_slice %15 {offsets = [0, 128], sizes = [128, 32], strides = [1, 1]} : vector<128x192xbf16> to vector<128x32xbf16>
      %cst_32 = arith.constant dense<0.000000e+00> : vector<128x32xf32>
      %97 = tpu.matmul %95, %96, %cst_32 {dimension_numbers = #tpu.dot_dimension_numbers<[1], [0], [0], [1], [0, 0, 1, 1], [], []>} : vector<128x128xbf16>, vector<128x32xbf16>, vector<128x32xf32> -> vector<128x32xf32>
      %98 = tpu.reciprocal %94 {approx = true} : vector<128x1xf32> -> vector<128x1xf32>
      %99 = vector.broadcast %98 : vector<128x1xf32> to vector<128x32xf32>
      %100 = arith.mulf %97, %99 : vector<128x32xf32>
      %101 = arith.addf %84, %100 : vector<128x32xf32>
      %102 = vector.extract_strided_slice %12 {offsets = [0, 10], sizes = [128, 2], strides = [1, 1]} : vector<128x36xbf16> to vector<128x2xbf16>
      %103 = vector.extract_strided_slice %12 {offsets = [0, 22], sizes = [128, 2], strides = [1, 1]} : vector<128x36xbf16> to vector<128x2xbf16>
      %cst_33 = arith.constant dense<0.000000e+00> : vector<128x128xf32>
      %104 = tpu.matmul %102, %103, %cst_33 {dimension_numbers = #tpu.dot_dimension_numbers<[1], [1], [0], [0], [0, 0, 1, 0], [], []>} : vector<128x2xbf16>, vector<128x2xbf16>, vector<128x128xf32> -> vector<128x128xf32>
      %cst_34 = arith.constant dense<0xFF800000> : vector<128xf32>
      %105 = vector.multi_reduction <maximumf>, %104, %cst_34 [1] : vector<128x128xf32> to vector<128xf32>
      %106 = vector.shape_cast %105 : vector<128xf32> to vector<128x1xf32>
      %107 = vector.broadcast %106 : vector<128x1xf32> to vector<128x128xf32>
      %108 = arith.subf %104, %107 : vector<128x128xf32>
      %109 = math.exp %108 : vector<128x128xf32>
      %cst_35 = arith.constant dense<0.000000e+00> : vector<128xf32>
      %110 = vector.multi_reduction <add>, %109, %cst_35 [1] : vector<128x128xf32> to vector<128xf32>
      %111 = vector.shape_cast %110 : vector<128xf32> to vector<128x1xf32>
      %112 = arith.truncf %109 : vector<128x128xf32> to vector<128x128xbf16>
      %113 = vector.extract_strided_slice %15 {offsets = [0, 160], sizes = [128, 32], strides = [1, 1]} : vector<128x192xbf16> to vector<128x32xbf16>
      %cst_36 = arith.constant dense<0.000000e+00> : vector<128x32xf32>
      %114 = tpu.matmul %112, %113, %cst_36 {dimension_numbers = #tpu.dot_dimension_numbers<[1], [0], [0], [1], [0, 0, 1, 1], [], []>} : vector<128x128xbf16>, vector<128x32xbf16>, vector<128x32xf32> -> vector<128x32xf32>
      %115 = tpu.reciprocal %111 {approx = true} : vector<128x1xf32> -> vector<128x1xf32>
      %116 = vector.broadcast %115 : vector<128x1xf32> to vector<128x32xf32>
      %117 = arith.mulf %114, %116 : vector<128x32xf32>
      %118 = arith.addf %101, %117 : vector<128x32xf32>
      %119 = vector.broadcast %7 : vector<1x32xf32> to vector<128x32xf32>
      %120 = arith.addf %118, %119 : vector<128x32xf32>
      %121 = arith.index_cast %10 : i32 to index
      %c0_37 = arith.constant 0 : index
      %122 = vector.load %arg5[%121, %c0_37] : memref<256x32xf32, #tpu.memory_space<vmem>>, vector<128x32xf32>
      tpu.vector_store %arg5[%121, %c0_37], %120 {strides = array<i32>} : memref<256x32xf32, #tpu.memory_space<vmem>>, vector<128x32xf32>,
    }
    %c2_i32_9 = arith.constant 2 : i32
    return
  }
  func.func @transform_0(%arg0: i32) -> (i32, i32) {
    %c0_i32 = arith.constant 0 : i32
    %c0_i32_0 = arith.constant 0 : i32
    return %arg0, %c0_i32 : i32, i32
  }
  func.func @transform_1(%arg0: i32) -> (i32, i32) {
    %c0_i32 = arith.constant 0 : i32
    %c0_i32_0 = arith.constant 0 : i32
    %c0_i32_1 = arith.constant 0 : i32
    return %c0_i32, %c0_i32_0 : i32, i32
  }
  func.func @transform_2(%arg0: i32) -> (i32, i32) {
    %c0_i32 = arith.constant 0 : i32
    %c0_i32_0 = arith.constant 0 : i32
    %c0_i32_1 = arith.constant 0 : i32
    return %c0_i32, %c0_i32_0 : i32, i32
  }
  func.func @transform_3(%arg0: i32) -> (i32, i32) {
    %c0_i32 = arith.constant 0 : i32
    %c0_i32_0 = arith.constant 0 : i32
    %c0_i32_1 = arith.constant 0 : i32
    return %c0_i32, %c0_i32_0 : i32, i32
  }
  func.func @transform_4(%arg0: i32) -> (i32, i32) {
    %c0_i32 = arith.constant 0 : i32
    %c0_i32_0 = arith.constant 0 : i32
    return %arg0, %c0_i32 : i32, i32
  }
}

</mosaic_0001>

<bundles_post_ra>
// kernel: attention1_forward.1
= control target key start
LH: loop header
LB: loop body
LE: loop exit
PB: predicated region body
PF: predicated region fallthrough
CT: control target
= control target key end

     0   :  { %s5085_s15 = smov 0   ;;  %s7037_s0 = inlined_call_operand.vmem [shape: f32[512,32], index: 0, kind: input, shape index: {}]   ;;  %s7038_s1 = inlined_call_operand.vmem [shape: bf16[32,36], index: 1, kind: input, shape index: {}]   ;;  %s7039_s2 = inlined_call_operand.vmem [shape: bf16[12,192], index: 2, kind: input, shape index: {}]   ;;  %s7040_s3 = inlined_call_operand.vmem [shape: f32[1,32], index: 3, kind: input, shape index: {}]   ;;  %s7041_s4 = inlined_call_operand.vmem [shape: f32[512,32], index: 4, kind: output, shape index: {}]  }
   0x1 LB: > { %s3745_s16 = sadd.s32 4294967295, %s5038_s15   ;;  %p3749_p0 = scmp.ge.s32.totalorder %s5038_s15, 1  ;;  %s5038_s15 = sphi %s5085_s15, %s14_s15  }
   0x2   : > { %p163_p1 = scmp.lt.s32.totalorder %s5038_s15, 3 }
   0x4   : > { %p164_p2 = pnand %p3749_p0, %p163_p1 }
   0x5   : > { %s3750_s19 = sshll.u32 (!%p164_p2), %s3745_s16, 5  ;;  %s5204_s9 = smov (!%p164_p2), 0  }
   0x6   : > { %167 = sbr.rel (%p164_p2) target bundleno = 2909 (0xb5d), region = 36  ;;  %p190_p3 = scmp.lt.s32.totalorder (!%p164_p2), %s3750_s19, 63 }
   0xb   : > { %v4622_v0 = vld [vmem:[%s7038_s1 + $0x8] sm:$0xff]   ;;  %v4623_v1 = vld [vmem:[%s7038_s1] sm:$0xff]   ;;  %s7368_s19 = smov (!%p190_p3, %s3750_s19), 63  ;;  %vm266_vm0 = vcmask 261120   ;;  %vm604_vm1 = vcmask 289792  }
   0xc   : > { %4118 = vmatprep.subr.bf16.mxu0 %v4622_v0  ;;  %4538 = vmatprep.subr.bf16.mxu1 %v4622_v0  ;;  %s3751_s22 = sshll.u32 %s7368_s19, 3  ;;  %v5160_v50 = vld [vmem:[%s7039_s2] sm:$0xff]  ;;  %v5165_v51 = vld [vmem:[%s7039_s2 + $0x8] sm:$0x33] }
   0xd   : > { %4119 = vmatpush3.bf16.msra.mxu0 %v4622_v0  ;;  %4540 = vmatpush3.bf16.msra.mxu1 %v4622_v0  ;;  %s5102_s25 = scalar_lea.vmem %s7037_s0, %s3751_s22  ;;  %s5107_s28 = scalar_lea.vmem %s7041_s4, %s3751_s22  ;;  %7091 = vst [vmem:[#allocation3_spill] sm:$0xff] %v5160_v50  ;;  %7092 = vst [vmem:[#allocation4_spill] sm:$0xff] %v5165_v51  ;;  %v5170_v52 = vld [vmem:[%s7040_s3] ss:$0 sm:$0xff] }
   0xe   : > { %4120 = vmatprep.subr.bf16.mxu0 %v4623_v1  ;;  %4539 = vmatprep.subr.bf16.mxu1 %v4623_v1  ;;  %v202_v2 = vld [vmem:[%s5102_s25] sm:$0xff]  ;;  %v203_v3 = vld [vmem:[%s5102_s25 + $0x8] sm:$0xff]  ;;  %v204_v7 = vld [vmem:[%s5102_s25 + $0x10] sm:$0xff]  ;;  %7093 = vst [vmem:[#allocation5_spill] sm:$0xff] %v5170_v52 }
   0xf   : > { %v218_v4 = vld [vmem:[%s5102_s25 + $0x80] sm:$0xff]  ;;  %v234_v5 = vpack.c.bf16 %v203_v3, %v202_v2  ;;  %v219_v6 = vld [vmem:[%s5102_s25 + $0x88] sm:$0xff]  ;;  %v205_v8 = vld [vmem:[%s5102_s25 + $0x18] sm:$0xff] }
  0x10   : > { %v242_v9 = vpack.c.bf16 %v219_v6, %v218_v4  ;;  %v235_v10 = vpack.c.bf16 %v205_v8, %v204_v7  ;;  %v220_v11 = vld [vmem:[%s5102_s25 + $0x90] sm:$0xff]  ;;  %v221_v12 = vld [vmem:[%s5102_s25 + $0x98] sm:$0xff]  ;;  %v206_v13 = vld [vmem:[%s5102_s25 + $0x20] sm:$0xff] }
  0x11   : > { %4121 = vmatpush3.bf16.msra.mxu0 %v4623_v1  ;;  %4541 = vmatpush3.bf16.msra.mxu1 %v4623_v1  ;;  %v243_v14 = vpack.c.bf16 %v221_v12, %v220_v11  ;;  %v207_v15 = vld [vmem:[%s5102_s25 + $0x28] sm:$0xff]  ;;  %v222_v16 = vld [vmem:[%s5102_s25 + $0xa0] sm:$0xff]  ;;  %v208_v20 = vld [vmem:[%s5102_s25 + $0x30] sm:$0xff] }
  0x12   : > { %4122 = vmatprep.mubr.msk.bf16.mxu0 %vm266_vm0, %v234_v5  ;;  %v223_v17 = vld [vmem:[%s5102_s25 + $0xa8] sm:$0xff]  ;;  %4138 = vmatprep.mubr.msk.bf16.mxu1 %vm266_vm0, %v242_v9  ;;  %v236_v18 = vpack.c.bf16 %v207_v15, %v206_v13  ;;  %v209_v21 = vld [vmem:[%s5102_s25 + $0x38] sm:$0xff]  ;;  %v224_v22 = vld [vmem:[%s5102_s25 + $0xb0] sm:$0xff] }
  0x13   : > { %v244_v19 = vpack.c.bf16 %v223_v17, %v222_v16  ;;  %v225_v23 = vld [vmem:[%s5102_s25 + $0xb8] sm:$0xff]  ;;  %v210_v24 = vld [vmem:[%s5102_s25 + $0x40] sm:$0xff]  ;;  %v211_v25 = vld [vmem:[%s5102_s25 + $0x48] sm:$0xff]  ;;  %v237_v28 = vpack.c.bf16 %v209_v21, %v208_v20 }
  0x14   : > { %4123 = vmatmul.mubr.msk.bf16.vlgmr.msra.gmra.mxu0 %vm266_vm0, %v235_v10  ;;  %4139 = vmatmul.mubr.msk.bf16.vlgmr.msra.gmra.mxu1 %vm266_vm0, %v243_v14  ;;  %v226_v26 = vld [vmem:[%s5102_s25 + $0xc0] sm:$0xff]  ;;  %v227_v27 = vld [vmem:[%s5102_s25 + $0xc8] sm:$0xff]  ;;  %v245_v29 = vpack.c.bf16 %v225_v23, %v224_v22  ;;  %v238_v30 = vpack.c.bf16 %v211_v25, %v210_v24  ;;  %v212_v32 = vld [vmem:[%s5102_s25 + $0x50] sm:$0xff] }
  0x15   : > { %4126 = vmatprep.mubr.msk.bf16.mxu0 %vm266_vm0, %v236_v18  ;;  %4142 = vmatprep.mubr.msk.bf16.mxu1 %vm266_vm0, %v244_v19  ;;  %v246_v31 = vpack.c.bf16 %v227_v27, %v226_v26  ;;  %v213_v33 = vld [vmem:[%s5102_s25 + $0x58] sm:$0xff]  ;;  %v228_v34 = vld [vmem:[%s5102_s25 + $0xd0] sm:$0xff]  ;;  %v214_v36 = vld [vmem:[%s5102_s25 + $0x60] sm:$0xff] }
  0x16   : > { %v229_v35 = vld [vmem:[%s5102_s25 + $0xd8] sm:$0xff]  ;;  %v215_v37 = vld [vmem:[%s5102_s25 + $0x68] sm:$0xff]  ;;  %v230_v38 = vld [vmem:[%s5102_s25 + $0xe0] sm:$0xff]  ;;  %v239_v40 = vpack.c.bf16 %v213_v33, %v212_v32 }
  0x17   : > { %v231_v39 = vld [vmem:[%s5102_s25 + $0xe8] sm:$0xff]  ;;  %v247_v41 = vpack.c.bf16 %v229_v35, %v228_v34  ;;  %v240_v42 = vpack.c.bf16 %v215_v37, %v214_v36  ;;  %v216_v44 = vld [vmem:[%s5102_s25 + $0x70] sm:$0xff]  ;;  %v217_v45 = vld [vmem:[%s5102_s25 + $0x78] sm:$0xff] }
  0x18   : > { %v248_v43 = vpack.c.bf16 %v231_v39, %v230_v38  ;;  %v232_v46 = vld [vmem:[%s5102_s25 + $0xf0] sm:$0xff]  ;;  %v233_v47 = vld [vmem:[%s5102_s25 + $0xf8] sm:$0xff]  ;;  %v241_v48 = vpack.c.bf16 %v217_v45, %v216_v44 }
  0x19   : > { %v249_v49 = vpack.c.bf16 %v233_v47, %v232_v46 }
  0x1c   : > { %4127 = vmatmul.mubr.msk.bf16.gmra.mxu0 %vm266_vm0, %v237_v28  ;;  %4143 = vmatmul.mubr.msk.bf16.gmra.mxu1 %vm266_vm0, %v245_v29 }
  0x1d   : > { %4130 = vmatprep.mubr.msk.bf16.mxu0 %vm266_vm0, %v238_v30  ;;  %4146 = vmatprep.mubr.msk.bf16.mxu1 %vm266_vm0, %v246_v31 }
  0x24   : > { %4131 = vmatmul.mubr.msk.bf16.gmra.mxu0 %vm266_vm0, %v239_v40  ;;  %4147 = vmatmul.mubr.msk.bf16.gmra.mxu1 %vm266_vm0, %v247_v41 }
  0x25   : > { %4134 = vmatprep.mubr.msk.bf16.mxu0 %vm266_vm0, %v240_v42  ;;  %4150 = vmatprep.mubr.msk.bf16.mxu1 %vm266_vm0, %v248_v43 }
  0x2c   : > { %4135 = vmatmul.mubr.msk.bf16.gmra.mxu0 %vm266_vm0, %v241_v48  ;;  %4151 = vmatmul.mubr.msk.bf16.gmra.mxu1 %vm266_vm0, %v249_v49 }
  0xd4   : > { %v4124_v53 = vpop.f32.mrf.mxu0  ;;  %v4140_v55 = vpop.f32.mrf.mxu1 }
  0xd5   : > { %v3878_v54 = vpack.c.bf16 %v4124_v53, %v4124_v53  ;;  %v3894_v56 = vpack.c.bf16 %v4140_v55, %v4140_v55 }
  0xd6   : > { %v349_v57 = vpop.f32.mrf.mxu0  ;;  %v413_v59 = vpop.f32.mrf.mxu1 }
  0xd7   : > { %607 = vst.msk [vmem:[#allocation2 + $0x8] sm:$0xf] %vm604_vm1, %v3878_v54  ;;  %v3876_v58 = vpack.c.bf16 %v349_v57, %v349_v57  ;;  %623 = vst.msk [vmem:[#allocation2 + $0x48] sm:$0xf] %vm604_vm1, %v3894_v56  ;;  %v3892_v60 = vpack.c.bf16 %v413_v59, %v413_v59 }
  0xd8   : > { %v4125_v61 = vpop.f32.mrf.mxu0  ;;  %v4141_v63 = vpop.f32.mrf.mxu1 }
  0xd9   : > { %605 = vst.msk [vmem:[#allocation2] sm:$0xf] %vm604_vm1, %v3876_v58  ;;  %v3879_v62 = vpack.c.bf16 %v4125_v61, %v4125_v61  ;;  %621 = vst.msk [vmem:[#allocation2 + $0x40] sm:$0xf] %vm604_vm1, %v3892_v60  ;;  %v3895_v0 = vpack.c.bf16 %v4141_v63, %v4141_v63 }
  0xda   : > { %v352_v1 = vpop.f32.mrf.mxu0  ;;  %v416_v3 = vpop.f32.mrf.mxu1 }
  0xdb   : > { %608 = vst.msk [vmem:[#allocation2 + $0xc] sm:$0xf] %vm604_vm1, %v3879_v62  ;;  %v3877_v2 = vpack.c.bf16 %v352_v1, %v352_v1  ;;  %624 = vst.msk [vmem:[#allocation2 + $0x4c] sm:$0xf] %vm604_vm1, %v3895_v0  ;;  %v3893_v4 = vpack.c.bf16 %v416_v3, %v416_v3 }
  0xdc   : > { %v4128_v5 = vpop.f32.mrf.mxu0  ;;  %v4144_v7 = vpop.f32.mrf.mxu1 }
  0xdd   : > { %606 = vst.msk [vmem:[#allocation2 + $0x4] sm:$0xf] %vm604_vm1, %v3877_v2  ;;  %v3882_v6 = vpack.c.bf16 %v4128_v5, %v4128_v5  ;;  %622 = vst.msk [vmem:[#allocation2 + $0x44] sm:$0xf] %vm604_vm1, %v3893_v4  ;;  %v3898_v8 = vpack.c.bf16 %v4144_v7, %v4144_v7 }
  0xde   : > { %v365_v9 = vpop.f32.mrf.mxu0  ;;  %v429_v11 = vpop.f32.mrf.mxu1 }
  0xdf   : > { %611 = vst.msk [vmem:[#allocation2 + $0x18] sm:$0xf] %vm604_vm1, %v3882_v6  ;;  %v3880_v10 = vpack.c.bf16 %v365_v9, %v365_v9  ;;  %627 = vst.msk [vmem:[#allocation2 + $0x58] sm:$0xf] %vm604_vm1, %v3898_v8  ;;  %v3896_v12 = vpack.c.bf16 %v429_v11, %v429_v11 }
  0xe0   : > { %v4129_v13 = vpop.f32.mrf.mxu0  ;;  %v4145_v15 = vpop.f32.mrf.mxu1 }
  0xe1   : > { %609 = vst.msk [vmem:[#allocation2 + $0x10] sm:$0xf] %vm604_vm1, %v3880_v10  ;;  %v3883_v14 = vpack.c.bf16 %v4129_v13, %v4129_v13  ;;  %625 = vst.msk [vmem:[#allocation2 + $0x50] sm:$0xf] %vm604_vm1, %v3896_v12  ;;  %v3899_v16 = vpack.c.bf16 %v4145_v15, %v4145_v15 }
  0xe2   : > { %v368_v17 = vpop.f32.mrf.mxu0  ;;  %v432_v19 = vpop.f32.mrf.mxu1 }
  0xe3   : > { %612 = vst.msk [vmem:[#allocation2 + $0x1c] sm:$0xf] %vm604_vm1, %v3883_v14  ;;  %v3881_v18 = vpack.c.bf16 %v368_v17, %v368_v17  ;;  %628 = vst.msk [vmem:[#allocation2 + $0x5c] sm:$0xf] %vm604_vm1, %v3899_v16  ;;  %v3897_v20 = vpack.c.bf16 %v432_v19, %v432_v19 }
  0xe4   : > { %v4132_v21 = vpop.f32.mrf.mxu0  ;;  %v4148_v23 = vpop.f32.mrf.mxu1 }
  0xe5   : > { %610 = vst.msk [vmem:[#allocation2 + $0x14] sm:$0xf] %vm604_vm1, %v3881_v18  ;;  %v3886_v22 = vpack.c.bf16 %v4132_v21, %v4132_v21  ;;  %626 = vst.msk [vmem:[#allocation2 + $0x54] sm:$0xf] %vm604_vm1, %v3897_v20  ;;  %v3902_v24 = vpack.c.bf16 %v4148_v23, %v4148_v23 }
  0xe6   : > { %v381_v25 = vpop.f32.mrf.mxu0  ;;  %v445_v27 = vpop.f32.mrf.mxu1 }
  0xe7   : > { %615 = vst.msk [vmem:[#allocation2 + $0x28] sm:$0xf] %vm604_vm1, %v3886_v22  ;;  %v3884_v26 = vpack.c.bf16 %v381_v25, %v381_v25  ;;  %631 = vst.msk [vmem:[#allocation2 + $0x68] sm:$0xf] %vm604_vm1, %v3902_v24  ;;  %v3900_v28 = vpack.c.bf16 %v445_v27, %v445_v27 }
  0xe8   : > { %v4133_v29 = vpop.f32.mrf.mxu0  ;;  %v4149_v31 = vpop.f32.mrf.mxu1 }
  0xe9   : > { %613 = vst.msk [vmem:[#allocation2 + $0x20] sm:$0xf] %vm604_vm1, %v3884_v26  ;;  %v3887_v30 = vpack.c.bf16 %v4133_v29, %v4133_v29  ;;  %629 = vst.msk [vmem:[#allocation2 + $0x60] sm:$0xf] %vm604_vm1, %v3900_v28  ;;  %v3903_v32 = vpack.c.bf16 %v4149_v31, %v4149_v31 }
  0xea   : > { %v384_v33 = vpop.f32.mrf.mxu0  ;;  %v448_v35 = vpop.f32.mrf.mxu1 }
  0xeb   : > { %616 = vst.msk [vmem:[#allocation2 + $0x2c] sm:$0xf] %vm604_vm1, %v3887_v30  ;;  %v3885_v34 = vpack.c.bf16 %v384_v33, %v384_v33  ;;  %632 = vst.msk [vmem:[#allocation2 + $0x6c] sm:$0xf] %vm604_vm1, %v3903_v32  ;;  %v3901_v36 = vpack.c.bf16 %v448_v35, %v448_v35 }
  0xec   : > { %v4136_v37 = vpop.f32.mrf.mxu0  ;;  %v4152_v39 = vpop.f32.mrf.mxu1 }
  0xed   : > { %614 = vst.msk [vmem:[#allocation2 + $0x24] sm:$0xf] %vm604_vm1, %v3885_v34  ;;  %v3890_v38 = vpack.c.bf16 %v4136_v37, %v4136_v37  ;;  %630 = vst.msk [vmem:[#allocation2 + $0x64] sm:$0xf] %vm604_vm1, %v3901_v36  ;;  %v3906_v40 = vpack.c.bf16 %v4152_v39, %v4152_v39 }
  0xee   : > { %v397_v41 = vpop.f32.mrf.mxu0  ;;  %v461_v43 = vpop.f32.mrf.mxu1 }
  0xef   : > { %619 = vst.msk [vmem:[#allocation2 + $0x38] sm:$0xf] %vm604_vm1, %v3890_v38  ;;  %v3888_v42 = vpack.c.bf16 %v397_v41, %v397_v41  ;;  %635 = vst.msk [vmem:[#allocation2 + $0x78] sm:$0xf] %vm604_vm1, %v3906_v40  ;;  %v3904_v44 = vpack.c.bf16 %v461_v43, %v461_v43 }
  0xf0   : > { %v4137_v45 = vpop.f32.mrf.mxu0  ;;  %v4153_v47 = vpop.f32.mrf.mxu1 }
  0xf1   : > { %617 = vst.msk [vmem:[#allocation2 + $0x30] sm:$0xf] %vm604_vm1, %v3888_v42  ;;  %v3891_v46 = vpack.c.bf16 %v4137_v45, %v4137_v45  ;;  %633 = vst.msk [vmem:[#allocation2 + $0x70] sm:$0xf] %vm604_vm1, %v3904_v44  ;;  %v3907_v48 = vpack.c.bf16 %v4153_v47, %v4153_v47 }
  0xf2   : > { %v400_v49 = vpop.f32.mrf.mxu0  ;;  %v464_v54 = vpop.f32.mrf.mxu1 }
  0xf3   : > { %620 = vst.msk [vmem:[#allocation2 + $0x3c] sm:$0xf] %vm604_vm1, %v3891_v46  ;;  %v3889_v53 = vpack.c.bf16 %v400_v49, %v400_v49  ;;  %636 = vst.msk [vmem:[#allocation2 + $0x7c] sm:$0xf] %vm604_vm1, %v3907_v48  ;;  %v3905_v55 = vpack.c.bf16 %v464_v54, %v464_v54 }
  0xf5   : > { %618 = vst.msk [vmem:[#allocation2 + $0x34] sm:$0xf] %vm604_vm1, %v3889_v53  ;;  %634 = vst.msk [vmem:[#allocation2 + $0x74] sm:$0xf] %vm604_vm1, %v3905_v55 }
  0xf6 LB: >> { %v7094_v51 = vld [vmem:[#allocation4_spill] sm:$0xff]  ;;  %v7095_v50 = vld [vmem:[#allocation3_spill] sm:$0xff]  ;;  %s3804_s10 = sshll.u32 %s5042_s9, 7  ;;  %vm756_vm2 = vcmask 1045504   ;;  %s5044_s14 = smov 116   ;;  %v5045_v63 = vmov 0   ;;  %s5042_s9 = sphi %s5204_s9, %s645_s9  }
  0xf7   : >> { %s647_s11 = sshra.s32 %s3804_s10, 3  ;;  %v3815_v57 = vcombine.high %v7095_v50, %v7094_v51  ;;  %v3814_v58 = vcombine.low %v7095_v50, %v7094_v51  ;;  %795 = vmatprep.mubr.bf16.mxu0 %v5045_v63  ;;  %vm908_vm3 = vcmask 15360   ;;  %s5046_s16 = smov 114   ;;  %vm731_vm4 = vcmask 97280  }
  0xf8   : >> { %s3805_s12 = sshll.u32 %s647_s11, 2  ;;  %s5047_s17 = smov 104  }
  0xf9   : >> { %s5212_s13 = scalar_lea.vmem [#allocation2], %s3805_s12  ;;  %3816 = vmatprep.subr.msk.bf16.mxu0 %vm756_vm2, %v3815_v57  ;;  %v758_v61 = vsel %vm756_vm2, %v3814_v58, 0  ;;  %s5048_s18 = smov 126  }
  0xfa   : >> { %778 = vmatpush1.bf16.msra.mxu0 %v758_v61  ;;  %s5049_s19 = smov 112   ;;  %s5050_s20 = smov 96  }
  0xfb   : >> { %s5051_s21 = smov 124   ;;  %s5052_s22 = smov 64  }
  0xfc   : >> { %v5215_v56 = vld [vmem:[%s5212_s13 + $0x38] sm:$0xff]   ;;  %v5222_v59 = vld [vmem:[%s5212_s13 + $0x28] sm:$0xff]   ;;  %v5226_v60 = vld [vmem:[%s5212_s13 + $0x20] sm:$0xff]   ;;  %s5053_s23 = smov 110   ;;  %s5054_s24 = smov 122  }
  0xfd   : >> { %906 = vrot.lane.b32.xlu0 %v5215_v56, %s5044_s14  ;;  %902 = vrot.lane.b32.xlu1 %v5222_v59, %s5044_s14  ;;  %v5230_v62 = vld [vmem:[%s5212_s13 + $0x30] sm:$0xff]   ;;  %v5234_v0 = vld [vmem:[%s5212_s13] sm:$0xff]   ;;  %s5055_s25 = smov 32   ;;  %s5056_s26 = smov 108  }
  0xfe   : >> { %v5238_v1 = vld [vmem:[%s5212_s13 + $0x10] sm:$0xff]   ;;  %v5242_v2 = vld [vmem:[%s5212_s13 + $0x18] sm:$0xff]   ;;  %4170 = vmatprep.mubr.msk.bf16.mxu1 %vm908_vm3, %v5234_v0  ;;  %v5249_v3 = vld [vmem:[%s5212_s13 + $0x8] sm:$0xff]   ;;  %s5057_s27 = smov 120   ;;  %s5058_s29 = smov 106  }
  0xff   : >> { %s5059_s30 = smov 118   ;;  %s6925_s5 = scalar_lea.vmem %s5107_s28, %s3804_s10 }
 0x100   : >> { %s645_s9 = sadd.s32 1, %s5042_s9  }
 0x101   : >> { %904 = vrot.lane.b32.xlu0 %v5230_v62, %s5044_s14  ;;  %900 = vrot.lane.b32.xlu1 %v5226_v60, %s5044_s14  ;;  %p642_p4 = scmp.ge.s32.totalorder %s645_s9, 2  }
 0x105   : >> { %898 = vrot.lane.b32.xlu0 %v5242_v2, %s5044_s14  ;;  %896 = vrot.lane.b32.xlu1 %v5238_v1, %s5044_s14 }
 0x109   : >> { %894 = vrot.lane.b32.xlu0 %v5249_v3, %s5044_s14  ;;  %892 = vrot.lane.b32.xlu1 %v5234_v0, %s5044_s14 }
 0x10d   : >> { %1349 = vrot.lane.b32.xlu0 %v5215_v56, %s5046_s16  ;;  %707 = vrot.lane.b32.xlu1 %v5234_v0, %s5047_s17 }
 0x111   : >> { %1347 = vrot.lane.b32.xlu0 %v5230_v62, %s5046_s16  ;;  %709 = vrot.lane.b32.xlu1 %v5249_v3, %s5047_s17 }
 0x115   : >> { %1345 = vrot.lane.b32.xlu0 %v5222_v59, %s5046_s16  ;;  %711 = vrot.lane.b32.xlu1 %v5238_v1, %s5047_s17 }
 0x119   : >> { %1343 = vrot.lane.b32.xlu0 %v5226_v60, %s5046_s16  ;;  %713 = vrot.lane.b32.xlu1 %v5242_v2, %s5047_s17 }
 0x11d   : >> { %1341 = vrot.lane.b32.xlu0 %v5242_v2, %s5046_s16  ;;  %715 = vrot.lane.b32.xlu1 %v5226_v60, %s5047_s17 }
 0x121   : >> { %1339 = vrot.lane.b32.xlu0 %v5238_v1, %s5046_s16  ;;  %717 = vrot.lane.b32.xlu1 %v5222_v59, %s5047_s17 }
 0x125   : >> { %1337 = vrot.lane.b32.xlu0 %v5249_v3, %s5046_s16  ;;  %719 = vrot.lane.b32.xlu1 %v5230_v62, %s5047_s17 }
 0x129   : >> { %1335 = vrot.lane.b32.xlu0 %v5234_v0, %s5046_s16  ;;  %1319 = vrot.lane.b32.xlu1 %v5234_v0, %s5048_s18 }
 0x12d   : >> { %721 = vrot.lane.b32.xlu0 %v5215_v56, %s5047_s17  ;;  %1321 = vrot.lane.b32.xlu1 %v5249_v3, %s5048_s18 }
 0x131   : >> { %1323 = vrot.lane.b32.xlu0 %v5238_v1, %s5048_s18  ;;  %1325 = vrot.lane.b32.xlu1 %v5242_v2, %s5048_s18 }
 0x135   : >> { %1327 = vrot.lane.b32.xlu0 %v5226_v60, %s5048_s18  ;;  %1329 = vrot.lane.b32.xlu1 %v5222_v59, %s5048_s18 }
 0x139   : >> { %1331 = vrot.lane.b32.xlu0 %v5230_v62, %s5048_s18  ;;  %1333 = vrot.lane.b32.xlu1 %v5215_v56, %s5048_s18 }
 0x13d   : >> { %1823 = vrot.lane.b32.xlu0 %v5215_v56, %s5049_s19  ;;  %1819 = vrot.lane.b32.xlu1 %v5222_v59, %s5049_s19 }
 0x141   : >> { %1821 = vrot.lane.b32.xlu0 %v5230_v62, %s5049_s19 }
 0x145   : >> { %1817 = vrot.lane.b32.xlu0 %v5226_v60, %s5049_s19 }
 0x16f   : >> { %v907_v4 = vpop.permute.xlu0 %906  ;;  %v903_v5 = vpop.permute.xlu1 %902 }
 0x170   : >> { %4542 = vmatprep.subr.msk.bf16.mxu1 %vm908_vm3, %v907_v4  ;;  %v955_v6 = vsel %vm908_vm3, %v907_v4, 0  ;;  %v949_v14 = vsel %vm908_vm3, %v903_v5, 0 }
 0x171   : >> { %4155 = vmatpush3.bf16.xpose.msra.mxu1 %v955_v6 }
 0x173   : >> { %v905_v7 = vpop.permute.xlu0 %904  ;;  %v901_v8 = vpop.permute.xlu1 %900 }
 0x174   : >> { %4543 = vmatprep.subr.msk.bf16.mxu1 %vm908_vm3, %v905_v7  ;;  %v952_v9 = vsel %vm908_vm3, %v905_v7, 0  ;;  %v946_v18 = vsel %vm908_vm3, %v901_v8, 0 }
 0x177   : >> { %v897_v10 = vpop.permute.xlu1 %896  ;;  %v899_v11 = vpop.permute.xlu0 %898 }
 0x178   : >> { %v943_v21 = vsel %vm908_vm3, %v899_v11, 0  ;;  %v940_v24 = vsel %vm908_vm3, %v897_v10, 0 }
 0x179   : >> { %4157 = vmatpush3.bf16.xpose.msra.mxu1 %v952_v9 }
 0x17a   : >> { %4544 = vmatprep.subr.msk.bf16.mxu1 %vm908_vm3, %v903_v5 }
 0x17b   : >> { %v893_v12 = vpop.permute.xlu1 %892  ;;  %v895_v15 = vpop.permute.xlu0 %894 }
 0x17c   : >> { %v937_v28 = vsel %vm908_vm3, %v895_v15, 0  ;;  %v934_v31 = vsel %vm908_vm3, %v893_v12, 0 }
 0x17f   : >> { %v708_v13 = vpop.permute.xlu1 %707  ;;  %v1350_v17 = vpop.permute.xlu0 %1349 }
 0x180   : >> { %3817 = vmatmul.mubr.msk.bf16.vlgmr.msra.gmra.mxu0 %vm731_vm4, %v708_v13  ;;  %v1397_v34 = vsel %vm908_vm3, %v1350_v17, 0 }
 0x181   : >> { %4159 = vmatpush3.bf16.xpose.msra.mxu1 %v949_v14  ;;  %805 = vmatprep.mubr.bf16.mxu0 %v5045_v63 }
 0x182   : >> { %4545 = vmatprep.subr.msk.bf16.mxu1 %vm908_vm3, %v901_v8 }
 0x183   : >> { %v710_v16 = vpop.permute.xlu1 %709  ;;  %v1348_v19 = vpop.permute.xlu0 %1347 }
 0x184   : >> { %v1394_v37 = vsel %vm908_vm3, %v1348_v19, 0 }
 0x187   : >> { %v712_v20 = vpop.permute.xlu1 %711  ;;  %v1346_v22 = vpop.permute.xlu0 %1345 }
 0x188   : >> { %3818 = vmatmul.mubr.msk.bf16.gmra.mxu0 %vm731_vm4, %v710_v16  ;;  %v1391_v38 = vsel %vm908_vm3, %v1346_v22, 0 }
 0x189   : >> { %4161 = vmatpush3.bf16.xpose.msra.mxu1 %v946_v18  ;;  %815 = vmatprep.mubr.bf16.mxu0 %v5045_v63 }
 0x18a   : >> { %4546 = vmatprep.subr.msk.bf16.mxu1 %vm908_vm3, %v899_v11 }
 0x18b   : >> { %v714_v23 = vpop.permute.xlu1 %713  ;;  %v1344_v25 = vpop.permute.xlu0 %1343 }
 0x18c   : >> { %v1388_v39 = vsel %vm908_vm3, %v1344_v25, 0 }
 0x18f   : >> { %v716_v26 = vpop.permute.xlu1 %715  ;;  %v1342_v27 = vpop.permute.xlu0 %1341 }
 0x190   : >> { %3819 = vmatmul.mubr.msk.bf16.gmra.mxu0 %vm731_vm4, %v712_v20  ;;  %v1385_v41 = vsel %vm908_vm3, %v1342_v27, 0 }
 0x191   : >> { %4163 = vmatpush3.bf16.xpose.msra.mxu1 %v943_v21  ;;  %825 = vmatprep.mubr.bf16.mxu0 %v5045_v63 }
 0x192   : >> { %4547 = vmatprep.subr.msk.bf16.mxu1 %vm908_vm3, %v897_v10 }
 0x193   : >> { %v1340_v29 = vpop.permute.xlu0 %1339  ;;  %v718_v30 = vpop.permute.xlu1 %717 }
 0x194   : >> { %v1382_v42 = vsel %vm908_vm3, %v1340_v29, 0 }
 0x197   : >> { %v1338_v32 = vpop.permute.xlu0 %1337  ;;  %v720_v33 = vpop.permute.xlu1 %719 }
 0x198   : >> { %3820 = vmatmul.mubr.msk.bf16.gmra.mxu0 %vm731_vm4, %v714_v23  ;;  %v1379_v43 = vsel %vm908_vm3, %v1338_v32, 0 }
 0x199   : >> { %4165 = vmatpush3.bf16.xpose.msra.mxu1 %v940_v24  ;;  %835 = vmatprep.mubr.bf16.mxu0 %v5045_v63 }
 0x19a   : >> { %4548 = vmatprep.subr.msk.bf16.mxu1 %vm908_vm3, %v895_v15 }
 0x19b   : >> { %v1336_v35 = vpop.permute.xlu0 %1335  ;;  %v1320_v40 = vpop.permute.xlu1 %1319 }
 0x19c   : >> { %v1376_v44 = vsel %vm908_vm3, %v1336_v35, 0 }
 0x19f   : >> { %v722_v36 = vpop.permute.xlu0 %721  ;;  %v1322_v45 = vpop.permute.xlu1 %1321 }
 0x1a0   : >> { %3821 = vmatmul.mubr.msk.bf16.gmra.mxu0 %vm731_vm4, %v716_v26 }
 0x1a1   : >> { %4167 = vmatpush3.bf16.xpose.msra.mxu1 %v937_v28  ;;  %845 = vmatprep.mubr.bf16.mxu0 %v5045_v63 }
 0x1a2   : >> { %4549 = vmatprep.subr.msk.bf16.mxu1 %vm908_vm3, %v893_v12 }
 0x1a3   : >> { %v1324_v46 = vpop.permute.xlu0 %1323  ;;  %v1326_v47 = vpop.permute.xlu1 %1325 }
 0x1a7   : >> { %v1328_v48 = vpop.permute.xlu0 %1327  ;;  %v1330_v49 = vpop.permute.xlu1 %1329 }
 0x1a8   : >> { %3822 = vmatmul.mubr.msk.bf16.gmra.mxu0 %vm731_vm4, %v718_v30 }
 0x1a9   : >> { %4169 = vmatpush3.bf16.xpose.msra.mxu1 %v934_v31  ;;  %855 = vmatprep.mubr.bf16.mxu0 %v5045_v63 }
 0x1aa   : >> { %4550 = vmatprep.subr.msk.bf16.mxu1 %vm908_vm3, %v1350_v17 }
 0x1ab   : >> { %v1332_v53 = vpop.permute.xlu0 %1331  ;;  %v1334_v54 = vpop.permute.xlu1 %1333 }
 0x1b0   : >> { %4171 = vmatmul.mubr.msk.bf16.vlgmr.msra.gmra.mxu1 %vm908_vm3, %v5249_v3  ;;  %3823 = vmatmul.mubr.msk.bf16.gmra.mxu0 %vm731_vm4, %v720_v33 }
 0x1b1   : >> { %4219 = vmatpush3.bf16.xpose.msra.mxu1 %v1397_v34  ;;  %865 = vmatprep.mubr.bf16.mxu0 %v5045_v63 }
 0x1b2   : >> { %4551 = vmatprep.subr.msk.bf16.mxu1 %vm908_vm3, %v1348_v19  ;;  %4174 = vmatprep.mubr.msk.bf16.mxu1 %vm908_vm3, %v5238_v1 }
 0x1b8   : >> { %4175 = vmatmul.mubr.msk.bf16.gmra.mxu1 %vm908_vm3, %v5242_v2  ;;  %3824 = vmatmul.mubr.msk.bf16.gmra.mxu0 %vm731_vm4, %v722_v36 }
 0x1b9   : >> { %4221 = vmatpush3.bf16.xpose.msra.mxu1 %v1394_v37  ;;  %4178 = vmatprep.mubr.msk.bf16.mxu1 %vm908_vm3, %v5226_v60 }
 0x1ba   : >> { %4552 = vmatprep.subr.msk.bf16.mxu1 %vm908_vm3, %v1346_v22 }
 0x1c0   : >> { %4179 = vmatmul.mubr.msk.bf16.gmra.mxu1 %vm908_vm3, %v5222_v59 }
 0x1c1   : >> { %4223 = vmatpush3.bf16.xpose.msra.mxu1 %v1391_v38  ;;  %4182 = vmatprep.mubr.msk.bf16.mxu1 %vm908_vm3, %v5230_v62 }
 0x1c2   : >> { %4553 = vmatprep.subr.msk.bf16.mxu1 %vm908_vm3, %v1344_v25 }
 0x1c8   : >> { %4183 = vmatmul.mubr.msk.bf16.gmra.mxu1 %vm908_vm3, %v5215_v56 }
 0x1c9   : >> { %4225 = vmatpush3.bf16.xpose.msra.mxu1 %v1388_v39  ;;  %4234 = vmatprep.mubr.msk.bf16.mxu1 %vm908_vm3, %v1320_v40 }
 0x1ca   : >> { %4554 = vmatprep.subr.msk.bf16.mxu1 %vm908_vm3, %v1342_v27 }
 0x1d1   : >> { %4227 = vmatpush3.bf16.xpose.msra.mxu1 %v1385_v41 }
 0x1d2   : >> { %4555 = vmatprep.subr.msk.bf16.mxu1 %vm908_vm3, %v1340_v29 }
 0x1d9   : >> { %4229 = vmatpush3.bf16.xpose.msra.mxu1 %v1382_v42 }
 0x1da   : >> { %4556 = vmatprep.subr.msk.bf16.mxu1 %vm908_vm3, %v1338_v32 }
 0x1e1   : >> { %4231 = vmatpush3.bf16.xpose.msra.mxu1 %v1379_v43 }
 0x1e2   : >> { %4557 = vmatprep.subr.msk.bf16.mxu1 %vm908_vm3, %v1336_v35 }
 0x1e9   : >> { %4233 = vmatpush3.bf16.xpose.msra.mxu1 %v1376_v44 }
 0x1f0   : >> { %4235 = vmatmul.mubr.msk.bf16.vlgmr.msra.gmra.mxu1 %vm908_vm3, %v1322_v45 }
 0x1f1   : >> { %4238 = vmatprep.mubr.msk.bf16.mxu1 %vm908_vm3, %v1324_v46 }
 0x1f8   : >> { %4239 = vmatmul.mubr.msk.bf16.gmra.mxu1 %vm908_vm3, %v1326_v47 }
 0x1f9   : >> { %4242 = vmatprep.mubr.msk.bf16.mxu1 %vm908_vm3, %v1328_v48 }
 0x200   : >> { %4243 = vmatmul.mubr.msk.bf16.gmra.mxu1 %vm908_vm3, %v1330_v49 }
 0x201   : >> { %4246 = vmatprep.mubr.msk.bf16.mxu1 %vm908_vm3, %v1332_v53 }
 0x208   : >> { %4247 = vmatmul.mubr.msk.bf16.gmra.mxu1 %vm908_vm3, %v1334_v54 }
 0x240   : >> { %v797_v55 = vpop.f32.mrf.mxu0 }
 0x242   : >> { %v5354_v57 = vpop.f32.mrf.mxu0 }
 0x243   : >> { %7096 = vst [vmem:[#allocation6_spill] sm:$0xff] %v5354_v57  ;;  %v5535_v57 = vpop.permute.xlu0 %1823 }
 0x244   : >> { %v801_v58 = vpop.f32.mrf.mxu0 }
 0x245   : >> { %v5356_v61 = vpack.c.bf16 %v801_v58, %v797_v55 }
 0x246   : >> { %v5358_v63 = vpop.f32.mrf.mxu0 }
 0x247   : >> { %7097 = vst [vmem:[#allocation7_spill] sm:$0xff] %v5358_v63  ;;  %1624 = vrot.lane.b32.xlu1 %v5356_v61, %s5050_s20 }
 0x248   : >> { %v807_v4 = vpop.f32.mrf.mxu0 }
 0x24a   : >> { %v5362_v5 = vpop.f32.mrf.mxu0 }
 0x24b   : >> { %7098 = vst [vmem:[#allocation8_spill] sm:$0xff] %v5362_v5  ;;  %v5540_v5 = vpop.permute.xlu0 %1821 }
 0x24c   : >> { %v811_v6 = vpop.f32.mrf.mxu0 }
 0x24d   : >> { %v5364_v7 = vpack.c.bf16 %v811_v6, %v807_v4 }
 0x24e   : >> { %v5366_v8 = vpop.f32.mrf.mxu0 }
 0x24f   : >> { %7099 = vst [vmem:[#allocation9_spill] sm:$0xff] %v5366_v8  ;;  %1626 = vrot.lane.b32.xlu0 %v5364_v7, %s5050_s20 }
 0x250   : >> { %v817_v9 = vpop.f32.mrf.mxu0 }
 0x252   : >> { %v5370_v10 = vpop.f32.mrf.mxu0 }
 0x253   : >> { %7100 = vst [vmem:[#allocation10_spill] sm:$0xff] %v5370_v10  ;;  %v5545_v10 = vpop.permute.xlu0 %1817 }
 0x254   : >> { %v821_v11 = vpop.f32.mrf.mxu0  ;;  %7112 = vst [vmem:[#allocation22_spill] sm:$0xff] %v5545_v10 }
 0x255   : >> { %v5372_v12 = vpack.c.bf16 %v821_v11, %v817_v9 }
 0x256   : >> { %v5374_v13 = vpop.f32.mrf.mxu0 }
 0x257   : >> { %7101 = vst [vmem:[#allocation11_spill] sm:$0xff] %v5374_v13  ;;  %1628 = vrot.lane.b32.xlu1 %v5372_v12, %s5050_s20 }
 0x258   : >> { %v827_v14 = vpop.f32.mrf.mxu0 }
 0x25a   : >> { %v5378_v15 = vpop.f32.mrf.mxu0 }
 0x25b   : >> { %7102 = vst [vmem:[#allocation12_spill] sm:$0xff] %v5378_v15 }
 0x25c   : >> { %v831_v16 = vpop.f32.mrf.mxu0 }
 0x25d   : >> { %v5380_v17 = vpack.c.bf16 %v831_v16, %v827_v14 }
 0x25e   : >> { %v5382_v18 = vpop.f32.mrf.mxu0 }
 0x25f   : >> { %7103 = vst [vmem:[#allocation13_spill] sm:$0xff] %v5382_v18  ;;  %1630 = vrot.lane.b32.xlu1 %v5380_v17, %s5050_s20 }
 0x260   : >> { %v837_v19 = vpop.f32.mrf.mxu0 }
 0x262   : >> { %v839_v20 = vpop.f32.mrf.mxu0 }
 0x264   : >> { %v841_v21 = vpop.f32.mrf.mxu0 }
 0x265   : >> { %v5386_v22 = vpack.c.bf16 %v841_v21, %v837_v19 }
 0x266   : >> { %v843_v23 = vpop.f32.mrf.mxu0 }
 0x267   : >> { %v5388_v24 = vpack.c.bf16 %v843_v23, %v839_v20  ;;  %1632 = vrot.lane.b32.xlu1 %v5386_v22, %s5050_s20 }
 0x268   : >> { %v847_v25 = vpop.f32.mrf.mxu0 }
 0x269   : >> { %7104 = vst [vmem:[#allocation14_spill] sm:$0xff] %v5388_v24 }
 0x26a   : >> { %v849_v26 = vpop.f32.mrf.mxu0 }
 0x26c   : >> { %v851_v27 = vpop.f32.mrf.mxu0 }
 0x26d   : >> { %v5392_v28 = vpack.c.bf16 %v851_v27, %v847_v25 }
 0x26e   : >> { %v853_v29 = vpop.f32.mrf.mxu0 }
 0x26f   : >> { %v5394_v30 = vpack.c.bf16 %v853_v29, %v849_v26  ;;  %1634 = vrot.lane.b32.xlu1 %v5392_v28, %s5050_s20 }
 0x270   : >> { %v857_v31 = vpop.f32.mrf.mxu0  ;;  %v5398_v32 = vpop.f32.mrf.mxu1 }
 0x271   : >> { %7105 = vst [vmem:[#allocation15_spill] sm:$0xff] %v5394_v30 }
 0x272   : >> { %v859_v33 = vpop.f32.mrf.mxu0  ;;  %v5402_v36 = vpop.f32.mrf.mxu1 }
 0x274   : >> { %v861_v34 = vpop.f32.mrf.mxu0  ;;  %v5408_v40 = vpop.f32.mrf.mxu1 }
 0x275   : >> { %v5400_v35 = vpack.c.bf16 %v861_v34, %v857_v31 }
 0x276   : >> { %v863_v37 = vpop.f32.mrf.mxu0  ;;  %v5412_v43 = vpop.f32.mrf.mxu1 }
 0x277   : >> { %v5404_v38 = vpack.c.bf16 %v863_v37, %v859_v33  ;;  %1636 = vrot.lane.b32.xlu0 %v5400_v35, %s5050_s20  ;;  %v5509_v33 = vpop.permute.xlu1 %1819 }
 0x278   : >> { %v867_v39 = vpop.f32.mrf.mxu0  ;;  %v5419_v45 = vpop.f32.mrf.mxu1 }
 0x279   : >> { %7106 = vst [vmem:[#allocation16_spill] sm:$0xff] %v5404_v38 }
 0x27a   : >> { %v5410_v41 = vpop.f32.mrf.mxu0  ;;  %v5423_v46 = vpop.f32.mrf.mxu1 }
 0x27b   : >> { %7107 = vst [vmem:[#allocation17_spill] sm:$0xff] %v5410_v41 }
 0x27c   : >> { %v871_v42 = vpop.f32.mrf.mxu0  ;;  %v5427_v47 = vpop.f32.mrf.mxu1 }
 0x27d   : >> { %v5414_v44 = vpack.c.bf16 %v871_v42, %v867_v39 }
 0x27e   : >> { %v5431_v48 = vpop.f32.mrf.mxu1 }
 0x27f   : >> { %1638 = vrot.lane.b32.xlu1 %v5414_v44, %s5050_s20  ;;  %4186 = vmatprep.subr.bf16.mxu0 %v5414_v44 }
 0x280   : >> { %4187 = vmatpush3.bf16.msra.mxu0 %v5414_v44  ;;  %v5435_v49 = vpop.f32.mrf.mxu1 }
 0x281   : >> { %4188 = vmatprep.subr.bf16.mxu0 %v5400_v35 }
 0x282   : >> { %v5439_v53 = vpop.f32.mrf.mxu1 }
 0x284   : >> { %4189 = vmatpush3.bf16.msra.mxu0 %v5400_v35  ;;  %v5444_v54 = vpop.f32.mrf.mxu1 }
 0x285   : >> { %4190 = vmatprep.subr.bf16.mxu0 %v5392_v28 }
 0x286   : >> { %v5449_v55 = vpop.f32.mrf.mxu1 }
 0x288   : >> { %4191 = vmatpush3.bf16.msra.mxu0 %v5392_v28  ;;  %v5453_v58 = vpop.f32.mrf.mxu1 }
 0x289   : >> { %4192 = vmatprep.subr.bf16.mxu0 %v5386_v22 }
 0x28a   : >> { %v5457_v4 = vpop.f32.mrf.mxu1 }
 0x28c   : >> { %4193 = vmatpush3.bf16.msra.mxu0 %v5386_v22  ;;  %v5461_v6 = vpop.f32.mrf.mxu1 }
 0x28d   : >> { %4194 = vmatprep.subr.bf16.mxu0 %v5380_v17 }
 0x28e   : >> { %v5465_v9 = vpop.f32.mrf.mxu1 }
 0x290   : >> { %4195 = vmatpush3.bf16.msra.mxu0 %v5380_v17 }
 0x291   : >> { %4196 = vmatprep.subr.bf16.mxu0 %v5372_v12 }
 0x294   : >> { %4197 = vmatpush3.bf16.msra.mxu0 %v5372_v12 }
 0x295   : >> { %4198 = vmatprep.subr.bf16.mxu0 %v5364_v7 }
 0x296   : >> { %1058 = vmax.xlane.f32.xlu0 %v5398_v32 }
 0x298   : >> { %4199 = vmatpush3.bf16.msra.mxu0 %v5364_v7 }
 0x299   : >> { %4200 = vmatprep.subr.bf16.mxu0 %v5356_v61 }
 0x29a   : >> { %1054 = vmax.xlane.f32.xlu0 %v5402_v36 }
 0x29c   : >> { %4201 = vmatpush3.bf16.msra.mxu0 %v5356_v61 }
 0x29e   : >> { %1060 = vmax.xlane.f32.xlu0 %v5408_v40 }
 0x2a2   : >> { %1068 = vmax.xlane.f32.xlu0 %v5427_v47 }
 0x2a3   : >> { %1056 = vmax.xlane.f32.xlu1 %v5412_v43 }
 0x2a6   : >> { %1064 = vmax.xlane.f32.xlu0 %v5431_v48 }
 0x2a7   : >> { %1066 = vmax.xlane.f32.xlu1 %v5419_v45 }
 0x2aa   : >> { %1076 = vmax.xlane.f32.xlu0 %v5444_v54 }
 0x2ab   : >> { %1062 = vmax.xlane.f32.xlu1 %v5423_v46 }
 0x2ae   : >> { %1072 = vmax.xlane.f32.xlu0 %v5449_v55 }
 0x2af   : >> { %1074 = vmax.xlane.f32.xlu1 %v5435_v49 }
 0x2b0   : >> { %v5469_v11 = vpop.f32.mrf.mxu1 }
 0x2b2   : >> { %v5471_v14 = vpop.f32.mrf.mxu1  ;;  %1084 = vmax.xlane.f32.xlu0 %v5461_v6 }
 0x2b3   : >> { %1070 = vmax.xlane.f32.xlu1 %v5439_v53 }
 0x2b4   : >> { %v5475_v16 = vpop.f32.mrf.mxu1 }
 0x2b6   : >> { %1080 = vmax.xlane.f32.xlu0 %v5465_v9  ;;  %v5479_v19 = vpop.f32.mrf.mxu1 }
 0x2b7   : >> { %1082 = vmax.xlane.f32.xlu1 %v5453_v58 }
 0x2b8   : >> { %v5483_v20 = vpop.f32.mrf.mxu1 }
 0x2b9   : >> { %v5512_v34 = vpop.permute.xlu1 %1624 }
 0x2ba   : >> { %1500 = vmax.xlane.f32.xlu0 %v5469_v11  ;;  %v5487_v21 = vpop.f32.mrf.mxu1 }
 0x2bb   : >> { %1078 = vmax.xlane.f32.xlu1 %v5457_v4 }
 0x2bc   : >> { %v5491_v23 = vpop.f32.mrf.mxu1 }
 0x2be   : >> { %1502 = vmax.xlane.f32.xlu0 %v5475_v16  ;;  %v5495_v25 = vpop.f32.mrf.mxu1 }
 0x2bf   : >> { %1496 = vmax.xlane.f32.xlu1 %v5471_v14 }
 0x2c0   : >> { %v5497_v26 = vpop.f32.mrf.mxu1 }
 0x2c1   : >> { %v5547_v18 = vpop.permute.xlu0 %1626 }
 0x2c2   : >> { %1498 = vmax.xlane.f32.xlu0 %v5479_v19  ;;  %v5501_v27 = vpop.f32.mrf.mxu1 }
 0x2c3   : >> { %1504 = vmax.xlane.f32.xlu1 %v5487_v21 }
 0x2c4   : >> { %v5504_v29 = vpop.f32.mrf.mxu1 }
 0x2c6   : >> { %1508 = vmax.xlane.f32.xlu0 %v5483_v20  ;;  %v5507_v31 = vpop.f32.mrf.mxu1 }
 0x2c7   : >> { %1510 = vmax.xlane.f32.xlu1 %v5491_v23 }
 0x2c8   : >> { %v5529_v52 = vpop.f32.mrf.mxu1 }
 0x2c9   : >> { %v5516_v37 = vpop.permute.xlu1 %1628  ;;  %7108 = vst [vmem:[#allocation18_spill] sm:$0xff] %v5529_v52 }
 0x2ca   : >> { %1506 = vmax.xlane.f32.xlu0 %v5495_v25  ;;  %v5532_v63 = vpop.f32.mrf.mxu1 }
 0x2cb   : >> { %1516 = vmax.xlane.f32.xlu1 %v5497_v26  ;;  %7109 = vst [vmem:[#allocation19_spill] sm:$0xff] %v5532_v63 }
 0x2cc   : >> { %v5537_v8 = vpop.f32.mrf.mxu1 }
 0x2cd   : >> { %7110 = vst [vmem:[#allocation20_spill] sm:$0xff] %v5537_v8 }
 0x2ce   : >> { %v5542_v13 = vpop.f32.mrf.mxu1 }
 0x2cf   : >> { %1512 = vmax.xlane.f32.xlu1 %v5501_v27  ;;  %7111 = vst [vmem:[#allocation21_spill] sm:$0xff] %v5542_v13 }
 0x2d1   : >> { %v5518_v39 = vpop.permute.xlu1 %1630 }
 0x2d3   : >> { %1518 = vmax.xlane.f32.xlu1 %v5504_v29 }
 0x2d7   : >> { %1514 = vmax.xlane.f32.xlu1 %v5507_v31 }
 0x2d9   : >> { %v5522_v42 = vpop.permute.xlu1 %1632 }
 0x2e0   : >> { %1813 = vrot.lane.b32.xlu0 %v5238_v1, %s5049_s19 }
 0x2e1   : >> { %v5524_v50 = vpop.permute.xlu1 %1634 }
 0x2e8   : >> { %1815 = vrot.lane.b32.xlu1 %v5242_v2, %s5049_s19 }
 0x2e9   : >> { %v5549_v15 = vpop.permute.xlu0 %1636 }
 0x2f1   : >> { %v5526_v51 = vpop.permute.xlu1 %1638 }
 0x2f2   : >> { %4250 = vmatprep.subr.bf16.mxu0 %v5526_v51 }
 0x2ff   : >> { %1524 = vmax.xlane.f32.xlu0 %v5529_v52 }
 0x303   : >> { %1520 = vmax.xlane.f32.xlu0 %v5532_v63 }
 0x307   : >> { %1526 = vmax.xlane.f32.xlu0 %v5537_v8 }
 0x30c   : >> { %1522 = vmax.xlane.f32.xlu1 %v5542_v13 }
 0x31d   : >> { %1811 = vrot.lane.b32.xlu0 %v5249_v3, %s5049_s19  ;;  %1809 = vrot.lane.b32.xlu1 %v5234_v0, %s5049_s19 }
 0x31f   : >> { %v1059_v24 = vpop.xlane.xlu0 %1058 }
 0x320   : >> { %v1088_v52 = vsub.f32 %v5398_v32, %v1059_v24 }
 0x321   : >> { %1793 = vrot.lane.b32.xlu0 %v5234_v0, %s5051_s21  ;;  %1795 = vrot.lane.b32.xlu1 %v5249_v3, %s5051_s21 }
 0x323   : >> { %v1055_v30 = vpop.xlane.xlu0 %1054 }
 0x324   : >> { %v1086_v38 = vsub.f32 %v5402_v36, %v1055_v30 }
 0x325   : >> { %1797 = vrot.lane.b32.xlu0 %v5238_v1, %s5051_s21  ;;  %1799 = vrot.lane.b32.xlu1 %v5242_v2, %s5051_s21  ;;  %v1106_v1 = vmul.f32 1.442695, %v1088_v52 }
 0x326   : >> { %v1102_v8 = vmul.f32 1.442695, %v1086_v38 }
 0x327   : >> { %v1061_v41 = vpop.xlane.xlu0 %1060 }
 0x328   : >> { %v1089_v13 = vsub.f32 %v5408_v40, %v1061_v41  ;;  %4632 = vpow2.f32 %v1102_v8 }
 0x329   : >> { %1801 = vrot.lane.b32.xlu0 %v5226_v60, %s5051_s21  ;;  %1803 = vrot.lane.b32.xlu1 %v5222_v59, %s5051_s21 }
 0x32a   : >> { %v1108_v63 = vmul.f32 1.442695, %v1089_v13 }
 0x32b   : >> { %v1069_v0 = vpop.xlane.xlu0 %1068 }
 0x32c   : >> { %v1057_v3 = vpop.xlane.xlu1 %1056  ;;  %4634 = vpow2.f32 %v1108_v63  ;;  %v1093_v52 = vsub.f32 %v5427_v47, %v1069_v0 }
 0x32d   : >> { %v1087_v10 = vsub.f32 %v5412_v43, %v1057_v3  ;;  %1805 = vrot.lane.b32.xlu0 %v5230_v62, %s5051_s21  ;;  %1807 = vrot.lane.b32.xlu1 %v5215_v56, %s5051_s21 }
 0x32e   : >> { %v1116_v13 = vmul.f32 1.442695, %v1093_v52 }
 0x32f   : >> { %v1104_v2 = vmul.f32 1.442695, %v1087_v10  ;;  %v1065_v30 = vpop.xlane.xlu0 %1064 }
 0x330   : >> { %v1091_v60 = vsub.f32 %v5431_v48, %v1065_v30  ;;  %v1067_v59 = vpop.xlane.xlu1 %1066 }
 0x331   : >> { %4636 = vpow2.f32 %v1104_v2  ;;  %v1092_v24 = vsub.f32 %v5419_v45, %v1067_v59  ;;  %2104 = vrot.lane.b32.xlu0 %v5414_v44, %s5052_s22  ;;  %2102 = vrot.lane.b32.xlu1 %v5400_v35, %s5052_s22 }
 0x332   : >> { %4638 = vpow2.f32 %v1106_v1  ;;  %v1112_v56 = vmul.f32 1.442695, %v1091_v60 }
 0x333   : >> { %v1077_v62 = vpop.xlane.xlu0 %1076  ;;  %v1114_v8 = vmul.f32 1.442695, %v1092_v24 }
 0x334   : >> { %v1063_v63 = vpop.xlane.xlu1 %1062  ;;  %4640 = vpow2.f32 %v1112_v56  ;;  %v1097_v43 = vsub.f32 %v5444_v54, %v1077_v62 }
 0x335   : >> { %v1090_v10 = vsub.f32 %v5423_v46, %v1063_v63  ;;  %2100 = vrot.lane.b32.xlu0 %v5392_v28, %s5052_s22  ;;  %2094 = vrot.lane.b32.xlu1 %v5372_v12, %s5052_s22  ;;  %4642 = vpow2.f32 %v1114_v8  ;;  %v5586_v47 = vpop.eup %4632 }
 0x336   : >> { %v1124_v1 = vmul.f32 1.442695, %v1097_v43 }
 0x337   : >> { %v1110_v32 = vmul.f32 1.442695, %v1090_v10  ;;  %v1073_v36 = vpop.xlane.xlu0 %1072 }
 0x338   : >> { %v1095_v38 = vsub.f32 %v5449_v55, %v1073_v36  ;;  %v1075_v40 = vpop.xlane.xlu1 %1074 }
 0x339   : >> { %4644 = vpow2.f32 %v1110_v32  ;;  %v1096_v41 = vsub.f32 %v5435_v49, %v1075_v40  ;;  %2098 = vrot.lane.b32.xlu0 %v5386_v22, %s5052_s22  ;;  %2090 = vrot.lane.b32.xlu1 %v5356_v61, %s5052_s22  ;;  %v5588_v55 = vpop.eup %4634 }
 0x33a   : >> { %4646 = vpow2.f32 %v1116_v13  ;;  %v1120_v45 = vmul.f32 1.442695, %v1095_v38 }
 0x33b   : >> { %v1085_v46 = vpop.xlane.xlu0 %1084  ;;  %v1122_v48 = vmul.f32 1.442695, %v1096_v41 }
 0x33c   : >> { %v1071_v0 = vpop.xlane.xlu1 %1070  ;;  %4648 = vpow2.f32 %v1120_v45  ;;  %v1101_v56 = vsub.f32 %v5461_v6, %v1085_v46 }
 0x33d   : >> { %v1094_v3 = vsub.f32 %v5439_v53, %v1071_v0  ;;  %2096 = vrot.lane.b32.xlu0 %v5380_v17, %s5052_s22  ;;  %4650 = vpow2.f32 %v1122_v48 }
 0x33e   : >> { %v5593_v49 = vpop.eup %4636  ;;  %v1132_v36 = vmul.f32 1.442695, %v1101_v56 }
 0x33f   : >> { %v5595_v2 = vpop.eup %4638  ;;  %v1118_v54 = vmul.f32 1.442695, %v1094_v3  ;;  %v1081_v30 = vpop.xlane.xlu0 %1080  ;;  %v1166_v60 = vpack.c.bf16 %v5593_v49, %v5586_v47 }
 0x340   : >> { %v1099_v59 = vsub.f32 %v5465_v9, %v1081_v30  ;;  %v1083_v24 = vpop.xlane.xlu1 %1082  ;;  %v1167_v53 = vpack.c.bf16 %v5588_v55, %v5595_v2 }
 0x341   : >> { %4652 = vpow2.f32 %v1118_v54  ;;  %v1100_v52 = vsub.f32 %v5453_v58, %v1083_v24  ;;  %4202 = vmatprep.mubr.bf16.mxu0 %v1166_v60  ;;  %2092 = vrot.lane.b32.xlu0 %v5364_v7, %s5052_s22  ;;  %v5607_v9 = vpop.eup %4640 }
 0x342   : >> { %4654 = vpow2.f32 %v1124_v1  ;;  %4203 = vmatmul.mubr.bf16.vlgmr.msra.gmra.mxu0 %v1167_v53  ;;  %v1128_v62 = vmul.f32 1.442695, %v1099_v59  ;;  %v5610_v13 = vpop.eup %4642 }
 0x343   : >> { %4251 = vmatpush3.bf16.msra.mxu0 %v5526_v51  ;;  %v1501_v8 = vpop.xlane.xlu0 %1500  ;;  %v1130_v63 = vmul.f32 1.442695, %v1100_v52 }
 0x344   : >> { %4252 = vmatprep.subr.bf16.mxu0 %v5549_v15  ;;  %v1079_v10 = vpop.xlane.xlu1 %1078  ;;  %4656 = vpow2.f32 %v1128_v62 }
 0x345   : >> { %v1098_v58 = vsub.f32 %v5457_v4, %v1079_v10  ;;  %4658 = vpow2.f32 %v1130_v63 }
 0x346   : >> { %v5613_v32 = vpop.eup %4644 }
 0x347   : >> { %v5615_v38 = vpop.eup %4646  ;;  %v1126_v6 = vmul.f32 1.442695, %v1098_v58  ;;  %4253 = vmatpush3.bf16.msra.mxu0 %v5549_v15  ;;  %v1503_v51 = vpop.xlane.xlu0 %1502  ;;  %v1168_v40 = vpack.c.bf16 %v5607_v9, %v5613_v32  ;;  %v1530_v15 = vsub.f32 %v5469_v11, %v1501_v8 }
 0x348   : >> { %4254 = vmatprep.subr.bf16.mxu0 %v5524_v50  ;;  %v1531_v41 = vsub.f32 %v5475_v16, %v1503_v51  ;;  %v1497_v43 = vpop.xlane.xlu1 %1496  ;;  %v1169_v4 = vpack.c.bf16 %v5615_v38, %v5610_v13 }
 0x349   : >> { %4660 = vpow2.f32 %v1126_v6  ;;  %v1528_v45 = vsub.f32 %v5471_v14, %v1497_v43  ;;  %4206 = vmatprep.mubr.bf16.mxu0 %v1168_v40  ;;  %v5627_v3 = vpop.eup %4648  ;;  %v1548_v11 = vmul.f32 1.442695, %v1530_v15 }
 0x34a   : >> { %4662 = vpow2.f32 %v1132_v36  ;;  %v1550_v46 = vmul.f32 1.442695, %v1531_v41  ;;  %4207 = vmatmul.mubr.bf16.gmra.mxu0 %v1169_v4  ;;  %v5631_v54 = vpop.eup %4650 }
 0x34b   : >> { %v1544_v48 = vmul.f32 1.442695, %v1528_v45  ;;  %4255 = vmatpush3.bf16.msra.mxu0 %v5524_v50  ;;  %v1499_v0 = vpop.xlane.xlu0 %1498 }
 0x34c   : >> { %4256 = vmatprep.subr.bf16.mxu0 %v5522_v42  ;;  %v1529_v16 = vsub.f32 %v5479_v19, %v1499_v0  ;;  %v1505_v1 = vpop.xlane.xlu1 %1504  ;;  %4664 = vpow2.f32 %v1550_v46 }
 0x34d   : >> { %v1532_v14 = vsub.f32 %v5487_v21, %v1505_v1  ;;  %4666 = vpow2.f32 %v1544_v48 }
 0x34e   : >> { %v5634_v30 = vpop.eup %4652  ;;  %v1546_v60 = vmul.f32 1.442695, %v1529_v16 }
 0x34f   : >> { %v5636_v59 = vpop.eup %4654  ;;  %4257 = vmatpush3.bf16.msra.mxu0 %v5522_v42  ;;  %v1509_v50 = vpop.xlane.xlu0 %1508  ;;  %v1170_v24 = vpack.c.bf16 %v5627_v3, %v5634_v30  ;;  %v1552_v52 = vmul.f32 1.442695, %v1532_v14  ;;  %v1871_v14 = vsel %vm908_vm3, %v5535_v57, 0 }
 0x350   : >> { %7113 = vst [vmem:[#allocation23_spill] sm:$0xff] %v5636_v59  ;;  %4668 = vpow2.f32 %v1546_v60  ;;  %4258 = vmatprep.subr.bf16.mxu0 %v5518_v39  ;;  %v1534_v19 = vsub.f32 %v5483_v20, %v1509_v50  ;;  %v1511_v21 = vpop.xlane.xlu1 %1510  ;;  %v1171_v53 = vpack.c.bf16 %v5636_v59, %v5631_v54 }
 0x351   : >> { %v1535_v56 = vsub.f32 %v5491_v23, %v1511_v21  ;;  %4210 = vmatprep.mubr.bf16.mxu0 %v1170_v24  ;;  %4670 = vpow2.f32 %v1548_v11  ;;  %v5647_v63 = vpop.eup %4656  ;;  %v1868_v24 = vsel %vm908_vm3, %v5540_v5, 0 }
 0x352   : >> { %v1556_v62 = vmul.f32 1.442695, %v1534_v19  ;;  %4211 = vmatmul.mubr.bf16.gmra.mxu0 %v1171_v53  ;;  %7114 = vst [vmem:[#allocation24_spill] sm:$0xff] %v5647_v63  ;;  %v5651_v58 = vpop.eup %4658  ;;  %4672 = vpow2.f32 %v1552_v52  ;;  %v1865_v52 = vsel %vm908_vm3, %v5509_v33, 0 }
 0x353   : >> { %v1558_v42 = vmul.f32 1.442695, %v1535_v56  ;;  %4259 = vmatpush3.bf16.msra.mxu0 %v5518_v39  ;;  %v1507_v8 = vpop.xlane.xlu0 %1506  ;;  %7115 = vst [vmem:[#allocation25_spill] sm:$0xff] %v5651_v58 }
 0x354   : >> { %4260 = vmatprep.subr.bf16.mxu0 %v5516_v37  ;;  %v1533_v20 = vsub.f32 %v5495_v25, %v1507_v8  ;;  %v1517_v10 = vpop.xlane.xlu1 %1516  ;;  %4674 = vpow2.f32 %v1556_v62 }
 0x355   : >> { %4676 = vpow2.f32 %v1558_v42  ;;  %v1538_v15 = vsub.f32 %v5497_v26, %v1517_v10 }
 0x356   : >> { %v5653_v36 = vpop.eup %4660  ;;  %v1554_v23 = vmul.f32 1.442695, %v1533_v20 }
 0x357   : >> { %7116 = vst [vmem:[#allocation26_spill] sm:$0xff] %v5653_v36  ;;  %v5655_v6 = vpop.eup %4662  ;;  %4261 = vmatpush3.bf16.msra.mxu0 %v5516_v37  ;;  %v1172_v39 = vpack.c.bf16 %v5647_v63, %v5653_v36  ;;  %v1564_v1 = vmul.f32 1.442695, %v1538_v15  ;;  %v1814_v10 = vpop.permute.xlu0 %1813 }
 0x358   : >> { %7117 = vst [vmem:[#allocation27_spill] sm:$0xff] %v5655_v6  ;;  %4678 = vpow2.f32 %v1554_v23  ;;  %4262 = vmatprep.subr.bf16.mxu0 %v5547_v18  ;;  %v1513_v25 = vpop.xlane.xlu1 %1512  ;;  %v1173_v51 = vpack.c.bf16 %v5655_v6, %v5651_v58 }
 0x359   : >> { %4214 = vmatprep.mubr.bf16.mxu0 %v1172_v39  ;;  %v5663_v40 = vpop.eup %4664  ;;  %v1536_v41 = vsub.f32 %v5501_v27, %v1513_v25  ;;  %v1856_v39 = vsel %vm908_vm3, %v1814_v10, 0 }
 0x35a   : >> { %4215 = vmatmul.mubr.bf16.gmra.mxu0 %v1173_v51  ;;  %7118 = vst [vmem:[#allocation28_spill] sm:$0xff] %v5663_v40  ;;  %v5667_v43 = vpop.eup %4666  ;;  %v7131_v51 = vld [vmem:[#allocation19_spill] sm:$0xff] }
 0x35b   : >> { %4263 = vmatpush3.bf16.msra.mxu0 %v5547_v18  ;;  %7119 = vst [vmem:[#allocation29_spill] sm:$0xff] %v5667_v43  ;;  %v1560_v0 = vmul.f32 1.442695, %v1536_v41 }
 0x35c   : >> { %4264 = vmatprep.subr.bf16.mxu0 %v5512_v34  ;;  %v1519_v37 = vpop.xlane.xlu1 %1518 }
 0x35d   : >> { %v5670_v4 = vpop.eup %4668  ;;  %v1539_v45 = vsub.f32 %v5504_v29, %v1519_v37  ;;  %4680 = vpow2.f32 %v1560_v0 }
 0x35e   : >> { %7120 = vst [vmem:[#allocation30_spill] sm:$0xff] %v5670_v4  ;;  %v1608_v46 = vpack.c.bf16 %v5670_v4, %v5667_v43  ;;  %v5676_v48 = vpop.eup %4670 }
 0x35f   : >> { %7121 = vst [vmem:[#allocation31_spill] sm:$0xff] %v5676_v48  ;;  %4265 = vmatpush3.bf16.msra.mxu0 %v5512_v34  ;;  %v1566_v18 = vmul.f32 1.442695, %v1539_v45  ;;  %v1609_v16 = vpack.c.bf16 %v5663_v40, %v5676_v48  ;;  %v5684_v26 = vpop.eup %4672  ;;  %v7132_v45 = vld [vmem:[#allocation20_spill] sm:$0xff] }
 0x360   : >> { %4558 = vmatprep.subr.msk.bf16.mxu0 %vm908_vm3, %v5535_v57  ;;  %4266 = vmatprep.mubr.bf16.mxu0 %v1608_v46  ;;  %v1515_v27 = vpop.xlane.xlu1 %1514  ;;  %7122 = vst [vmem:[#allocation32_spill] sm:$0xff] %v5684_v26  ;;  %v7133_v46 = vld [vmem:[#allocation18_spill] sm:$0xff] }
 0x361   : >> { %v1537_v29 = vsub.f32 %v5507_v31, %v1515_v27  ;;  %v5688_v11 = vpop.eup %4674  ;;  %4682 = vpow2.f32 %v1566_v18 }
 0x362   : >> { %4267 = vmatmul.mubr.bf16.vlgmr.msra.gmra.mxu0 %v1609_v16  ;;  %7123 = vst [vmem:[#allocation33_spill] sm:$0xff] %v5688_v11  ;;  %v5690_v60 = vpop.eup %4676 }
 0x363   : >> { %v1562_v34 = vmul.f32 1.442695, %v1537_v29  ;;  %4283 = vmatpush3.bf16.xpose.msra.mxu0 %v1871_v14  ;;  %7124 = vst [vmem:[#allocation34_spill] sm:$0xff] %v5690_v60  ;;  %v1611_v57 = vpack.c.bf16 %v5690_v60, %v5688_v11  ;;  %v7134_v14 = vld [vmem:[#allocation21_spill] sm:$0xff] }
 0x364   : >> { %4559 = vmatprep.subr.msk.bf16.mxu0 %vm908_vm3, %v5540_v5  ;;  %v7130_v5 = vld [vmem:[#allocation22_spill] sm:$0xff]  ;;  %v1816_v20 = vpop.permute.xlu1 %1815 }
 0x365   : >> { %v5694_v50 = vpop.eup %4678  ;;  %4684 = vpow2.f32 %v1562_v34  ;;  %v1862_v8 = vsel %vm908_vm3, %v7130_v5, 0 }
 0x366   : >> { %7125 = vst [vmem:[#allocation35_spill] sm:$0xff] %v5694_v50  ;;  %4686 = vpow2.f32 %v1564_v1  ;;  %v1610_v31 = vpack.c.bf16 %v5694_v50, %v5684_v26 }
 0x368   : >> { %4270 = vmatprep.mubr.bf16.mxu0 %v1610_v31 }
 0x36a   : >> { %4271 = vmatmul.mubr.bf16.gmra.mxu0 %v1611_v57  ;;  %v5704_v19 = vpop.eup %4680 }
 0x36b   : >> { %4285 = vmatpush3.bf16.xpose.msra.mxu0 %v1868_v24  ;;  %7126 = vst [vmem:[#allocation36_spill] sm:$0xff] %v5704_v19 }
 0x36c   : >> { %4560 = vmatprep.subr.msk.bf16.mxu0 %vm908_vm3, %v5509_v33  ;;  %v1859_v33 = vsel %vm908_vm3, %v1816_v20, 0 }
 0x36e   : >> { %v5706_v21 = vpop.eup %4682 }
 0x36f   : >> { %7127 = vst [vmem:[#allocation37_spill] sm:$0xff] %v5706_v21 }
 0x372   : >> { %v5708_v53 = vpop.eup %4684 }
 0x373   : >> { %7128 = vst [vmem:[#allocation38_spill] sm:$0xff] %v5708_v53  ;;  %v5712_v56 = vpop.eup %4686  ;;  %4287 = vmatpush3.bf16.xpose.msra.mxu0 %v1865_v52  ;;  %v1612_v62 = vpack.c.bf16 %v5708_v53, %v5704_v19 }
 0x374   : >> { %7129 = vst [vmem:[#allocation39_spill] sm:$0xff] %v5712_v56  ;;  %4561 = vmatprep.subr.msk.bf16.mxu0 %vm908_vm3, %v7130_v5  ;;  %v1613_v42 = vpack.c.bf16 %v5706_v21, %v5712_v56 }
 0x375   : >> { %4274 = vmatprep.mubr.bf16.mxu0 %v1612_v62 }
 0x376   : >> { %4275 = vmatmul.mubr.bf16.gmra.mxu0 %v1613_v42 }
 0x37b   : >> { %4289 = vmatpush3.bf16.xpose.msra.mxu0 %v1862_v8 }
 0x37c   : >> { %4562 = vmatprep.subr.msk.bf16.mxu0 %vm908_vm3, %v1816_v20 }
 0x383   : >> { %4291 = vmatpush3.bf16.xpose.msra.mxu0 %v1859_v33 }
 0x384   : >> { %4563 = vmatprep.subr.msk.bf16.mxu0 %vm908_vm3, %v1814_v10 }
 0x388   : >> { %v1525_v23 = vpop.xlane.xlu0 %1524 }
 0x389   : >> { %v1542_v0 = vsub.f32 %v7133_v46, %v1525_v23 }
 0x38b   : >> { %4293 = vmatpush3.bf16.xpose.msra.mxu0 %v1856_v39  ;;  %v1572_v31 = vmul.f32 1.442695, %v1542_v0 }
 0x38c   : >> { %v1521_v25 = vpop.xlane.xlu0 %1520 }
 0x38d   : >> { %v1540_v41 = vsub.f32 %v7131_v51, %v1521_v25 }
 0x38f   : >> { %v1568_v18 = vmul.f32 1.442695, %v1540_v41 }
 0x390   : >> { %v1527_v37 = vpop.xlane.xlu0 %1526 }
 0x391   : >> { %v1543_v15 = vsub.f32 %v7132_v45, %v1527_v37  ;;  %4688 = vpow2.f32 %v1568_v18 }
 0x393   : >> { %v1574_v16 = vmul.f32 1.442695, %v1543_v15 }
 0x394   : >> { %v1812_v27 = vpop.permute.xlu0 %1811 }
 0x395   : >> { %v1523_v29 = vpop.xlane.xlu1 %1522  ;;  %4564 = vmatprep.subr.msk.bf16.mxu0 %vm908_vm3, %v1812_v27  ;;  %v1853_v1 = vsel %vm908_vm3, %v1812_v27, 0  ;;  %4690 = vpow2.f32 %v1574_v16 }
 0x396   : >> { %v1541_v34 = vsub.f32 %v7134_v14, %v1523_v29  ;;  %4295 = vmatpush3.bf16.xpose.msra.mxu0 %v1853_v1  ;;  %v5752_v29 = vld [vmem:[%s5212_s13 + $0x38] sm:$0xff]   ;;  %v5757_v1 = vld [vmem:[%s5212_s13 + $0x28] sm:$0xff]  }
 0x397   : >> { %2289 = vrot.lane.b32.xlu0 %v5752_v29, %s5053_s23  ;;  %2285 = vrot.lane.b32.xlu1 %v5757_v1, %s5053_s23 }
 0x398   : >> { %v1570_v57 = vmul.f32 1.442695, %v1541_v34  ;;  %v1794_v24 = vpop.permute.xlu0 %1793  ;;  %v5762_v34 = vld [vmem:[%s5212_s13 + $0x30] sm:$0xff]  }
 0x399   : >> { %v1810_v52 = vpop.permute.xlu1 %1809 }
 0x39a   : >> { %4692 = vpow2.f32 %v1570_v57  ;;  %4565 = vmatprep.subr.msk.bf16.mxu0 %vm908_vm3, %v1810_v52  ;;  %v1850_v62 = vsel %vm908_vm3, %v1810_v52, 0  ;;  %v5769_v57 = vld [vmem:[%s5212_s13 + $0x20] sm:$0xff]  }
 0x39b   : >> { %4694 = vpow2.f32 %v1572_v31  ;;  %2287 = vrot.lane.b32.xlu0 %v5762_v34, %s5053_s23 }
 0x39c   : >> { %v1798_v5 = vpop.permute.xlu0 %1797 }
 0x39d   : >> { %v1796_v42 = vpop.permute.xlu1 %1795 }
 0x39e   : >> { %4297 = vmatpush3.bf16.xpose.msra.mxu0 %v1850_v62  ;;  %v5734_v10 = vpop.eup %4688 }
 0x39f   : >> { %7135 = vst [vmem:[#allocation22_spill] sm:$0xff] %v5734_v10  ;;  %2283 = vrot.lane.b32.xlu0 %v5769_v57, %s5053_s23 }
 0x3a0   : >> { %v1802_v8 = vpop.permute.xlu0 %1801 }
 0x3a1   : >> { %v1800_v20 = vpop.permute.xlu1 %1799 }
 0x3a2   : >> { %v5736_v39 = vpop.eup %4690 }
 0x3a3   : >> { %7136 = vst [vmem:[#allocation19_spill] sm:$0xff] %v5736_v39 }
 0x3a4   : >> { %v1806_v33 = vpop.permute.xlu0 %1805 }
 0x3a5   : >> { %v1804_v23 = vpop.permute.xlu1 %1803 }
 0x3a7   : >> { %v5738_v25 = vpop.eup %4692 }
 0x3a8   : >> { %7137 = vst [vmem:[#allocation20_spill] sm:$0xff] %v5738_v25  ;;  %v5740_v51 = vpop.eup %4694  ;;  %v2105_v41 = vpop.permute.xlu0 %2104  ;;  %v1614_v37 = vpack.c.bf16 %v5738_v25, %v5734_v10 }
 0x3a9   : >> { %7138 = vst [vmem:[#allocation18_spill] sm:$0xff] %v5740_v51  ;;  %4314 = vmatprep.subr.bf16.mxu1 %v2105_v41  ;;  %v1808_v45 = vpop.permute.xlu1 %1807  ;;  %v1615_v15 = vpack.c.bf16 %v5736_v39, %v5740_v51  ;;  %v5903_v39 = vld [vmem:[%s5212_s13 + $0x8] sm:$0xff]   ;;  %v5908_v51 = vld [vmem:[%s5212_s13] sm:$0xff]  }
 0x3aa   : >> { %4278 = vmatprep.mubr.bf16.mxu0 %v1614_v37  ;;  %4315 = vmatpush3.bf16.msra.mxu1 %v2105_v41 }
 0x3ab   : >> { %4279 = vmatmul.mubr.bf16.gmra.mxu0 %v1615_v15 }
 0x3ac   : >> { %v2101_v46 = vpop.permute.xlu0 %2100  ;;  %4298 = vmatprep.mubr.msk.bf16.mxu0 %vm908_vm3, %v1794_v24  ;;  %v5774_v24 = vpop.f32.mrf.mxu0 }
 0x3ad   : >> { %v2103_v0 = vpop.permute.xlu1 %2102 }
 0x3ae   : >> { %4316 = vmatprep.subr.bf16.mxu1 %v2103_v0 }
 0x3af   : >> { %4317 = vmatpush3.bf16.msra.mxu1 %v2103_v0 }
 0x3b0   : >> { %4318 = vmatprep.subr.bf16.mxu1 %v2101_v46  ;;  %v2099_v18 = vpop.permute.xlu0 %2098 }
 0x3b1   : >> { %v2095_v16 = vpop.permute.xlu1 %2094 }
 0x3b3   : >> { %4299 = vmatmul.mubr.msk.bf16.vlgmr.msra.gmra.mxu0 %vm908_vm3, %v1796_v42  ;;  %4319 = vmatpush3.bf16.msra.mxu1 %v2101_v46 }
 0x3b4   : >> { %4320 = vmatprep.subr.bf16.mxu1 %v2099_v18  ;;  %4302 = vmatprep.mubr.msk.bf16.mxu0 %vm908_vm3, %v1798_v5  ;;  %v2097_v27 = vpop.permute.xlu0 %2096 }
 0x3b5   : >> { %v2091_v31 = vpop.permute.xlu1 %2090 }
 0x3b7   : >> { %4321 = vmatpush3.bf16.msra.mxu1 %v2099_v18 }
 0x3b8   : >> { %4322 = vmatprep.subr.bf16.mxu1 %v2097_v27  ;;  %v2093_v14 = vpop.permute.xlu0 %2092 }
 0x3bb   : >> { %4303 = vmatmul.mubr.msk.bf16.gmra.mxu0 %vm908_vm3, %v1800_v20  ;;  %4323 = vmatpush3.bf16.msra.mxu1 %v2097_v27 }
 0x3bc   : >> { %4324 = vmatprep.subr.bf16.mxu1 %v2095_v16  ;;  %4306 = vmatprep.mubr.msk.bf16.mxu0 %vm908_vm3, %v1802_v8 }
 0x3bf   : >> { %4325 = vmatpush3.bf16.msra.mxu1 %v2095_v16 }
 0x3c0   : >> { %4326 = vmatprep.subr.bf16.mxu1 %v2093_v14 }
 0x3c3   : >> { %4307 = vmatmul.mubr.msk.bf16.gmra.mxu0 %vm908_vm3, %v1804_v23  ;;  %4327 = vmatpush3.bf16.msra.mxu1 %v2093_v14 }
 0x3c4   : >> { %4328 = vmatprep.subr.bf16.mxu1 %v2091_v31  ;;  %4310 = vmatprep.mubr.msk.bf16.mxu0 %vm908_vm3, %v1806_v33 }
 0x3c7   : >> { %4329 = vmatpush3.bf16.msra.mxu1 %v2091_v31 }
 0x3cb   : >> { %4311 = vmatmul.mubr.msk.bf16.gmra.mxu0 %vm908_vm3, %v1808_v45 }
 0x402   : >> { %v5776_v52 = vpop.f32.mrf.mxu0 }
 0x403   : >> { %7139 = vst [vmem:[#allocation21_spill] sm:$0xff] %v5776_v52  ;;  %v5886_v52 = vld [vmem:[%s5212_s13 + $0x18] sm:$0xff]  }
 0x404   : >> { %v5778_v62 = vpop.f32.mrf.mxu0 }
 0x405   : >> { %7140 = vst [vmem:[#allocation40_spill] sm:$0xff] %v5778_v62 }
 0x406   : >> { %v5780_v5 = vpop.f32.mrf.mxu0 }
 0x407   : >> { %7141 = vst [vmem:[#allocation41_spill] sm:$0xff] %v5780_v5 }
 0x408   : >> { %v5782_v42 = vpop.f32.mrf.mxu0 }
 0x409   : >> { %7142 = vst [vmem:[#allocation42_spill] sm:$0xff] %v5782_v42  ;;  %v5929_v10 = vpop.permute.xlu1 %2285 }
 0x40a   : >> { %v5784_v8 = vpop.f32.mrf.mxu0 }
 0x40b   : >> { %7143 = vst [vmem:[#allocation43_spill] sm:$0xff] %v5784_v8 }
 0x40c   : >> { %v5786_v20 = vpop.f32.mrf.mxu0 }
 0x40d   : >> { %7144 = vst [vmem:[#allocation44_spill] sm:$0xff] %v5786_v20 }
 0x40e   : >> { %v5788_v33 = vpop.f32.mrf.mxu0 }
 0x40f   : >> { %7145 = vst [vmem:[#allocation45_spill] sm:$0xff] %v5788_v33 }
 0x410   : >> { %v5790_v23 = vpop.f32.mrf.mxu0 }
 0x411   : >> { %7146 = vst [vmem:[#allocation46_spill] sm:$0xff] %v5790_v23 }
 0x412   : >> { %v5792_v41 = vpop.f32.mrf.mxu0 }
 0x413   : >> { %7147 = vst [vmem:[#allocation47_spill] sm:$0xff] %v5792_v41  ;;  %v5814_v41 = vpop.permute.xlu0 %2289 }
 0x414   : >> { %v5794_v37 = vpop.f32.mrf.mxu0  ;;  %4566 = vmatprep.subr.msk.bf16.mxu1 %vm908_vm3, %v5814_v41 }
 0x415   : >> { %7148 = vst [vmem:[#allocation48_spill] sm:$0xff] %v5794_v37 }
 0x416   : >> { %v5796_v45 = vpop.f32.mrf.mxu0 }
 0x417   : >> { %7149 = vst [vmem:[#allocation49_spill] sm:$0xff] %v5796_v45  ;;  %v5925_v25 = vpop.permute.xlu0 %2287 }
 0x418   : >> { %v5798_v15 = vpop.f32.mrf.mxu0 }
 0x419   : >> { %7150 = vst [vmem:[#allocation50_spill] sm:$0xff] %v5798_v15 }
 0x41a   : >> { %v5800_v46 = vpop.f32.mrf.mxu0 }
 0x41b   : >> { %7151 = vst [vmem:[#allocation51_spill] sm:$0xff] %v5800_v46 }
 0x41c   : >> { %v5802_v0 = vpop.f32.mrf.mxu0 }
 0x41d   : >> { %7152 = vst [vmem:[#allocation52_spill] sm:$0xff] %v5802_v0 }
 0x41e   : >> { %v5804_v18 = vpop.f32.mrf.mxu0 }
 0x41f   : >> { %7153 = vst [vmem:[#allocation53_spill] sm:$0xff] %v5804_v18 }
 0x420   : >> { %v5806_v27 = vpop.f32.mrf.mxu0 }
 0x421   : >> { %7154 = vst [vmem:[#allocation54_spill] sm:$0xff] %v5806_v27 }
 0x422   : >> { %v5808_v16 = vpop.f32.mrf.mxu0 }
 0x423   : >> { %7155 = vst [vmem:[#allocation55_spill] sm:$0xff] %v5808_v16  ;;  %v5881_v16 = vld [vmem:[%s5212_s13 + $0x10] sm:$0xff]  }
 0x424   : >> { %v5810_v14 = vpop.f32.mrf.mxu0 }
 0x425   : >> { %7156 = vst [vmem:[#allocation56_spill] sm:$0xff] %v5810_v14 }
 0x426   : >> { %v5812_v31 = vpop.f32.mrf.mxu0 }
 0x427   : >> { %7157 = vst [vmem:[#allocation57_spill] sm:$0xff] %v5812_v31 }
 0x428   : >> { %v5818_v45 = vpop.f32.mrf.mxu0 }
 0x429   : >> { %7158 = vst [vmem:[#allocation58_spill] sm:$0xff] %v5818_v45 }
 0x42a   : >> { %v5820_v46 = vpop.f32.mrf.mxu0 }
 0x42b   : >> { %7159 = vst [vmem:[#allocation59_spill] sm:$0xff] %v5820_v46 }
 0x42c   : >> { %v5822_v0 = vpop.f32.mrf.mxu0 }
 0x42d   : >> { %7160 = vst [vmem:[#allocation60_spill] sm:$0xff] %v5822_v0 }
 0x42e   : >> { %v5824_v18 = vpop.f32.mrf.mxu0 }
 0x42f   : >> { %7161 = vst [vmem:[#allocation61_spill] sm:$0xff] %v5824_v18 }
 0x430   : >> { %v5826_v27 = vpop.f32.mrf.mxu0 }
 0x431   : >> { %7162 = vst [vmem:[#allocation62_spill] sm:$0xff] %v5826_v27 }
 0x436   : >> { %v5828_v15 = vpop.f32.mrf.mxu0 }
 0x437   : >> { %7163 = vst [vmem:[#allocation63_spill] sm:$0xff] %v5828_v15 }
 0x438   : >> { %v5830_v37 = vpop.f32.mrf.mxu0 }
 0x439   : >> { %7164 = vst [vmem:[#allocation64_spill] sm:$0xff] %v5830_v37 }
 0x43a   : >> { %v5832_v33 = vpop.f32.mrf.mxu0 }
 0x43b   : >> { %7165 = vst [vmem:[#allocation65_spill] sm:$0xff] %v5832_v33 }
 0x43c   : >> { %v5834_v8 = vpop.f32.mrf.mxu0 }
 0x43d   : >> { %7166 = vst [vmem:[#allocation66_spill] sm:$0xff] %v5834_v8 }
 0x46b   : >> { %v5836_v23 = vpop.f32.mrf.mxu0 }
 0x46c   : >> { %7167 = vst [vmem:[#allocation67_spill] sm:$0xff] %v5836_v23 }
 0x46d   : >> { %v5838_v20 = vpop.f32.mrf.mxu0 }
 0x46e   : >> { %7168 = vst [vmem:[#allocation68_spill] sm:$0xff] %v5838_v20 }
 0x46f   : >> { %v5840_v31 = vpop.f32.mrf.mxu0 }
 0x470   : >> { %7169 = vst [vmem:[#allocation69_spill] sm:$0xff] %v5840_v31 }
 0x471   : >> { %v5842_v46 = vpop.f32.mrf.mxu0 }
 0x472   : >> { %7170 = vst [vmem:[#allocation70_spill] sm:$0xff] %v5842_v46 }
 0x473   : >> { %v5844_v0 = vpop.f32.mrf.mxu0 }
 0x474   : >> { %1974 = vmax.xlane.f32.xlu1 %v5844_v0 }
 0x475   : >> { %v5847_v18 = vpop.f32.mrf.mxu0 }
 0x476   : >> { %1970 = vmax.xlane.f32.xlu0 %v5847_v18 }
 0x477   : >> { %v5850_v15 = vpop.f32.mrf.mxu0 }
 0x478   : >> { %1976 = vmax.xlane.f32.xlu1 %v5850_v15 }
 0x479   : >> { %v5853_v33 = vpop.f32.mrf.mxu0 }
 0x47b   : >> { %v5855_v23 = vpop.f32.mrf.mxu0 }
 0x47c   : >> { %1972 = vmax.xlane.f32.xlu1 %v5853_v33  ;;  %1982 = vmax.xlane.f32.xlu0 %v5855_v23 }
 0x47d   : >> { %v5859_v31 = vpop.f32.mrf.mxu0 }
 0x47f   : >> { %v5861_v46 = vpop.f32.mrf.mxu0 }
 0x480   : >> { %1978 = vmax.xlane.f32.xlu1 %v5859_v31 }
 0x481   : >> { %v5864_v20 = vpop.f32.mrf.mxu0 }
 0x482   : >> { %1980 = vmax.xlane.f32.xlu0 %v5864_v20 }
 0x483   : >> { %v5868_v8 = vpop.f32.mrf.mxu0 }
 0x484   : >> { %1984 = vmax.xlane.f32.xlu1 %v5861_v46 }
 0x485   : >> { %v5871_v37 = vpop.f32.mrf.mxu0 }
 0x487   : >> { %v5874_v27 = vpop.f32.mrf.mxu0 }
 0x488   : >> { %1990 = vmax.xlane.f32.xlu1 %v5868_v8 }
 0x489   : >> { %v5877_v5 = vpop.f32.mrf.mxu0 }
 0x48b   : >> { %v5890_v45 = vpop.f32.mrf.mxu0 }
 0x48c   : >> { %1986 = vmax.xlane.f32.xlu1 %v5871_v37 }
 0x48d   : >> { %v5893_v42 = vpop.f32.mrf.mxu0 }
 0x48f   : >> { %v5896_v14 = vpop.f32.mrf.mxu0 }
 0x490   : >> { %1992 = vmax.xlane.f32.xlu1 %v5874_v27 }
 0x491   : >> { %v5899_v62 = vpop.f32.mrf.mxu0 }
 0x494   : >> { %1988 = vmax.xlane.f32.xlu1 %v5877_v5 }
 0x498   : >> { %2279 = vrot.lane.b32.xlu0 %v5881_v16, %s5053_s23 }
 0x4a5   : >> { %2281 = vrot.lane.b32.xlu1 %v5886_v52, %s5053_s23 }
 0x4b7   : >> { %1998 = vmax.xlane.f32.xlu0 %v5890_v45 }
 0x4bb   : >> { %1994 = vmax.xlane.f32.xlu0 %v5893_v42 }
 0x4bf   : >> { %2000 = vmax.xlane.f32.xlu0 %v5896_v14 }
 0x4c9   : >> { %1996 = vmax.xlane.f32.xlu1 %v5899_v62 }
 0x4d5   : >> { %2277 = vrot.lane.b32.xlu0 %v5903_v39, %s5053_s23 }
 0x4d9   : >> { %2259 = vrot.lane.b32.xlu0 %v5908_v51, %s5054_s24 }
 0x4da   : >> { %2275 = vrot.lane.b32.xlu1 %v5908_v51, %s5053_s23 }
 0x4dd   : >> { %2263 = vrot.lane.b32.xlu0 %v5881_v16, %s5054_s24 }
 0x4de   : >> { %2261 = vrot.lane.b32.xlu1 %v5903_v39, %s5054_s24 }
 0x4e1   : >> { %2267 = vrot.lane.b32.xlu0 %v5769_v57, %s5054_s24 }
 0x4e2   : >> { %2265 = vrot.lane.b32.xlu1 %v5886_v52, %s5054_s24 }
 0x4e5   : >> { %2271 = vrot.lane.b32.xlu0 %v5762_v34, %s5054_s24 }
 0x4e6   : >> { %2269 = vrot.lane.b32.xlu1 %v5757_v1, %s5054_s24 }
 0x4e9   : >> { %2570 = vrot.lane.b32.xlu0 %v5414_v44, %s5055_s25  ;;  %v5932_v44 = vpop.permute.xlu0 %2283 }
 0x4ea   : >> { %2273 = vrot.lane.b32.xlu1 %v5752_v29, %s5054_s24 }
 0x4ed   : >> { %2566 = vrot.lane.b32.xlu0 %v5392_v28, %s5055_s25 }
 0x4ee   : >> { %2568 = vrot.lane.b32.xlu1 %v5400_v35, %s5055_s25 }
 0x4f1   : >> { %2564 = vrot.lane.b32.xlu0 %v5386_v22, %s5055_s25 }
 0x4f2   : >> { %2560 = vrot.lane.b32.xlu1 %v5372_v12, %s5055_s25 }
 0x4f5   : >> { %2562 = vrot.lane.b32.xlu0 %v5380_v17, %s5055_s25 }
 0x4f6   : >> { %2556 = vrot.lane.b32.xlu1 %v5356_v61, %s5055_s25 }
 0x4f9   : >> { %2558 = vrot.lane.b32.xlu0 %v5364_v7, %s5055_s25 }
 0x4fa   : >> { %2751 = vrot.lane.b32.xlu1 %v5757_v1, %s5056_s26 }
 0x4fd   : >> { %v1975_v21 = vpop.xlane.xlu1 %1974  ;;  %2755 = vrot.lane.b32.xlu0 %v5752_v29, %s5056_s26 }
 0x4fe   : >> { %v2004_v12 = vsub.f32 %v5844_v0, %v1975_v21 }
 0x4ff   : >> { %v1971_v28 = vpop.xlane.xlu0 %1970 }
 0x500   : >> { %v2002_v35 = vsub.f32 %v5847_v18, %v1971_v28  ;;  %v2022_v11 = vmul.f32 1.442695, %v2004_v12 }
 0x501   : >> { %v1977_v56 = vpop.xlane.xlu1 %1976  ;;  %2753 = vrot.lane.b32.xlu0 %v5762_v34, %s5056_s26 }
 0x502   : >> { %v2005_v22 = vsub.f32 %v5850_v15, %v1977_v56  ;;  %v2018_v53 = vmul.f32 1.442695, %v2002_v35 }
 0x504   : >> { %v2024_v17 = vmul.f32 1.442695, %v2005_v22  ;;  %4696 = vpow2.f32 %v2018_v53 }
 0x505   : >> { %v1973_v19 = vpop.xlane.xlu1 %1972  ;;  %v1983_v60 = vpop.xlane.xlu0 %1982  ;;  %2749 = vrot.lane.b32.xlu0 %v5769_v57, %s5056_s26 }
 0x506   : >> { %v2003_v61 = vsub.f32 %v5853_v33, %v1973_v19  ;;  %v2008_v7 = vsub.f32 %v5855_v23, %v1983_v60  ;;  %4698 = vpow2.f32 %v2024_v17 }
 0x508   : >> { %v2020_v50 = vmul.f32 1.442695, %v2003_v61  ;;  %v2030_v15 = vmul.f32 1.442695, %v2008_v7 }
 0x509   : >> { %v1979_v26 = vpop.xlane.xlu1 %1978 }
 0x50a   : >> { %v2006_v18 = vsub.f32 %v5859_v31, %v1979_v26  ;;  %4700 = vpow2.f32 %v2020_v50 }
 0x50b   : >> { %v1981_v28 = vpop.xlane.xlu0 %1980  ;;  %4702 = vpow2.f32 %v2022_v11 }
 0x50c   : >> { %v2026_v56 = vmul.f32 1.442695, %v2006_v18  ;;  %v2007_v21 = vsub.f32 %v5864_v20, %v1981_v28 }
 0x50d   : >> { %v1985_v0 = vpop.xlane.xlu1 %1984 }
 0x50e   : >> { %v2028_v35 = vmul.f32 1.442695, %v2007_v21  ;;  %v2009_v19 = vsub.f32 %v5861_v46, %v1985_v0  ;;  %4704 = vpow2.f32 %v2026_v56 }
 0x510   : >> { %4706 = vpow2.f32 %v2028_v35  ;;  %v2032_v53 = vmul.f32 1.442695, %v2009_v19  ;;  %v2334_v19 = vsel %vm908_vm3, %v5925_v25, 0 }
 0x511   : >> { %4708 = vpow2.f32 %v2030_v15  ;;  %v1991_v60 = vpop.xlane.xlu1 %1990  ;;  %v5942_v23 = vpop.eup %4696 }
 0x512   : >> { %4710 = vpow2.f32 %v2032_v53  ;;  %7171 = vst [vmem:[#allocation71_spill] sm:$0xff] %v5942_v23  ;;  %v2012_v17 = vsub.f32 %v5868_v8, %v1991_v60 }
 0x513   : >> { %v5944_v26 = vpop.eup %4698 }
 0x514   : >> { %7172 = vst [vmem:[#allocation72_spill] sm:$0xff] %v5944_v26  ;;  %v2038_v0 = vmul.f32 1.442695, %v2012_v17 }
 0x515   : >> { %v1987_v33 = vpop.xlane.xlu1 %1986 }
 0x516   : >> { %v2010_v50 = vsub.f32 %v5871_v37, %v1987_v33  ;;  %v2337_v37 = vsel %vm908_vm3, %v5814_v41, 0 }
 0x517   : >> { %v5946_v11 = vpop.eup %4700 }
 0x518   : >> { %7173 = vst [vmem:[#allocation73_spill] sm:$0xff] %v5946_v11  ;;  %v5949_v20 = vpop.eup %4702  ;;  %v2082_v46 = vpack.c.bf16 %v5946_v11, %v5942_v23  ;;  %v2034_v7 = vmul.f32 1.442695, %v2010_v50 }
 0x519   : >> { %7174 = vst [vmem:[#allocation74_spill] sm:$0xff] %v5949_v20  ;;  %v1993_v31 = vpop.xlane.xlu1 %1992  ;;  %v2083_v12 = vpack.c.bf16 %v5944_v26, %v5949_v20 }
 0x51a   : >> { %v2013_v22 = vsub.f32 %v5874_v27, %v1993_v31  ;;  %4330 = vmatprep.mubr.bf16.mxu1 %v2082_v46  ;;  %4712 = vpow2.f32 %v2034_v7 }
 0x51b   : >> { %v5957_v61 = vpop.eup %4704  ;;  %4331 = vmatmul.mubr.bf16.vlgmr.msra.gmra.mxu1 %v2083_v12 }
 0x51c   : >> { %7175 = vst [vmem:[#allocation75_spill] sm:$0xff] %v5957_v61  ;;  %v2040_v28 = vmul.f32 1.442695, %v2013_v22  ;;  %4347 = vmatpush3.bf16.xpose.msra.mxu1 %v2337_v37  ;;  %v2280_v22 = vpop.permute.xlu0 %2279 }
 0x51d   : >> { %v5961_v18 = vpop.eup %4706  ;;  %v1989_v56 = vpop.xlane.xlu1 %1988  ;;  %4567 = vmatprep.subr.msk.bf16.mxu1 %vm908_vm3, %v5925_v25  ;;  %v2322_v7 = vsel %vm908_vm3, %v2280_v22, 0 }
 0x51e   : >> { %7176 = vst [vmem:[#allocation76_spill] sm:$0xff] %v5961_v18  ;;  %v5963_v21 = vpop.eup %4708  ;;  %v2011_v8 = vsub.f32 %v5877_v5, %v1989_v56  ;;  %v2084_v27 = vpack.c.bf16 %v5961_v18, %v5957_v61  ;;  %4714 = vpow2.f32 %v2040_v28  ;;  %v2331_v5 = vsel %vm908_vm3, %v5929_v10, 0 }
 0x51f   : >> { %7177 = vst [vmem:[#allocation77_spill] sm:$0xff] %v5963_v21  ;;  %v5970_v15 = vpop.eup %4710 }
 0x520   : >> { %7178 = vst [vmem:[#allocation78_spill] sm:$0xff] %v5970_v15  ;;  %v2036_v41 = vmul.f32 1.442695, %v2011_v8  ;;  %4334 = vmatprep.mubr.bf16.mxu1 %v2084_v27  ;;  %v2085_v35 = vpack.c.bf16 %v5970_v15, %v5963_v21 }
 0x521   : >> { %v2282_v46 = vpop.permute.xlu1 %2281 }
 0x522   : >> { %4716 = vpow2.f32 %v2036_v41  ;;  %v2325_v12 = vsel %vm908_vm3, %v2282_v46, 0 }
 0x523   : >> { %4718 = vpow2.f32 %v2038_v0  ;;  %4335 = vmatmul.mubr.bf16.gmra.mxu1 %v2085_v35 }
 0x524   : >> { %4349 = vmatpush3.bf16.xpose.msra.mxu1 %v2334_v19 }
 0x525   : >> { %4568 = vmatprep.subr.msk.bf16.mxu1 %vm908_vm3, %v5929_v10  ;;  %v2328_v10 = vsel %vm908_vm3, %v5932_v44, 0 }
 0x527   : >> { %v5980_v53 = vpop.eup %4712 }
 0x528   : >> { %7179 = vst [vmem:[#allocation79_spill] sm:$0xff] %v5980_v53 }
 0x52b   : >> { %v5982_v60 = vpop.eup %4714 }
 0x52c   : >> { %4351 = vmatpush3.bf16.xpose.msra.mxu1 %v2331_v5  ;;  %7180 = vst [vmem:[#allocation80_spill] sm:$0xff] %v5982_v60 }
 0x52d   : >> { %4569 = vmatprep.subr.msk.bf16.mxu1 %vm908_vm3, %v5932_v44 }
 0x52f   : >> { %v5986_v33 = vpop.eup %4716 }
 0x530   : >> { %7181 = vst [vmem:[#allocation81_spill] sm:$0xff] %v5986_v33  ;;  %v5988_v50 = vpop.eup %4718  ;;  %v2086_v25 = vpack.c.bf16 %v5986_v33, %v5980_v53 }
 0x531   : >> { %7182 = vst [vmem:[#allocation82_spill] sm:$0xff] %v5988_v50  ;;  %v2087_v31 = vpack.c.bf16 %v5982_v60, %v5988_v50 }
 0x532   : >> { %4338 = vmatprep.mubr.bf16.mxu1 %v2086_v25 }
 0x533   : >> { %4339 = vmatmul.mubr.bf16.gmra.mxu1 %v2087_v31 }
 0x534   : >> { %4353 = vmatpush3.bf16.xpose.msra.mxu1 %v2328_v10 }
 0x535   : >> { %4570 = vmatprep.subr.msk.bf16.mxu1 %vm908_vm3, %v2282_v46 }
 0x53c   : >> { %4355 = vmatpush3.bf16.xpose.msra.mxu1 %v2325_v12 }
 0x53d   : >> { %4571 = vmatprep.subr.msk.bf16.mxu1 %vm908_vm3, %v2280_v22  ;;  %v7183_v22 = vld [vmem:[#allocation17_spill] sm:$0xff] }
 0x53e   : >> { %v6008_v12 = vpack.c.bf16 %v5774_v24, %v7183_v22  ;;  %v7190_v22 = vld [vmem:[#allocation14_spill] sm:$0xff] }
 0x540   : >> { %v1999_v17 = vpop.xlane.xlu0 %1998 }
 0x541   : >> { %v2016_v0 = vsub.f32 %v5890_v45, %v1999_v17 }
 0x543   : >> { %v2046_v31 = vmul.f32 1.442695, %v2016_v0 }
 0x544   : >> { %v1995_v37 = vpop.xlane.xlu0 %1994  ;;  %4357 = vmatpush3.bf16.xpose.msra.mxu1 %v2322_v7 }
 0x545   : >> { %v2014_v8 = vsub.f32 %v5893_v42, %v1995_v37 }
 0x547   : >> { %v2042_v35 = vmul.f32 1.442695, %v2014_v8 }
 0x548   : >> { %v2001_v28 = vpop.xlane.xlu0 %2000 }
 0x549   : >> { %v2017_v27 = vsub.f32 %v5896_v14, %v2001_v28  ;;  %4720 = vpow2.f32 %v2042_v35 }
 0x54b   : >> { %v2048_v19 = vmul.f32 1.442695, %v2017_v27 }
 0x54c   : >> { %v2278_v56 = vpop.permute.xlu0 %2277 }
 0x54d   : >> { %4572 = vmatprep.subr.msk.bf16.mxu1 %vm908_vm3, %v2278_v56  ;;  %v2319_v44 = vsel %vm908_vm3, %v2278_v56, 0  ;;  %4722 = vpow2.f32 %v2048_v19 }
 0x54e   : >> { %4359 = vmatpush3.bf16.xpose.msra.mxu1 %v2319_v44 }
 0x550   : >> { %v2260_v41 = vpop.permute.xlu0 %2259 }
 0x552   : >> { %v1997_v5 = vpop.xlane.xlu1 %1996 }
 0x553   : >> { %v2015_v25 = vsub.f32 %v5899_v62, %v1997_v5 }
 0x554   : >> { %v2264_v10 = vpop.permute.xlu0 %2263 }
 0x555   : >> { %v2044_v46 = vmul.f32 1.442695, %v2015_v25 }
 0x556   : >> { %v2276_v42 = vpop.permute.xlu1 %2275  ;;  %v6013_v28 = vpop.eup %4720 }
 0x557   : >> { %4724 = vpow2.f32 %v2044_v46  ;;  %4573 = vmatprep.subr.msk.bf16.mxu1 %vm908_vm3, %v2276_v42  ;;  %v2316_v45 = vsel %vm908_vm3, %v2276_v42, 0  ;;  %7184 = vst [vmem:[#allocation17_spill] sm:$0xff] %v6013_v28 }
 0x558   : >> { %4726 = vpow2.f32 %v2046_v31  ;;  %v2268_v14 = vpop.permute.xlu0 %2267  ;;  %4361 = vmatpush3.bf16.xpose.msra.mxu1 %v2316_v45  ;;  %v7188_v31 = vld [vmem:[#allocation16_spill] sm:$0xff]  ;;  %v7192_v45 = vld [vmem:[#allocation13_spill] sm:$0xff] }
 0x559   : >> { %4442 = vmatprep.subr.bf16.mxu1 %v6008_v12 }
 0x55a   : >> { %v2262_v62 = vpop.permute.xlu1 %2261  ;;  %v6015_v56 = vpop.eup %4722 }
 0x55b   : >> { %7185 = vst [vmem:[#allocation83_spill] sm:$0xff] %v6015_v56 }
 0x55c   : >> { %v2272_v17 = vpop.permute.xlu0 %2271 }
 0x55e   : >> { %v2266_v7 = vpop.permute.xlu1 %2265 }
 0x560   : >> { %v2571_v37 = vpop.permute.xlu0 %2570 }
 0x561   : >> { %4378 = vmatprep.subr.bf16.mxu0 %v2571_v37 }
 0x562   : >> { %4379 = vmatpush3.bf16.msra.mxu0 %v2571_v37  ;;  %v2270_v24 = vpop.permute.xlu1 %2269  ;;  %v7194_v37 = vld [vmem:[#allocation11_spill] sm:$0xff] }
 0x564   : >> { %v6017_v8 = vpop.eup %4724  ;;  %v2567_v19 = vpop.permute.xlu0 %2566 }
 0x565   : >> { %7186 = vst [vmem:[#allocation84_spill] sm:$0xff] %v6017_v8  ;;  %v6019_v44 = vpop.eup %4726  ;;  %v2088_v27 = vpack.c.bf16 %v6017_v8, %v6013_v28 }
 0x566   : >> { %7187 = vst [vmem:[#allocation85_spill] sm:$0xff] %v6019_v44  ;;  %v2274_v0 = vpop.permute.xlu1 %2273  ;;  %v2089_v35 = vpack.c.bf16 %v6015_v56, %v6019_v44 }
 0x567   : >> { %4342 = vmatprep.mubr.bf16.mxu1 %v2088_v27 }
 0x568   : >> { %4343 = vmatmul.mubr.bf16.gmra.mxu1 %v2089_v35  ;;  %v2565_v25 = vpop.permute.xlu0 %2564 }
 0x569   : >> { %4362 = vmatprep.mubr.msk.bf16.mxu1 %vm908_vm3, %v2260_v41  ;;  %v7189_v41 = vld [vmem:[#allocation15_spill] sm:$0xff] }
 0x56a   : >> { %v2569_v5 = vpop.permute.xlu1 %2568 }
 0x56b   : >> { %4380 = vmatprep.subr.bf16.mxu0 %v2569_v5 }
 0x56c   : >> { %4381 = vmatpush3.bf16.msra.mxu0 %v2569_v5  ;;  %v2563_v46 = vpop.permute.xlu0 %2562  ;;  %v7196_v5 = vld [vmem:[#allocation9_spill] sm:$0xff] }
 0x56d   : >> { %4382 = vmatprep.subr.bf16.mxu0 %v2567_v19 }
 0x56e   : >> { %v2561_v42 = vpop.permute.xlu1 %2560 }
 0x570   : >> { %4363 = vmatmul.mubr.msk.bf16.vlgmr.msra.gmra.mxu1 %vm908_vm3, %v2262_v62  ;;  %4383 = vmatpush3.bf16.msra.mxu0 %v2567_v19  ;;  %v7195_v19 = vld [vmem:[#allocation8_spill] sm:$0xff] }
 0x571   : >> { %4443 = vmatpush3.bf16.msra.mxu1 %v6008_v12  ;;  %4384 = vmatprep.subr.bf16.mxu0 %v2565_v25 }
 0x572   : >> { %4444 = vmatprep.subr.bf16.mxu1 %v7188_v31  ;;  %4366 = vmatprep.mubr.msk.bf16.mxu1 %vm908_vm3, %v2264_v10  ;;  %v7191_v10 = vld [vmem:[#allocation12_spill] sm:$0xff]  ;;  %v2557_v35 = vpop.permute.xlu1 %2556 }
 0x573   : >> { %v6042_v62 = vpack.c.bf16 %v7192_v45, %v7191_v10 }
 0x574   : >> { %4385 = vmatpush3.bf16.msra.mxu0 %v2565_v25  ;;  %v6060_v25 = vpack.c.bf16 %v7196_v5, %v7195_v19 }
 0x575   : >> { %4445 = vmatpush3.bf16.msra.mxu1 %v7188_v31  ;;  %4386 = vmatprep.subr.bf16.mxu0 %v2563_v46 }
 0x576   : >> { %4446 = vmatprep.subr.bf16.mxu1 %v7189_v41  ;;  %v6156_v33 = vpop.permute.xlu1 %2751 }
 0x578   : >> { %4367 = vmatmul.mubr.msk.bf16.gmra.mxu1 %vm908_vm3, %v2266_v7  ;;  %4387 = vmatpush3.bf16.msra.mxu0 %v2563_v46  ;;  %v2559_v7 = vpop.permute.xlu0 %2558  ;;  %v7198_v46 = vld [vmem:[#allocation7_spill] sm:$0xff] }
 0x579   : >> { %4447 = vmatpush3.bf16.msra.mxu1 %v7189_v41  ;;  %4388 = vmatprep.subr.bf16.mxu0 %v2561_v42 }
 0x57a   : >> { %4448 = vmatprep.subr.bf16.mxu1 %v7190_v22  ;;  %4370 = vmatprep.mubr.msk.bf16.mxu1 %vm908_vm3, %v2268_v14  ;;  %v7193_v14 = vld [vmem:[#allocation10_spill] sm:$0xff] }
 0x57b   : >> { %v6050_v27 = vpack.c.bf16 %v7194_v37, %v7193_v14 }
 0x57c   : >> { %4389 = vmatpush3.bf16.msra.mxu0 %v2561_v42 }
 0x57d   : >> { %4449 = vmatpush3.bf16.msra.mxu1 %v7190_v22  ;;  %4390 = vmatprep.subr.bf16.mxu0 %v2559_v7 }
 0x57e   : >> { %4450 = vmatprep.subr.bf16.mxu1 %v6042_v62 }
 0x580   : >> { %4371 = vmatmul.mubr.msk.bf16.gmra.mxu1 %vm908_vm3, %v2270_v24  ;;  %4391 = vmatpush3.bf16.msra.mxu0 %v2559_v7  ;;  %v7197_v24 = vld [vmem:[#allocation6_spill] sm:$0xff]  ;;  %v6078_v7 = vpop.permute.xlu0 %2755 }
 0x581   : >> { %4451 = vmatpush3.bf16.msra.mxu1 %v6042_v62  ;;  %4392 = vmatprep.subr.bf16.mxu0 %v2557_v35  ;;  %v6066_v42 = vpack.c.bf16 %v7198_v46, %v7197_v24 }
 0x582   : >> { %4452 = vmatprep.subr.bf16.mxu1 %v6050_v27  ;;  %4374 = vmatprep.mubr.msk.bf16.mxu1 %vm908_vm3, %v2272_v17 }
 0x584   : >> { %4393 = vmatpush3.bf16.msra.mxu0 %v2557_v35  ;;  %v6154_v50 = vpop.permute.xlu0 %2753 }
 0x585   : >> { %4453 = vmatpush3.bf16.msra.mxu1 %v6050_v27  ;;  %4574 = vmatprep.subr.msk.bf16.mxu0 %vm908_vm3, %v6078_v7 }
 0x586   : >> { %4454 = vmatprep.subr.bf16.mxu1 %v6060_v25 }
 0x588   : >> { %4375 = vmatmul.mubr.msk.bf16.gmra.mxu1 %vm908_vm3, %v2274_v0  ;;  %v6158_v53 = vpop.permute.xlu0 %2749 }
 0x589   : >> { %4455 = vmatpush3.bf16.msra.mxu1 %v6060_v25 }
 0x58a   : >> { %4456 = vmatprep.subr.bf16.mxu1 %v6066_v42 }
 0x58d   : >> { %4457 = vmatpush3.bf16.msra.mxu1 %v6066_v42 }
 0x5db   : >> { %v6072_v17 = vpop.f32.mrf.mxu1 }
 0x5dc   : >> { %7199 = vst [vmem:[#allocation16_spill] sm:$0xff] %v6072_v17 }
 0x5dd   : >> { %v6074_v10 = vpop.f32.mrf.mxu1 }
 0x5de   : >> { %7200 = vst [vmem:[#allocation15_spill] sm:$0xff] %v6074_v10 }
 0x5df   : >> { %v6076_v45 = vpop.f32.mrf.mxu1 }
 0x5e0   : >> { %7201 = vst [vmem:[#allocation14_spill] sm:$0xff] %v6076_v45 }
 0x5e1   : >> { %v6082_v14 = vpop.f32.mrf.mxu1 }
 0x5e2   : >> { %7202 = vst [vmem:[#allocation12_spill] sm:$0xff] %v6082_v14 }
 0x5e3   : >> { %v6084_v0 = vpop.f32.mrf.mxu1 }
 0x5e4   : >> { %7203 = vst [vmem:[#allocation13_spill] sm:$0xff] %v6084_v0 }
 0x5e5   : >> { %v6086_v37 = vpop.f32.mrf.mxu1 }
 0x5e6   : >> { %7204 = vst [vmem:[#allocation10_spill] sm:$0xff] %v6086_v37 }
 0x5e7   : >> { %v6088_v35 = vpop.f32.mrf.mxu1 }
 0x5e8   : >> { %7205 = vst [vmem:[#allocation11_spill] sm:$0xff] %v6088_v35 }
 0x5e9   : >> { %v6090_v19 = vpop.f32.mrf.mxu1 }
 0x5ea   : >> { %7206 = vst [vmem:[#allocation8_spill] sm:$0xff] %v6090_v19 }
 0x5f3   : >> { %v6092_v5 = vpop.f32.mrf.mxu1 }
 0x5f4   : >> { %7207 = vst [vmem:[#allocation9_spill] sm:$0xff] %v6092_v5 }
 0x5f5   : >> { %v6094_v24 = vpop.f32.mrf.mxu1 }
 0x5f6   : >> { %7208 = vst [vmem:[#allocation6_spill] sm:$0xff] %v6094_v24 }
 0x5f7   : >> { %v6096_v46 = vpop.f32.mrf.mxu1 }
 0x5f8   : >> { %7209 = vst [vmem:[#allocation7_spill] sm:$0xff] %v6096_v46 }
 0x5f9   : >> { %v6098_v45 = vpop.f32.mrf.mxu1 }
 0x5fa   : >> { %7210 = vst [vmem:[#allocation86_spill] sm:$0xff] %v6098_v45 }
 0x628   : >> { %v6100_v17 = vpop.f32.mrf.mxu1 }
 0x629   : >> { %7211 = vst [vmem:[#allocation87_spill] sm:$0xff] %v6100_v17 }
 0x62a   : >> { %v6102_v10 = vpop.f32.mrf.mxu1 }
 0x62b   : >> { %7212 = vst [vmem:[#allocation88_spill] sm:$0xff] %v6102_v10 }
 0x62c   : >> { %v6104_v14 = vpop.f32.mrf.mxu1 }
 0x62d   : >> { %7213 = vst [vmem:[#allocation89_spill] sm:$0xff] %v6104_v14 }
 0x62e   : >> { %v6106_v0 = vpop.f32.mrf.mxu1 }
 0x62f   : >> { %7214 = vst [vmem:[#allocation90_spill] sm:$0xff] %v6106_v0 }
 0x630   : >> { %v4364_v37 = vpop.f32.mrf.mxu1 }
 0x631   : >> { %2440 = vmax.xlane.f32.xlu1 %v4364_v37 }
 0x632   : >> { %v2373_v35 = vpop.f32.mrf.mxu1 }
 0x633   : >> { %2436 = vmax.xlane.f32.xlu0 %v2373_v35 }
 0x634   : >> { %v4365_v19 = vpop.f32.mrf.mxu1 }
 0x635   : >> { %2442 = vmax.xlane.f32.xlu1 %v4365_v19 }
 0x636   : >> { %v2376_v5 = vpop.f32.mrf.mxu1 }
 0x638   : >> { %v6108_v24 = vpop.f32.mrf.mxu1 }
 0x639   : >> { %2438 = vmax.xlane.f32.xlu1 %v2376_v5  ;;  %2448 = vmax.xlane.f32.xlu0 %v6108_v24 }
 0x63a   : >> { %v2389_v46 = vpop.f32.mrf.mxu1 }
 0x63c   : >> { %v6111_v17 = vpop.f32.mrf.mxu1 }
 0x63d   : >> { %2444 = vmax.xlane.f32.xlu1 %v2389_v46 }
 0x63e   : >> { %v2392_v10 = vpop.f32.mrf.mxu1 }
 0x63f   : >> { %2446 = vmax.xlane.f32.xlu0 %v2392_v10 }
 0x640   : >> { %v6114_v14 = vpop.f32.mrf.mxu1 }
 0x641   : >> { %2450 = vmax.xlane.f32.xlu1 %v6111_v17 }
 0x642   : >> { %v6117_v0 = vpop.f32.mrf.mxu1 }
 0x644   : >> { %v6120_v45 = vpop.f32.mrf.mxu1 }
 0x645   : >> { %2456 = vmax.xlane.f32.xlu1 %v6114_v14 }
 0x646   : >> { %v6123_v56 = vpop.f32.mrf.mxu1 }
 0x648   : >> { %v6130_v44 = vpop.f32.mrf.mxu1 }
 0x649   : >> { %2452 = vmax.xlane.f32.xlu1 %v6117_v0 }
 0x64a   : >> { %v6133_v8 = vpop.f32.mrf.mxu1 }
 0x64c   : >> { %v6136_v28 = vpop.f32.mrf.mxu1 }
 0x64d   : >> { %2458 = vmax.xlane.f32.xlu1 %v6120_v45 }
 0x64e   : >> { %v6139_v60 = vpop.f32.mrf.mxu1 }
 0x651   : >> { %2454 = vmax.xlane.f32.xlu1 %v6123_v56 }
 0x655   : >> { %2745 = vrot.lane.b32.xlu0 %v5881_v16, %s5056_s26 }
 0x662   : >> { %2747 = vrot.lane.b32.xlu1 %v5886_v52, %s5056_s26 }
 0x674   : >> { %2464 = vmax.xlane.f32.xlu0 %v6130_v44 }
 0x678   : >> { %2460 = vmax.xlane.f32.xlu0 %v6133_v8 }
 0x67c   : >> { %2466 = vmax.xlane.f32.xlu0 %v6136_v28 }
 0x686   : >> { %2462 = vmax.xlane.f32.xlu1 %v6139_v60 }
 0x692   : >> { %2743 = vrot.lane.b32.xlu0 %v5903_v39, %s5056_s26 }
 0x696   : >> { %2725 = vrot.lane.b32.xlu0 %v5908_v51, %s5057_s27 }
 0x697   : >> { %2741 = vrot.lane.b32.xlu1 %v5908_v51, %s5056_s26 }
 0x69a   : >> { %2729 = vrot.lane.b32.xlu0 %v5881_v16, %s5057_s27 }
 0x69b   : >> { %2727 = vrot.lane.b32.xlu1 %v5903_v39, %s5057_s27 }
 0x69e   : >> { %2733 = vrot.lane.b32.xlu0 %v5769_v57, %s5057_s27 }
 0x69f   : >> { %2731 = vrot.lane.b32.xlu1 %v5886_v52, %s5057_s27 }
 0x6a2   : >> { %2737 = vrot.lane.b32.xlu0 %v5762_v34, %s5057_s27 }
 0x6a3   : >> { %2735 = vrot.lane.b32.xlu1 %v5757_v1, %s5057_s27 }
 0x6a6   : >> { %3193 = vrot.lane.b32.xlu0 %v5757_v1, %s5058_s29 }
 0x6a7   : >> { %2739 = vrot.lane.b32.xlu1 %v5752_v29, %s5057_s27 }
 0x6ab   : >> { %3197 = vrot.lane.b32.xlu1 %v5752_v29, %s5058_s29 }
 0x6af   : >> { %3195 = vrot.lane.b32.xlu1 %v5762_v34, %s5058_s29 }
 0x6b3   : >> { %3191 = vrot.lane.b32.xlu1 %v5769_v57, %s5058_s29 }
 0x6ba   : >> { %v2441_v15 = vpop.xlane.xlu1 %2440 }
 0x6bb   : >> { %v2470_v20 = vsub.f32 %v4364_v37, %v2441_v15 }
 0x6bc   : >> { %v2437_v21 = vpop.xlane.xlu0 %2436 }
 0x6bd   : >> { %v2468_v18 = vsub.f32 %v2373_v35, %v2437_v21  ;;  %v2488_v43 = vmul.f32 1.442695, %v2470_v20 }
 0x6be   : >> { %v2443_v61 = vpop.xlane.xlu1 %2442 }
 0x6bf   : >> { %v2471_v26 = vsub.f32 %v4365_v19, %v2443_v61  ;;  %v2484_v11 = vmul.f32 1.442695, %v2468_v18 }
 0x6c1   : >> { %v2490_v40 = vmul.f32 1.442695, %v2471_v26  ;;  %4728 = vpow2.f32 %v2484_v11 }
 0x6c2   : >> { %v2439_v23 = vpop.xlane.xlu1 %2438  ;;  %v2449_v48 = vpop.xlane.xlu0 %2448 }
 0x6c3   : >> { %v2469_v4 = vsub.f32 %v2376_v5, %v2439_v23  ;;  %v2474_v58 = vsub.f32 %v6108_v24, %v2449_v48  ;;  %4730 = vpow2.f32 %v2490_v40 }
 0x6c5   : >> { %v2486_v6 = vmul.f32 1.442695, %v2469_v4  ;;  %v2496_v61 = vmul.f32 1.442695, %v2474_v58 }
 0x6c6   : >> { %v2445_v63 = vpop.xlane.xlu1 %2444 }
 0x6c7   : >> { %v2472_v36 = vsub.f32 %v2389_v46, %v2445_v63  ;;  %4732 = vpow2.f32 %v2486_v6 }
 0x6c8   : >> { %v2447_v59 = vpop.xlane.xlu0 %2446  ;;  %4734 = vpow2.f32 %v2488_v43 }
 0x6c9   : >> { %v2492_v21 = vmul.f32 1.442695, %v2472_v36  ;;  %v2473_v35 = vsub.f32 %v2392_v10, %v2447_v59 }
 0x6ca   : >> { %v2451_v15 = vpop.xlane.xlu1 %2450 }
 0x6cb   : >> { %v2494_v18 = vmul.f32 1.442695, %v2473_v35  ;;  %v2475_v26 = vsub.f32 %v6111_v17, %v2451_v15  ;;  %4736 = vpow2.f32 %v2492_v21  ;;  %v2800_v15 = vsel %vm908_vm3, %v6154_v50, 0 }
 0x6cd   : >> { %4738 = vpow2.f32 %v2494_v18  ;;  %v2498_v23 = vmul.f32 1.442695, %v2475_v26 }
 0x6ce   : >> { %4740 = vpow2.f32 %v2496_v61  ;;  %v2457_v4 = vpop.xlane.xlu1 %2456  ;;  %v6162_v11 = vpop.eup %4728 }
 0x6cf   : >> { %4742 = vpow2.f32 %v2498_v23  ;;  %v2478_v17 = vsub.f32 %v6114_v14, %v2457_v4 }
 0x6d0   : >> { %v6164_v63 = vpop.eup %4730 }
 0x6d1   : >> { %v2504_v35 = vmul.f32 1.442695, %v2478_v17 }
 0x6d2   : >> { %v2453_v48 = vpop.xlane.xlu1 %2452 }
 0x6d3   : >> { %v2476_v59 = vsub.f32 %v6117_v0, %v2453_v48  ;;  %v2803_v0 = vsel %vm908_vm3, %v6078_v7, 0 }
 0x6d4   : >> { %v6166_v6 = vpop.eup %4732 }
 0x6d5   : >> { %v6169_v58 = vpop.eup %4734  ;;  %v2548_v40 = vpack.c.bf16 %v6166_v6, %v6162_v11  ;;  %v2500_v37 = vmul.f32 1.442695, %v2476_v59 }
 0x6d6   : >> { %v2459_v36 = vpop.xlane.xlu1 %2458  ;;  %v2549_v20 = vpack.c.bf16 %v6164_v63, %v6169_v58 }
 0x6d7   : >> { %v2479_v43 = vsub.f32 %v6120_v45, %v2459_v36  ;;  %4394 = vmatprep.mubr.bf16.mxu0 %v2548_v40  ;;  %4744 = vpow2.f32 %v2500_v37  ;;  %v2746_v36 = vpop.permute.xlu0 %2745 }
 0x6d8   : >> { %v6177_v10 = vpop.eup %4736  ;;  %4395 = vmatmul.mubr.bf16.vlgmr.msra.gmra.mxu0 %v2549_v20  ;;  %v2788_v20 = vsel %vm908_vm3, %v2746_v36, 0 }
 0x6d9   : >> { %v2506_v5 = vmul.f32 1.442695, %v2479_v43  ;;  %4411 = vmatpush3.bf16.xpose.msra.mxu0 %v2803_v0 }
 0x6da   : >> { %v6181_v19 = vpop.eup %4738  ;;  %v2455_v24 = vpop.xlane.xlu1 %2454  ;;  %4575 = vmatprep.subr.msk.bf16.mxu0 %vm908_vm3, %v6154_v50 }
 0x6db   : >> { %v6183_v46 = vpop.eup %4740  ;;  %v2477_v45 = vsub.f32 %v6123_v56, %v2455_v24  ;;  %v2550_v14 = vpack.c.bf16 %v6181_v19, %v6177_v10  ;;  %4746 = vpow2.f32 %v2506_v5  ;;  %v2797_v56 = vsel %vm908_vm3, %v6156_v33, 0 }
 0x6dc   : >> { %v6190_v21 = vpop.eup %4742 }
 0x6dd   : >> { %v2502_v7 = vmul.f32 1.442695, %v2477_v45  ;;  %4398 = vmatprep.mubr.bf16.mxu0 %v2550_v14  ;;  %v2551_v61 = vpack.c.bf16 %v6190_v21, %v6183_v46 }
 0x6de   : >> { %v2748_v59 = vpop.permute.xlu1 %2747 }
 0x6df   : >> { %4748 = vpow2.f32 %v2502_v7  ;;  %v2791_v40 = vsel %vm908_vm3, %v2748_v59, 0 }
 0x6e0   : >> { %4750 = vpow2.f32 %v2504_v35  ;;  %4399 = vmatmul.mubr.bf16.gmra.mxu0 %v2551_v61 }
 0x6e1   : >> { %4413 = vmatpush3.bf16.xpose.msra.mxu0 %v2800_v15 }
 0x6e2   : >> { %4576 = vmatprep.subr.msk.bf16.mxu0 %vm908_vm3, %v6156_v33  ;;  %v2794_v33 = vsel %vm908_vm3, %v6158_v53, 0 }
 0x6e4   : >> { %v6200_v18 = vpop.eup %4744 }
 0x6e8   : >> { %v6202_v26 = vpop.eup %4746 }
 0x6e9   : >> { %4415 = vmatpush3.bf16.xpose.msra.mxu0 %v2797_v56 }
 0x6ea   : >> { %4577 = vmatprep.subr.msk.bf16.mxu0 %vm908_vm3, %v6158_v53 }
 0x6ec   : >> { %v6206_v23 = vpop.eup %4748 }
 0x6ed   : >> { %v6208_v4 = vpop.eup %4750  ;;  %v2552_v50 = vpack.c.bf16 %v6206_v23, %v6200_v18 }
 0x6ee   : >> { %v2553_v48 = vpack.c.bf16 %v6202_v26, %v6208_v4 }
 0x6ef   : >> { %4402 = vmatprep.mubr.bf16.mxu0 %v2552_v50 }
 0x6f0   : >> { %4403 = vmatmul.mubr.bf16.gmra.mxu0 %v2553_v48 }
 0x6f1   : >> { %4417 = vmatpush3.bf16.xpose.msra.mxu0 %v2794_v33 }
 0x6f2   : >> { %4578 = vmatprep.subr.msk.bf16.mxu0 %vm908_vm3, %v2748_v59 }
 0x6f9   : >> { %4419 = vmatpush3.bf16.xpose.msra.mxu0 %v2791_v40 }
 0x6fa   : >> { %4579 = vmatprep.subr.msk.bf16.mxu0 %vm908_vm3, %v2746_v36 }
 0x6fd   : >> { %v2465_v43 = vpop.xlane.xlu0 %2464 }
 0x6fe   : >> { %v2482_v45 = vsub.f32 %v6130_v44, %v2465_v43 }
 0x700   : >> { %v2512_v15 = vmul.f32 1.442695, %v2482_v45 }
 0x701   : >> { %v2461_v17 = vpop.xlane.xlu0 %2460  ;;  %4421 = vmatpush3.bf16.xpose.msra.mxu0 %v2788_v20 }
 0x702   : >> { %v2480_v5 = vsub.f32 %v6133_v8, %v2461_v17 }
 0x704   : >> { %v2508_v14 = vmul.f32 1.442695, %v2480_v5 }
 0x705   : >> { %v2467_v37 = vpop.xlane.xlu0 %2466 }
 0x706   : >> { %v2483_v24 = vsub.f32 %v6136_v28, %v2467_v37  ;;  %4752 = vpow2.f32 %v2508_v14 }
 0x708   : >> { %v2514_v35 = vmul.f32 1.442695, %v2483_v24 }
 0x709   : >> { %v2744_v0 = vpop.permute.xlu0 %2743 }
 0x70a   : >> { %4580 = vmatprep.subr.msk.bf16.mxu0 %vm908_vm3, %v2744_v0  ;;  %v2785_v53 = vsel %vm908_vm3, %v2744_v0, 0  ;;  %4754 = vpow2.f32 %v2514_v35 }
 0x70b   : >> { %4423 = vmatpush3.bf16.xpose.msra.mxu0 %v2785_v53 }
 0x70d   : >> { %v2726_v36 = vpop.permute.xlu0 %2725 }
 0x70f   : >> { %v2463_v7 = vpop.xlane.xlu1 %2462 }
 0x710   : >> { %v2481_v61 = vsub.f32 %v6139_v60, %v2463_v7 }
 0x711   : >> { %v2730_v43 = vpop.permute.xlu0 %2729 }
 0x712   : >> { %v2510_v56 = vmul.f32 1.442695, %v2481_v61 }
 0x713   : >> { %v2742_v50 = vpop.permute.xlu1 %2741  ;;  %v6228_v28 = vpop.eup %4752 }
 0x714   : >> { %4756 = vpow2.f32 %v2510_v56  ;;  %4581 = vmatprep.subr.msk.bf16.mxu0 %vm908_vm3, %v2742_v50  ;;  %v2782_v8 = vsel %vm908_vm3, %v2742_v50, 0 }
 0x715   : >> { %4758 = vpow2.f32 %v2512_v15  ;;  %4425 = vmatpush3.bf16.xpose.msra.mxu0 %v2782_v8  ;;  %v2734_v17 = vpop.permute.xlu0 %2733 }
 0x717   : >> { %v6230_v44 = vpop.eup %4754  ;;  %v2728_v40 = vpop.permute.xlu1 %2727 }
 0x719   : >> { %v2738_v0 = vpop.permute.xlu0 %2737 }
 0x71b   : >> { %v2732_v20 = vpop.permute.xlu1 %2731 }
 0x71f   : >> { %v2736_v37 = vpop.permute.xlu1 %2735 }
 0x721   : >> { %v6232_v48 = vpop.eup %4756 }
 0x722   : >> { %v6234_v33 = vpop.eup %4758  ;;  %v2554_v60 = vpack.c.bf16 %v6232_v48, %v6228_v28 }
 0x723   : >> { %v2555_v59 = vpack.c.bf16 %v6230_v44, %v6234_v33  ;;  %v2740_v5 = vpop.permute.xlu1 %2739 }
 0x724   : >> { %4406 = vmatprep.mubr.bf16.mxu0 %v2554_v60 }
 0x725   : >> { %4407 = vmatmul.mubr.bf16.gmra.mxu0 %v2555_v59 }
 0x726   : >> { %4426 = vmatprep.mubr.msk.bf16.mxu0 %vm908_vm3, %v2726_v36 }
 0x727   : >> { %v6264_v45 = vpop.permute.xlu1 %3197 }
 0x728   : >> { %4582 = vmatprep.subr.msk.bf16.mxu1 %vm908_vm3, %v6264_v45 }
 0x72d   : >> { %4427 = vmatmul.mubr.msk.bf16.vlgmr.msra.gmra.mxu0 %vm908_vm3, %v2728_v40 }
 0x72e   : >> { %4430 = vmatprep.mubr.msk.bf16.mxu0 %vm908_vm3, %v2730_v43 }
 0x735   : >> { %4431 = vmatmul.mubr.msk.bf16.gmra.mxu0 %vm908_vm3, %v2732_v20 }
 0x736   : >> { %4434 = vmatprep.mubr.msk.bf16.mxu0 %vm908_vm3, %v2734_v17 }
 0x73d   : >> { %4435 = vmatmul.mubr.msk.bf16.gmra.mxu0 %vm908_vm3, %v2736_v37 }
 0x73e   : >> { %4438 = vmatprep.mubr.msk.bf16.mxu0 %vm908_vm3, %v2738_v0 }
 0x745   : >> { %4439 = vmatmul.mubr.msk.bf16.gmra.mxu0 %vm908_vm3, %v2740_v5 }
 0x798   : >> { %v6256_v53 = vpop.f32.mrf.mxu0 }
 0x799   : >> { %7215 = vst [vmem:[#allocation91_spill] sm:$0xff] %v6256_v53 }
 0x79a   : >> { %v6258_v29 = vpop.f32.mrf.mxu0 }
 0x79b   : >> { %7216 = vst [vmem:[#allocation92_spill] sm:$0xff] %v6258_v29 }
 0x79c   : >> { %v6260_v1 = vpop.f32.mrf.mxu0 }
 0x79d   : >> { %7217 = vst [vmem:[#allocation93_spill] sm:$0xff] %v6260_v1 }
 0x79e   : >> { %v6262_v24 = vpop.f32.mrf.mxu0 }
 0x79f   : >> { %7218 = vst [vmem:[#allocation94_spill] sm:$0xff] %v6262_v24 }
 0x7a0   : >> { %v6268_v34 = vpop.f32.mrf.mxu0 }
 0x7a1   : >> { %7219 = vst [vmem:[#allocation95_spill] sm:$0xff] %v6268_v34  ;;  %v5025_v34 = vld [vmem:[%s5212_s13 + $0x30] sm:$0xff]  }
 0x7a2   : >> { %v6270_v14 = vpop.f32.mrf.mxu0 }
 0x7a3   : >> { %7220 = vst [vmem:[#allocation96_spill] sm:$0xff] %v6270_v14 }
 0x7a4   : >> { %v6272_v57 = vpop.f32.mrf.mxu0 }
 0x7a5   : >> { %7221 = vst [vmem:[#allocation97_spill] sm:$0xff] %v6272_v57  ;;  %v5024_v57 = vld [vmem:[%s5212_s13 + $0x20] sm:$0xff]  }
 0x7a6   : >> { %v6274_v35 = vpop.f32.mrf.mxu0 }
 0x7a7   : >> { %7222 = vst [vmem:[#allocation98_spill] sm:$0xff] %v6274_v35 }
 0x7b0   : >> { %v6276_v7 = vpop.f32.mrf.mxu0 }
 0x7b1   : >> { %7223 = vst [vmem:[#allocation99_spill] sm:$0xff] %v6276_v7 }
 0x7b2   : >> { %v6278_v61 = vpop.f32.mrf.mxu0 }
 0x7b3   : >> { %7224 = vst [vmem:[#allocation100_spill] sm:$0xff] %v6278_v61 }
 0x7b4   : >> { %v6280_v15 = vpop.f32.mrf.mxu0 }
 0x7b5   : >> { %7225 = vst [vmem:[#allocation101_spill] sm:$0xff] %v6280_v15 }
 0x7b6   : >> { %v6282_v56 = vpop.f32.mrf.mxu0 }
 0x7b7   : >> { %7226 = vst [vmem:[#allocation102_spill] sm:$0xff] %v6282_v56 }
 0x7e5   : >> { %v6284_v50 = vpop.f32.mrf.mxu0 }
 0x7e6   : >> { %7227 = vst [vmem:[#allocation103_spill] sm:$0xff] %v6284_v50 }
 0x7e7   : >> { %v6286_v8 = vpop.f32.mrf.mxu0 }
 0x7e8   : >> { %7228 = vst [vmem:[#allocation104_spill] sm:$0xff] %v6286_v8 }
 0x7e9   : >> { %v6288_v60 = vpop.f32.mrf.mxu0 }
 0x7ea   : >> { %7229 = vst [vmem:[#allocation105_spill] sm:$0xff] %v6288_v60 }
 0x7eb   : >> { %v6290_v59 = vpop.f32.mrf.mxu0 }
 0x7ec   : >> { %7230 = vst [vmem:[#allocation106_spill] sm:$0xff] %v6290_v59 }
 0x7ed   : >> { %v6292_v36 = vpop.f32.mrf.mxu0 }
 0x7ee   : >> { %2906 = vmax.xlane.f32.xlu0 %v6292_v36 }
 0x7ef   : >> { %v2839_v40 = vpop.f32.mrf.mxu0 }
 0x7f1   : >> { %v6295_v43 = vpop.f32.mrf.mxu0 }
 0x7f2   : >> { %2902 = vmax.xlane.f32.xlu0 %v2839_v40 }
 0x7f3   : >> { %v2842_v20 = vpop.f32.mrf.mxu0 }
 0x7f4   : >> { %2904 = vmax.xlane.f32.xlu1 %v2842_v20 }
 0x7f5   : >> { %v6297_v17 = vpop.f32.mrf.mxu0 }
 0x7f6   : >> { %2908 = vmax.xlane.f32.xlu0 %v6295_v43 }
 0x7f7   : >> { %v6300_v37 = vpop.f32.mrf.mxu0 }
 0x7f9   : >> { %v6302_v0 = vpop.f32.mrf.mxu0 }
 0x7fa   : >> { %2914 = vmax.xlane.f32.xlu0 %v6297_v17 }
 0x7fb   : >> { %v6305_v5 = vpop.f32.mrf.mxu0 }
 0x7fd   : >> { %v6307_v60 = vpop.f32.mrf.mxu0 }
 0x7fe   : >> { %2910 = vmax.xlane.f32.xlu0 %v6300_v37 }
 0x7ff   : >> { %v6310_v50 = vpop.f32.mrf.mxu0 }
 0x801   : >> { %v6312_v59 = vpop.f32.mrf.mxu0 }
 0x802   : >> { %2916 = vmax.xlane.f32.xlu0 %v6302_v0 }
 0x803   : >> { %v6315_v8 = vpop.f32.mrf.mxu0 }
 0x804   : >> { %2920 = vmax.xlane.f32.xlu1 %v6315_v8 }
 0x805   : >> { %v6319_v15 = vpop.f32.mrf.mxu0 }
 0x806   : >> { %2912 = vmax.xlane.f32.xlu0 %v6305_v5 }
 0x807   : >> { %v6325_v7 = vpop.f32.mrf.mxu0 }
 0x808   : >> { %2930 = vmax.xlane.f32.xlu1 %v6319_v15 }
 0x809   : >> { %v6339_v1 = vpop.f32.mrf.mxu0 }
 0x80a   : >> { %2922 = vmax.xlane.f32.xlu0 %v6307_v60 }
 0x80b   : >> { %v6344_v53 = vpop.f32.mrf.mxu0 }
 0x80e   : >> { %2918 = vmax.xlane.f32.xlu0 %v6310_v50 }
 0x812   : >> { %2924 = vmax.xlane.f32.xlu0 %v6312_v59 }
 0x816   : >> { %2926 = vmax.xlane.f32.xlu0 %v6325_v7 }
 0x819   : >> { %3187 = vrot.lane.b32.xlu1 %v5881_v16, %s5058_s29 }
 0x81d   : >> { %3185 = vrot.lane.b32.xlu1 %v5903_v39, %s5058_s29 }
 0x82c   : >> { %3189 = vrot.lane.b32.xlu0 %v5886_v52, %s5058_s29 }
 0x830   : >> { %3171 = vrot.lane.b32.xlu0 %v5881_v16, %s5059_s30  ;;  %v5026_v16 = vld [vmem:[%s5212_s13 + $0x28] sm:$0xff]  }
 0x834   : >> { %3175 = vrot.lane.b32.xlu0 %v5024_v57, %s5059_s30 }
 0x838   : >> { %3179 = vrot.lane.b32.xlu0 %v5025_v34, %s5059_s30 }
 0x83c   : >> { %3484 = vrot.lane.b32.xlu0 %v7188_v31, %s5050_s20  ;;  %v5027_v31 = vld [vmem:[%s5212_s13 + $0x38] sm:$0xff]  }
 0x840   : >> { %3480 = vrot.lane.b32.xlu0 %v7190_v22, %s5050_s20  ;;  %v3196_v22 = vpop.permute.xlu1 %3195 }
 0x841   : >> { %2932 = vmax.xlane.f32.xlu1 %v6339_v1 }
 0x844   : >> { %3476 = vrot.lane.b32.xlu0 %v6050_v27, %s5050_s20  ;;  %v6360_v27 = vpop.permute.xlu0 %3193 }
 0x845   : >> { %2928 = vmax.xlane.f32.xlu1 %v6344_v53 }
 0x856   : >> { %3183 = vrot.lane.b32.xlu1 %v5908_v51, %s5058_s29 }
 0x85a   : >> { %3167 = vrot.lane.b32.xlu1 %v5908_v51, %s5059_s30 }
 0x85e   : >> { %3169 = vrot.lane.b32.xlu1 %v5903_v39, %s5059_s30  ;;  %v6364_v39 = vpop.permute.xlu1 %3191 }
 0x862   : >> { %3173 = vrot.lane.b32.xlu1 %v5886_v52, %s5059_s30 }
 0x866   : >> { %3177 = vrot.lane.b32.xlu1 %v5026_v16, %s5059_s30 }
 0x86a   : >> { %3181 = vrot.lane.b32.xlu1 %v5027_v31, %s5059_s30 }
 0x86e   : >> { %3486 = vrot.lane.b32.xlu1 %v6008_v12, %s5050_s20 }
 0x872   : >> { %3482 = vrot.lane.b32.xlu1 %v7189_v41, %s5050_s20 }
 0x876   : >> { %3478 = vrot.lane.b32.xlu1 %v6042_v62, %s5050_s20 }
 0x877   : >> { %v2907_v51 = vpop.xlane.xlu0 %2906 }
 0x878   : >> { %v2936_v52 = vsub.f32 %v6292_v36, %v2907_v51 }
 0x87a   : >> { %v2954_v12 = vmul.f32 1.442695, %v2936_v52 }
 0x87b   : >> { %v2903_v34 = vpop.xlane.xlu0 %2902 }
 0x87c   : >> { %v2934_v57 = vsub.f32 %v2839_v40, %v2903_v34 }
 0x87d   : >> { %v2905_v16 = vpop.xlane.xlu1 %2904 }
 0x87e   : >> { %v2950_v31 = vmul.f32 1.442695, %v2934_v57  ;;  %v2935_v56 = vsub.f32 %v2842_v20, %v2905_v16 }
 0x87f   : >> { %v2909_v61 = vpop.xlane.xlu0 %2908 }
 0x880   : >> { %v2952_v35 = vmul.f32 1.442695, %v2935_v56  ;;  %v2937_v41 = vsub.f32 %v6295_v43, %v2909_v61  ;;  %4760 = vpow2.f32 %v2950_v31 }
 0x882   : >> { %4762 = vpow2.f32 %v2952_v35  ;;  %v2956_v14 = vmul.f32 1.442695, %v2937_v41 }
 0x883   : >> { %4764 = vpow2.f32 %v2954_v12  ;;  %v2915_v62 = vpop.xlane.xlu0 %2914 }
 0x884   : >> { %4766 = vpow2.f32 %v2956_v14  ;;  %v2940_v20 = vsub.f32 %v6297_v17, %v2915_v62 }
 0x887   : >> { %v2911_v24 = vpop.xlane.xlu0 %2910 }
 0x888   : >> { %v2938_v29 = vsub.f32 %v6300_v37, %v2911_v24 }
 0x88a   : >> { %v2958_v52 = vmul.f32 1.442695, %v2938_v29 }
 0x88b   : >> { %v2917_v36 = vpop.xlane.xlu0 %2916 }
 0x88c   : >> { %v2941_v40 = vsub.f32 %v6302_v0, %v2917_v36  ;;  %v2962_v0 = vmul.f32 1.442695, %v2940_v20  ;;  %4768 = vpow2.f32 %v2958_v52  ;;  %v3242_v52 = vsel %vm908_vm3, %v3196_v22, 0 }
 0x88d   : >> { %v6370_v51 = vpop.eup %4760  ;;  %v2921_v34 = vpop.xlane.xlu1 %2920 }
 0x88e   : >> { %v2964_v61 = vmul.f32 1.442695, %v2941_v40  ;;  %v2943_v17 = vsub.f32 %v6315_v8, %v2921_v34 }
 0x88f   : >> { %v6373_v56 = vpop.eup %4762  ;;  %v2913_v43 = vpop.xlane.xlu0 %2912 }
 0x890   : >> { %v6375_v35 = vpop.eup %4764  ;;  %v2939_v14 = vsub.f32 %v6305_v5, %v2913_v43  ;;  %v3014_v24 = vpack.c.bf16 %v6373_v56, %v6370_v51  ;;  %4770 = vpow2.f32 %v2964_v61  ;;  %v3245_v5 = vsel %vm908_vm3, %v6264_v45, 0 }
 0x891   : >> { %v6380_v37 = vpop.eup %4766  ;;  %v2968_v31 = vmul.f32 1.442695, %v2943_v17 }
 0x892   : >> { %v2960_v57 = vmul.f32 1.442695, %v2939_v14  ;;  %4458 = vmatprep.mubr.bf16.mxu1 %v3014_v24  ;;  %v3015_v29 = vpack.c.bf16 %v6380_v37, %v6375_v35 }
 0x893   : >> { %v2923_v16 = vpop.xlane.xlu0 %2922 }
 0x894   : >> { %4772 = vpow2.f32 %v2960_v57  ;;  %4459 = vmatmul.mubr.bf16.vlgmr.msra.gmra.mxu1 %v3015_v29  ;;  %v2944_v12 = vsub.f32 %v6307_v60, %v2923_v16 }
 0x895   : >> { %4475 = vmatpush3.bf16.xpose.msra.mxu1 %v3245_v5  ;;  %4774 = vpow2.f32 %v2962_v0 }
 0x896   : >> { %4583 = vmatprep.subr.msk.bf16.mxu1 %vm908_vm3, %v3196_v22  ;;  %4776 = vpow2.f32 %v2968_v31  ;;  %v2970_v40 = vmul.f32 1.442695, %v2944_v12  ;;  %v2931_v31 = vpop.xlane.xlu1 %2930 }
 0x897   : >> { %v2919_v41 = vpop.xlane.xlu0 %2918 }
 0x898   : >> { %v2942_v62 = vsub.f32 %v6310_v50, %v2919_v41 }
 0x899   : >> { %v6394_v61 = vpop.eup %4768 }
 0x89a   : >> { %v2966_v36 = vmul.f32 1.442695, %v2942_v62  ;;  %v3188_v41 = vpop.permute.xlu1 %3187 }
 0x89b   : >> { %v2925_v8 = vpop.xlane.xlu0 %2924  ;;  %v3230_v62 = vsel %vm908_vm3, %v3188_v41, 0 }
 0x89c   : >> { %4778 = vpow2.f32 %v2966_v36  ;;  %v2945_v20 = vsub.f32 %v6312_v59, %v2925_v8  ;;  %v3239_v59 = vsel %vm908_vm3, %v6360_v27, 0 }
 0x89d   : >> { %4477 = vmatpush3.bf16.xpose.msra.mxu1 %v3242_v52  ;;  %4780 = vpow2.f32 %v2970_v40  ;;  %v6396_v60 = vpop.eup %4770  ;;  %v2948_v52 = vsub.f32 %v6319_v15, %v2931_v31 }
 0x89e   : >> { %v2972_v45 = vmul.f32 1.442695, %v2945_v20  ;;  %4584 = vmatprep.subr.msk.bf16.mxu1 %vm908_vm3, %v6360_v27  ;;  %v3236_v27 = vsel %vm908_vm3, %v6364_v39, 0 }
 0x89f   : >> { %v2927_v14 = vpop.xlane.xlu0 %2926 }
 0x8a0   : >> { %4782 = vpow2.f32 %v2972_v45  ;;  %v2946_v40 = vsub.f32 %v6325_v7, %v2927_v14 }
 0x8a1   : >> { %v6398_v50 = vpop.eup %4772 }
 0x8a2   : >> { %v3016_v43 = vpack.c.bf16 %v6398_v50, %v6394_v61  ;;  %v6402_v34 = vpop.eup %4774  ;;  %v2974_v45 = vmul.f32 1.442695, %v2946_v40 }
 0x8a3   : >> { %v3017_v22 = vpack.c.bf16 %v6396_v60, %v6402_v34  ;;  %v6410_v24 = vpop.eup %4776  ;;  %v3190_v16 = vpop.permute.xlu0 %3189 }
 0x8a4   : >> { %4462 = vmatprep.mubr.bf16.mxu1 %v3016_v43  ;;  %v3233_v12 = vsel %vm908_vm3, %v3190_v16, 0  ;;  %4784 = vpow2.f32 %v2974_v45 }
 0x8a5   : >> { %4479 = vmatpush3.bf16.xpose.msra.mxu1 %v3239_v59 }
 0x8a6   : >> { %4463 = vmatmul.mubr.bf16.gmra.mxu1 %v3017_v22  ;;  %4585 = vmatprep.subr.msk.bf16.mxu1 %vm908_vm3, %v6364_v39  ;;  %v3186_v39 = vpop.permute.xlu1 %3185 }
 0x8a7   : >> { %v3227_v36 = vsel %vm908_vm3, %v3186_v39, 0  ;;  %v3172_v14 = vpop.permute.xlu0 %3171 }
 0x8a9   : >> { %v6412_v0 = vpop.eup %4778 }
 0x8aa   : >> { %v3018_v57 = vpack.c.bf16 %v6410_v24, %v6412_v0  ;;  %v6416_v29 = vpop.eup %4780 }
 0x8ac   : >> { %4466 = vmatprep.mubr.bf16.mxu1 %v3018_v57  ;;  %v2978_v57 = vmul.f32 1.442695, %v2948_v52 }
 0x8ad   : >> { %v6420_v17 = vpop.eup %4782  ;;  %4481 = vmatpush3.bf16.xpose.msra.mxu1 %v3236_v27 }
 0x8ae   : >> { %v3019_v5 = vpack.c.bf16 %v6420_v17, %v6416_v29  ;;  %4586 = vmatprep.subr.msk.bf16.mxu1 %vm908_vm3, %v3190_v16 }
 0x8b0   : >> { %4467 = vmatmul.mubr.bf16.gmra.mxu1 %v3019_v5 }
 0x8b1   : >> { %v6436_v5 = vpop.eup %4784 }
 0x8b5   : >> { %4483 = vmatpush3.bf16.xpose.msra.mxu1 %v3233_v12 }
 0x8b6   : >> { %4587 = vmatprep.subr.msk.bf16.mxu1 %vm908_vm3, %v3188_v41  ;;  %v3176_v41 = vpop.permute.xlu0 %3175 }
 0x8bd   : >> { %4485 = vmatpush3.bf16.xpose.msra.mxu1 %v3230_v62 }
 0x8be   : >> { %4588 = vmatprep.subr.msk.bf16.mxu1 %vm908_vm3, %v3186_v39 }
 0x8c5   : >> { %4487 = vmatpush3.bf16.xpose.msra.mxu1 %v3227_v36 }
 0x8ca   : >> { %v2933_v8 = vpop.xlane.xlu1 %2932 }
 0x8cb   : >> { %v2949_v20 = vsub.f32 %v6339_v1, %v2933_v8  ;;  %v3180_v8 = vpop.permute.xlu0 %3179 }
 0x8cd   : >> { %v2980_v43 = vmul.f32 1.442695, %v2949_v20 }
 0x8ce   : >> { %v2929_v59 = vpop.xlane.xlu1 %2928 }
 0x8cf   : >> { %v2947_v22 = vsub.f32 %v6344_v53, %v2929_v59  ;;  %4786 = vpow2.f32 %v2980_v43  ;;  %v3485_v45 = vpop.permute.xlu0 %3484 }
 0x8d1   : >> { %v2976_v27 = vmul.f32 1.442695, %v2947_v22 }
 0x8d2   : >> { %v3184_v16 = vpop.permute.xlu1 %3183 }
 0x8d3   : >> { %4788 = vpow2.f32 %v2976_v27  ;;  %4589 = vmatprep.subr.msk.bf16.mxu1 %vm908_vm3, %v3184_v16  ;;  %v3224_v7 = vsel %vm908_vm3, %v3184_v16, 0  ;;  %v3481_v59 = vpop.permute.xlu0 %3480 }
 0x8d4   : >> { %4790 = vpow2.f32 %v2978_v57  ;;  %4489 = vmatpush3.bf16.xpose.msra.mxu1 %v3224_v7 }
 0x8d6   : >> { %v3168_v1 = vpop.permute.xlu1 %3167 }
 0x8d7   : >> { %v3477_v57 = vpop.permute.xlu0 %3476 }
 0x8da   : >> { %v3170_v15 = vpop.permute.xlu1 %3169 }
 0x8dc   : >> { %v6438_v12 = vpop.eup %4786 }
 0x8dd   : >> { %7231 = vst [vmem:[#allocation107_spill] sm:$0xff] %v6438_v12 }
 0x8de   : >> { %v3174_v31 = vpop.permute.xlu1 %3173 }
 0x8e0   : >> { %v6440_v53 = vpop.eup %4788 }
 0x8e1   : >> { %v6442_v62 = vpop.eup %4790  ;;  %v3020_v39 = vpack.c.bf16 %v6440_v53, %v6436_v5 }
 0x8e2   : >> { %v3178_v36 = vpop.permute.xlu1 %3177  ;;  %v3021_v40 = vpack.c.bf16 %v6438_v12, %v6442_v62 }
 0x8e3   : >> { %4470 = vmatprep.mubr.bf16.mxu1 %v3020_v39 }
 0x8e4   : >> { %4471 = vmatmul.mubr.bf16.gmra.mxu1 %v3021_v40 }
 0x8e5   : >> { %4490 = vmatprep.mubr.msk.bf16.mxu1 %vm908_vm3, %v3168_v1 }
 0x8e6   : >> { %v3182_v20 = vpop.permute.xlu1 %3181 }
 0x8ea   : >> { %v3487_v52 = vpop.permute.xlu1 %3486 }
 0x8eb   : >> { %4506 = vmatprep.subr.bf16.mxu0 %v3487_v52 }
 0x8ec   : >> { %4491 = vmatmul.mubr.msk.bf16.vlgmr.msra.gmra.mxu1 %vm908_vm3, %v3170_v15  ;;  %4507 = vmatpush3.bf16.msra.mxu0 %v3487_v52 }
 0x8ed   : >> { %4508 = vmatprep.subr.bf16.mxu0 %v3485_v45  ;;  %4494 = vmatprep.mubr.msk.bf16.mxu1 %vm908_vm3, %v3172_v14 }
 0x8ee   : >> { %v3483_v43 = vpop.permute.xlu1 %3482 }
 0x8f0   : >> { %4509 = vmatpush3.bf16.msra.mxu0 %v3485_v45 }
 0x8f1   : >> { %4510 = vmatprep.subr.bf16.mxu0 %v3483_v43 }
 0x8f2   : >> { %v3479_v22 = vpop.permute.xlu1 %3478 }
 0x8f4   : >> { %4495 = vmatmul.mubr.msk.bf16.gmra.mxu1 %vm908_vm3, %v3174_v31  ;;  %4511 = vmatpush3.bf16.msra.mxu0 %v3483_v43 }
 0x8f5   : >> { %4512 = vmatprep.subr.bf16.mxu0 %v3481_v59  ;;  %4498 = vmatprep.mubr.msk.bf16.mxu1 %vm908_vm3, %v3176_v41 }
 0x8f8   : >> { %4513 = vmatpush3.bf16.msra.mxu0 %v3481_v59 }
 0x8f9   : >> { %4514 = vmatprep.subr.bf16.mxu0 %v3479_v22 }
 0x8fc   : >> { %4499 = vmatmul.mubr.msk.bf16.gmra.mxu1 %vm908_vm3, %v3178_v36  ;;  %4515 = vmatpush3.bf16.msra.mxu0 %v3479_v22 }
 0x8fd   : >> { %4516 = vmatprep.subr.bf16.mxu0 %v3477_v57  ;;  %4502 = vmatprep.mubr.msk.bf16.mxu1 %vm908_vm3, %v3180_v8 }
 0x900   : >> { %4517 = vmatpush3.bf16.msra.mxu0 %v3477_v57 }
 0x904   : >> { %4503 = vmatmul.mubr.msk.bf16.gmra.mxu1 %vm908_vm3, %v3182_v20 }
 0x954   : >> { %v6456_v27 = vpop.f32.mrf.mxu1 }
 0x955   : >> { %7232 = vst [vmem:[#allocation108_spill] sm:$0xff] %v6456_v27  ;;  %v7275_v27 = vld [vmem:[#allocation77_spill] sm:$0xff] }
 0x956   : >> { %v6458_v16 = vpop.f32.mrf.mxu1 }
 0x957   : >> { %7233 = vst [vmem:[#allocation109_spill] sm:$0xff] %v6458_v16  ;;  %v7269_v16 = vld [vmem:[#allocation71_spill] sm:$0xff] }
 0x958   : >> { %v6460_v7 = vpop.f32.mrf.mxu1 }
 0x959   : >> { %7234 = vst [vmem:[#allocation110_spill] sm:$0xff] %v6460_v7  ;;  %v7270_v7 = vld [vmem:[#allocation73_spill] sm:$0xff] }
 0x95a   : >> { %v6462_v1 = vpop.f32.mrf.mxu1 }
 0x95b   : >> { %7235 = vst [vmem:[#allocation111_spill] sm:$0xff] %v6462_v1 }
 0x966   : >> { %v6464_v14 = vpop.f32.mrf.mxu1 }
 0x967   : >> { %7236 = vst [vmem:[#allocation112_spill] sm:$0xff] %v6464_v14 }
 0x968   : >> { %v6466_v15 = vpop.f32.mrf.mxu1 }
 0x969   : >> { %7237 = vst [vmem:[#allocation113_spill] sm:$0xff] %v6466_v15 }
 0x96a   : >> { %v6468_v31 = vpop.f32.mrf.mxu1 }
 0x96b   : >> { %7238 = vst [vmem:[#allocation114_spill] sm:$0xff] %v6468_v31 }
 0x96c   : >> { %v6470_v41 = vpop.f32.mrf.mxu1 }
 0x96d   : >> { %7239 = vst [vmem:[#allocation115_spill] sm:$0xff] %v6470_v41 }
 0x970   : >> { %v6472_v39 = vpop.f32.mrf.mxu1 }
 0x971   : >> { %7240 = vst [vmem:[#allocation116_spill] sm:$0xff] %v6472_v39 }
 0x972   : >> { %v6474_v36 = vpop.f32.mrf.mxu1 }
 0x973   : >> { %7241 = vst [vmem:[#allocation117_spill] sm:$0xff] %v6474_v36 }
 0x974   : >> { %v6476_v40 = vpop.f32.mrf.mxu1 }
 0x975   : >> { %7242 = vst [vmem:[#allocation118_spill] sm:$0xff] %v6476_v40 }
 0x976   : >> { %v6478_v8 = vpop.f32.mrf.mxu1 }
 0x977   : >> { %7243 = vst [vmem:[#allocation119_spill] sm:$0xff] %v6478_v8 }
 0x9a4   : >> { %v6480_v20 = vpop.f32.mrf.mxu1 }
 0x9a5   : >> { %7244 = vst [vmem:[#allocation120_spill] sm:$0xff] %v6480_v20 }
 0x9a6   : >> { %v6482_v52 = vpop.f32.mrf.mxu1 }
 0x9a7   : >> { %7245 = vst [vmem:[#allocation121_spill] sm:$0xff] %v6482_v52 }
 0x9a8   : >> { %v6484_v45 = vpop.f32.mrf.mxu1 }
 0x9a9   : >> { %7246 = vst [vmem:[#allocation122_spill] sm:$0xff] %v6484_v45 }
 0x9aa   : >> { %v6486_v43 = vpop.f32.mrf.mxu1 }
 0x9ab   : >> { %7247 = vst [vmem:[#allocation123_spill] sm:$0xff] %v6486_v43 }
 0x9ac   : >> { %v6488_v59 = vpop.f32.mrf.mxu1 }
 0x9ad   : >> { %3348 = vmax.xlane.f32.xlu0 %v6488_v59 }
 0x9ae   : >> { %v6491_v22 = vpop.f32.mrf.mxu1 }
 0x9b0   : >> { %v6493_v57 = vpop.f32.mrf.mxu1 }
 0x9b1   : >> { %3344 = vmax.xlane.f32.xlu0 %v6491_v22 }
 0x9b2   : >> { %v6496_v36 = vpop.f32.mrf.mxu1 }
 0x9b3   : >> { %3346 = vmax.xlane.f32.xlu1 %v6496_v36 }
 0x9b4   : >> { %v6499_v20 = vpop.f32.mrf.mxu1 }
 0x9b5   : >> { %3350 = vmax.xlane.f32.xlu0 %v6493_v57 }
 0x9b6   : >> { %v6502_v45 = vpop.f32.mrf.mxu1 }
 0x9b7   : >> { %3356 = vmax.xlane.f32.xlu1 %v6499_v20 }
 0x9b8   : >> { %v6505_v43 = vpop.f32.mrf.mxu1 }
 0x9b9   : >> { %3358 = vmax.xlane.f32.xlu0 %v6505_v43 }
 0x9ba   : >> { %v6508_v52 = vpop.f32.mrf.mxu1 }
 0x9bb   : >> { %3352 = vmax.xlane.f32.xlu1 %v6502_v45 }
 0x9bc   : >> { %v6511_v8 = vpop.f32.mrf.mxu1 }
 0x9bd   : >> { %3354 = vmax.xlane.f32.xlu0 %v6508_v52 }
 0x9be   : >> { %v6514_v40 = vpop.f32.mrf.mxu1 }
 0x9bf   : >> { %3364 = vmax.xlane.f32.xlu1 %v6511_v8 }
 0x9c0   : >> { %v6517_v39 = vpop.f32.mrf.mxu1 }
 0x9c1   : >> { %3366 = vmax.xlane.f32.xlu0 %v6517_v39 }
 0x9c2   : >> { %v6520_v41 = vpop.f32.mrf.mxu1 }
 0x9c3   : >> { %3360 = vmax.xlane.f32.xlu1 %v6514_v40 }
 0x9c4   : >> { %v6523_v15 = vpop.f32.mrf.mxu1 }
 0x9c5   : >> { %3362 = vmax.xlane.f32.xlu0 %v6520_v41 }
 0x9c6   : >> { %v6526_v31 = vpop.f32.mrf.mxu1 }
 0x9c7   : >> { %3372 = vmax.xlane.f32.xlu1 %v6523_v15 }
 0x9c8   : >> { %v6529_v14 = vpop.f32.mrf.mxu1 }
 0x9c9   : >> { %3374 = vmax.xlane.f32.xlu0 %v6529_v14 }
 0x9ca   : >> { %v6533_v1 = vpop.f32.mrf.mxu1 }
 0x9cb   : >> { %3368 = vmax.xlane.f32.xlu1 %v6526_v31 }
 0x9cd   : >> { %3370 = vmax.xlane.f32.xlu0 %v6533_v1 }
 0x9dc   : >> { %3474 = vrot.lane.b32.xlu1 %v6060_v25, %s5050_s20  ;;  %v7259_v25 = vld [vmem:[#allocation33_spill] sm:$0xff] }
 0x9e3   : >> { %3472 = vrot.lane.b32.xlu0 %v6066_v42, %s5050_s20  ;;  %v7260_v42 = vld [vmem:[#allocation34_spill] sm:$0xff] }
 0xa00   : >> { %1134 = vadd.xlane.f32.xlu1 %v5586_v47  ;;  %v7248_v47 = vld [vmem:[#allocation23_spill] sm:$0xff] }
 0xa02   : >> { %1136 = vadd.xlane.f32.xlu0 %v5593_v49  ;;  %v7249_v49 = vld [vmem:[#allocation26_spill] sm:$0xff] }
 0xa04   : >> { %1138 = vadd.xlane.f32.xlu1 %v5595_v2  ;;  %v7250_v2 = vld [vmem:[#allocation24_spill] sm:$0xff] }
 0xa06   : >> { %1140 = vadd.xlane.f32.xlu0 %v5588_v55  ;;  %v7251_v55 = vld [vmem:[#allocation25_spill] sm:$0xff] }
 0xa08   : >> { %1142 = vadd.xlane.f32.xlu1 %v5613_v32  ;;  %v7252_v32 = vld [vmem:[#allocation27_spill] sm:$0xff] }
 0xa0a   : >> { %1144 = vadd.xlane.f32.xlu0 %v5607_v9  ;;  %v7253_v9 = vld [vmem:[#allocation29_spill] sm:$0xff] }
 0xa0c   : >> { %1146 = vadd.xlane.f32.xlu1 %v5610_v13  ;;  %v7254_v13 = vld [vmem:[#allocation30_spill] sm:$0xff] }
 0xa0e   : >> { %1148 = vadd.xlane.f32.xlu0 %v5615_v38  ;;  %v7255_v38 = vld [vmem:[#allocation31_spill] sm:$0xff] }
 0xa10   : >> { %1150 = vadd.xlane.f32.xlu1 %v5634_v30  ;;  %v7256_v30 = vld [vmem:[#allocation28_spill] sm:$0xff] }
 0xa12   : >> { %1152 = vadd.xlane.f32.xlu0 %v5627_v3  ;;  %v7257_v3 = vld [vmem:[#allocation32_spill] sm:$0xff] }
 0xa14   : >> { %1154 = vadd.xlane.f32.xlu1 %v5631_v54  ;;  %v7258_v54 = vld [vmem:[#allocation35_spill] sm:$0xff] }
 0xa16   : >> { %1156 = vadd.xlane.f32.xlu0 %v7248_v47  ;;  %v7261_v47 = vld [vmem:[#allocation36_spill] sm:$0xff] }
 0xa18   : >> { %1158 = vadd.xlane.f32.xlu1 %v7249_v49  ;;  %v7262_v49 = vld [vmem:[#allocation38_spill] sm:$0xff] }
 0xa1a   : >> { %1160 = vadd.xlane.f32.xlu0 %v7250_v2  ;;  %v7263_v2 = vld [vmem:[#allocation39_spill] sm:$0xff] }
 0xa1c   : >> { %1162 = vadd.xlane.f32.xlu1 %v7251_v55 }
 0xa1e   : >> { %1164 = vadd.xlane.f32.xlu0 %v7252_v32  ;;  %v7264_v32 = vld [vmem:[#allocation37_spill] sm:$0xff] }
 0xa20   : >> { %1576 = vadd.xlane.f32.xlu1 %v7253_v9  ;;  %v7265_v9 = vld [vmem:[#allocation22_spill] sm:$0xff] }
 0xa22   : >> { %1578 = vadd.xlane.f32.xlu0 %v7254_v13 }
 0xa24   : >> { %1580 = vadd.xlane.f32.xlu1 %v7255_v38  ;;  %v7266_v38 = vld [vmem:[#allocation20_spill] sm:$0xff] }
 0xa26   : >> { %1582 = vadd.xlane.f32.xlu0 %v7256_v30 }
 0xa28   : >> { %1584 = vadd.xlane.f32.xlu1 %v7257_v3  ;;  %v7267_v3 = vld [vmem:[#allocation18_spill] sm:$0xff] }
 0xa2a   : >> { %1586 = vadd.xlane.f32.xlu0 %v7258_v54 }
 0xa2c   : >> { %1588 = vadd.xlane.f32.xlu1 %v7259_v25 }
 0xa2e   : >> { %1590 = vadd.xlane.f32.xlu0 %v7260_v42 }
 0xa30   : >> { %1592 = vadd.xlane.f32.xlu1 %v7261_v47 }
 0xa32   : >> { %1594 = vadd.xlane.f32.xlu0 %v7262_v49  ;;  %v7268_v49 = vld [vmem:[#allocation19_spill] sm:$0xff] }
 0xa34   : >> { %1596 = vadd.xlane.f32.xlu1 %v7263_v2 }
 0xa36   : >> { %v3349_v55 = vpop.xlane.xlu0 %3348  ;;  %1598 = vadd.xlane.f32.xlu0 %v7264_v32 }
 0xa38   : >> { %1600 = vadd.xlane.f32.xlu1 %v7265_v9 }
 0xa3a   : >> { %v3345_v13 = vpop.xlane.xlu0 %3344  ;;  %1602 = vadd.xlane.f32.xlu0 %v7266_v38  ;;  %v7271_v38 = vld [vmem:[#allocation74_spill] sm:$0xff] }
 0xa3b   : >> { %v3376_v30 = vsub.f32 %v6491_v22, %v3345_v13 }
 0xa3c   : >> { %1604 = vadd.xlane.f32.xlu1 %v7267_v3  ;;  %v3347_v54 = vpop.xlane.xlu1 %3346  ;;  %v7272_v3 = vld [vmem:[#allocation72_spill] sm:$0xff] }
 0xa3d   : >> { %v3392_v25 = vmul.f32 1.442695, %v3376_v30  ;;  %v3377_v42 = vsub.f32 %v6496_v36, %v3347_v54  ;;  %v7273_v54 = vld [vmem:[#allocation75_spill] sm:$0xff] }
 0xa3e   : >> { %v3351_v47 = vpop.xlane.xlu0 %3350  ;;  %1606 = vadd.xlane.f32.xlu0 %v7268_v49 }
 0xa3f   : >> { %v3394_v2 = vmul.f32 1.442695, %v3377_v42  ;;  %4792 = vpow2.f32 %v3392_v25  ;;  %v3379_v36 = vsub.f32 %v6493_v57, %v3351_v47 }
 0xa40   : >> { %2050 = vadd.xlane.f32.xlu1 %v7269_v16  ;;  %v3357_v32 = vpop.xlane.xlu1 %3356  ;;  %v3378_v16 = vsub.f32 %v6488_v59, %v3349_v55 }
 0xa41   : >> { %4794 = vpow2.f32 %v3394_v2  ;;  %v7274_v2 = vld [vmem:[#allocation76_spill] sm:$0xff] }
 0xa42   : >> { %v3359_v9 = vpop.xlane.xlu0 %3358  ;;  %2052 = vadd.xlane.f32.xlu0 %v7270_v7  ;;  %v3398_v7 = vmul.f32 1.442695, %v3379_v36  ;;  %v3396_v57 = vmul.f32 1.442695, %v3378_v16  ;;  %v3382_v36 = vsub.f32 %v6499_v20, %v3357_v32 }
 0xa44   : >> { %2054 = vadd.xlane.f32.xlu1 %v7271_v38  ;;  %v3353_v22 = vpop.xlane.xlu1 %3352  ;;  %4796 = vpow2.f32 %v3398_v7 }
 0xa45   : >> { %v3380_v42 = vsub.f32 %v6502_v45, %v3353_v22  ;;  %v3383_v45 = vsub.f32 %v6505_v43, %v3359_v9 }
 0xa46   : >> { %v3355_v13 = vpop.xlane.xlu0 %3354  ;;  %2056 = vadd.xlane.f32.xlu0 %v7272_v3 }
 0xa47   : >> { %v3381_v30 = vsub.f32 %v6508_v52, %v3355_v13  ;;  %v3400_v52 = vmul.f32 1.442695, %v3380_v42  ;;  %v7278_v42 = vld [vmem:[#allocation81_spill] sm:$0xff]  ;;  %v3406_v43 = vmul.f32 1.442695, %v3383_v45  ;;  %v7282_v45 = vld [vmem:[#allocation84_spill] sm:$0xff] }
 0xa48   : >> { %2058 = vadd.xlane.f32.xlu1 %v7273_v54  ;;  %v3365_v25 = vpop.xlane.xlu1 %3364  ;;  %v7276_v54 = vld [vmem:[#allocation78_spill] sm:$0xff] }
 0xa49   : >> { %v3402_v38 = vmul.f32 1.442695, %v3381_v30 }
 0xa4a   : >> { %v3367_v49 = vpop.xlane.xlu0 %3366  ;;  %2060 = vadd.xlane.f32.xlu0 %v7274_v2  ;;  %v7279_v2 = vld [vmem:[#allocation82_spill] sm:$0xff] }
 0xa4b   : >> { %4798 = vpow2.f32 %v3402_v38  ;;  %v3404_v38 = vmul.f32 1.442695, %v3382_v36  ;;  %v3387_v20 = vsub.f32 %v6517_v39, %v3367_v49 }
 0xa4c   : >> { %2062 = vadd.xlane.f32.xlu1 %v7275_v27  ;;  %v3361_v12 = vpop.xlane.xlu1 %3360  ;;  %v6585_v3 = vpop.eup %4792  ;;  %v7277_v27 = vld [vmem:[#allocation79_spill] sm:$0xff]  ;;  %4800 = vpow2.f32 %v3396_v57  ;;  %v3386_v57 = vsub.f32 %v6511_v8, %v3365_v25 }
 0xa4d   : >> { %4802 = vpow2.f32 %v3400_v52  ;;  %v3384_v30 = vsub.f32 %v6514_v40, %v3361_v12  ;;  %v7281_v12 = vld [vmem:[#allocation17_spill] sm:$0xff]  ;;  %v7284_v25 = vld [vmem:[#allocation83_spill] sm:$0xff] }
 0xa4e   : >> { %v6587_v47 = vpop.eup %4794  ;;  %v3363_v13 = vpop.xlane.xlu0 %3362  ;;  %2064 = vadd.xlane.f32.xlu0 %v7276_v54  ;;  %4804 = vpow2.f32 %v3406_v43  ;;  %v3412_v36 = vmul.f32 1.442695, %v3386_v57  ;;  %v7286_v57 = vld [vmem:[#allocation40_spill] sm:$0xff] }
 0xa4f   : >> { %v3456_v59 = vpack.c.bf16 %v6587_v47, %v6585_v3  ;;  %v3385_v55 = vsub.f32 %v6520_v41, %v3363_v13  ;;  %v3408_v41 = vmul.f32 1.442695, %v3384_v30  ;;  %v7280_v13 = vld [vmem:[#allocation80_spill] sm:$0xff] }
 0xa50   : >> { %2066 = vadd.xlane.f32.xlu1 %v7277_v27  ;;  %v3373_v22 = vpop.xlane.xlu1 %3372 }
 0xa51   : >> { %4522 = vmatprep.mubr.bf16.mxu0 %v3456_v59  ;;  %v3410_v9 = vmul.f32 1.442695, %v3385_v55  ;;  %v3414_v55 = vmul.f32 1.442695, %v3387_v20  ;;  %v6606_v39 = vpop.eup %4796 }
 0xa52   : >> { %v3375_v16 = vpop.xlane.xlu0 %3374  ;;  %2068 = vadd.xlane.f32.xlu0 %v7278_v42 }
 0xa53   : >> { %4806 = vpow2.f32 %v3410_v9  ;;  %v3391_v43 = vsub.f32 %v6529_v14, %v3375_v16 }
 0xa54   : >> { %2070 = vadd.xlane.f32.xlu1 %v7279_v2  ;;  %v3369_v7 = vpop.xlane.xlu1 %3368  ;;  %4808 = vpow2.f32 %v3404_v38  ;;  %v3390_v2 = vsub.f32 %v6523_v15, %v3373_v22 }
 0xa55   : >> { %4810 = vpow2.f32 %v3408_v41  ;;  %v3388_v52 = vsub.f32 %v6526_v31, %v3369_v7  ;;  %v3422_v7 = vmul.f32 1.442695, %v3391_v43  ;;  %v7290_v43 = vld [vmem:[#allocation21_spill] sm:$0xff] }
 0xa56   : >> { %2072 = vadd.xlane.f32.xlu0 %v7280_v13  ;;  %v3371_v54 = vpop.xlane.xlu0 %3370  ;;  %4812 = vpow2.f32 %v3414_v55  ;;  %v3420_v16 = vmul.f32 1.442695, %v3390_v2 }
 0xa57   : >> { %v3389_v32 = vsub.f32 %v6533_v1, %v3371_v54  ;;  %v7283_v1 = vld [vmem:[#allocation85_spill] sm:$0xff]  ;;  %v3416_v8 = vmul.f32 1.442695, %v3388_v52 }
 0xa58   : >> { %2074 = vadd.xlane.f32.xlu1 %v7281_v12  ;;  %v3475_v40 = vpop.permute.xlu1 %3474  ;;  %v6609_v27 = vpop.eup %4798 }
 0xa59   : >> { %4518 = vmatprep.subr.bf16.mxu0 %v3475_v40  ;;  %v3418_v49 = vmul.f32 1.442695, %v3389_v32  ;;  %v6611_v30 = vpop.eup %4800 }
 0xa5a   : >> { %2076 = vadd.xlane.f32.xlu0 %v7282_v45  ;;  %v3473_v59 = vpop.permute.xlu0 %3472  ;;  %4519 = vmatpush3.bf16.msra.mxu0 %v3475_v40  ;;  %v6614_v31 = vpop.eup %4802  ;;  %v3457_v42 = vpack.c.bf16 %v6606_v39, %v6611_v30  ;;  %v7287_v45 = vld [vmem:[#allocation56_spill] sm:$0xff] }
 0xa5b   : >> { %4520 = vmatprep.subr.bf16.mxu0 %v3473_v59  ;;  %4814 = vpow2.f32 %v3418_v49  ;;  %v3458_v9 = vpack.c.bf16 %v6609_v27, %v6614_v31  ;;  %v6624_v38 = vpop.eup %4804 }
 0xa5c   : >> { %2078 = vadd.xlane.f32.xlu1 %v7283_v1  ;;  %4816 = vpow2.f32 %v3412_v36  ;;  %v7288_v1 = vld [vmem:[#allocation42_spill] sm:$0xff] }
 0xa5d   : >> { %4818 = vpow2.f32 %v3416_v8 }
 0xa5e   : >> { %2080 = vadd.xlane.f32.xlu0 %v7284_v25  ;;  %4521 = vmatpush3.bf16.msra.mxu0 %v3473_v59  ;;  %4820 = vpow2.f32 %v3422_v7  ;;  %v7291_v7 = vld [vmem:[#allocation55_spill] sm:$0xff] }
 0xa5f   : >> { %4822 = vpow2.f32 %v3420_v16 }
 0xa60   : >> { %2516 = vadd.xlane.f32.xlu1 %v6162_v11  ;;  %v6627_v14 = vpop.eup %4806 }
 0xa61   : >> { %4523 = vmatmul.mubr.bf16.vlgmr.msra.gmra.mxu0 %v3457_v42  ;;  %v6629_v11 = vpop.eup %4808 }
 0xa62   : >> { %2518 = vadd.xlane.f32.xlu0 %v6166_v6  ;;  %4526 = vmatprep.mubr.bf16.mxu0 %v3458_v9  ;;  %v6632_v41 = vpop.eup %4810  ;;  %v3459_v15 = vpack.c.bf16 %v6624_v38, %v6629_v11 }
 0xa63   : >> { %v3460_v6 = vpack.c.bf16 %v6627_v14, %v6632_v41 }
 0xa64   : >> { %2520 = vadd.xlane.f32.xlu1 %v6169_v58  ;;  %v6640_v58 = vpop.eup %4812 }
 0xa66   : >> { %2522 = vadd.xlane.f32.xlu0 %v6164_v63 }
 0xa68   : >> { %2524 = vadd.xlane.f32.xlu1 %v6177_v10  ;;  %v6643_v63 = vpop.eup %4814 }
 0xa69   : >> { %4527 = vmatmul.mubr.bf16.gmra.mxu0 %v3459_v15  ;;  %v6645_v22 = vpop.eup %4816 }
 0xa6a   : >> { %2526 = vadd.xlane.f32.xlu0 %v6181_v19  ;;  %4530 = vmatprep.mubr.bf16.mxu0 %v3460_v6  ;;  %v6648_v13 = vpop.eup %4818  ;;  %v3461_v10 = vpack.c.bf16 %v6640_v58, %v6645_v22 }
 0xa6b   : >> { %v3462_v19 = vpack.c.bf16 %v6643_v63, %v6648_v13 }
 0xa6c   : >> { %2528 = vadd.xlane.f32.xlu1 %v6183_v46  ;;  %v6656_v46 = vpop.eup %4820 }
 0xa6d   : >> { %v6659_v54 = vpop.eup %4822 }
 0xa6e   : >> { %2530 = vadd.xlane.f32.xlu0 %v6190_v21  ;;  %v3463_v21 = vpack.c.bf16 %v6656_v46, %v6659_v54 }
 0xa70   : >> { %2532 = vadd.xlane.f32.xlu1 %v6200_v18 }
 0xa71   : >> { %4531 = vmatmul.mubr.bf16.gmra.mxu0 %v3461_v10 }
 0xa72   : >> { %2534 = vadd.xlane.f32.xlu0 %v6206_v23  ;;  %4534 = vmatprep.mubr.bf16.mxu0 %v3462_v19  ;;  %v7294_v19 = vld [vmem:[#allocation44_spill] sm:$0xff] }
 0xa74   : >> { %2536 = vadd.xlane.f32.xlu1 %v6208_v4 }
 0xa76   : >> { %2538 = vadd.xlane.f32.xlu0 %v6202_v26 }
 0xa78   : >> { %2540 = vadd.xlane.f32.xlu1 %v6228_v28 }
 0xa79   : >> { %4535 = vmatmul.mubr.bf16.gmra.mxu0 %v3463_v21 }
 0xa7a   : >> { %2542 = vadd.xlane.f32.xlu0 %v6232_v48 }
 0xa7c   : >> { %2544 = vadd.xlane.f32.xlu1 %v6234_v33 }
 0xa7e   : >> { %2546 = vadd.xlane.f32.xlu0 %v6230_v44 }
 0xa80   : >> { %2982 = vadd.xlane.f32.xlu1 %v6370_v51 }
 0xa82   : >> { %2984 = vadd.xlane.f32.xlu0 %v6373_v56 }
 0xa84   : >> { %2986 = vadd.xlane.f32.xlu1 %v6375_v35 }
 0xa86   : >> { %2988 = vadd.xlane.f32.xlu0 %v6380_v37  ;;  %v7285_v37 = vld [vmem:[#allocation107_spill] sm:$0xff] }
 0xa88   : >> { %2990 = vadd.xlane.f32.xlu1 %v6394_v61 }
 0xa89   : >> { %v1135_v18 = vpop.xlane.xlu1 %1134 }
 0xa8a   : >> { %2992 = vadd.xlane.f32.xlu0 %v6398_v50  ;;  %4824 = vrcp.f32 %v1135_v18  ;;  %v7295_v18 = vld [vmem:[#allocation60_spill] sm:$0xff] }
 0xa8b   : >> { %v1137_v26 = vpop.xlane.xlu0 %1136 }
 0xa8c   : >> { %2994 = vadd.xlane.f32.xlu1 %v6402_v34  ;;  %4826 = vrcp.f32 %v1137_v26 }
 0xa8d   : >> { %v1139_v23 = vpop.xlane.xlu1 %1138 }
 0xa8e   : >> { %2996 = vadd.xlane.f32.xlu0 %v6396_v60 }
 0xa8f   : >> { %v1141_v4 = vpop.xlane.xlu0 %1140 }
 0xa90   : >> { %2998 = vadd.xlane.f32.xlu1 %v6412_v0 }
 0xa91   : >> { %v1143_v28 = vpop.xlane.xlu1 %1142 }
 0xa92   : >> { %3000 = vadd.xlane.f32.xlu0 %v6410_v24 }
 0xa93   : >> { %v1145_v44 = vpop.xlane.xlu0 %1144 }
 0xa94   : >> { %3002 = vadd.xlane.f32.xlu1 %v6416_v29 }
 0xa95   : >> { %v1147_v48 = vpop.xlane.xlu1 %1146 }
 0xa96   : >> { %3004 = vadd.xlane.f32.xlu0 %v6420_v17 }
 0xa97   : >> { %v1149_v33 = vpop.xlane.xlu0 %1148 }
 0xa98   : >> { %3006 = vadd.xlane.f32.xlu1 %v6436_v5 }
 0xa99   : >> { %v1151_v51 = vpop.xlane.xlu1 %1150 }
 0xa9a   : >> { %3008 = vadd.xlane.f32.xlu0 %v6440_v53 }
 0xa9b   : >> { %v1153_v56 = vpop.xlane.xlu0 %1152 }
 0xa9c   : >> { %3010 = vadd.xlane.f32.xlu1 %v6442_v62 }
 0xa9d   : >> { %v1155_v35 = vpop.xlane.xlu1 %1154 }
 0xa9e   : >> { %3012 = vadd.xlane.f32.xlu0 %v7285_v37 }
 0xa9f   : >> { %v6684_v61 = vpop.xlane.xlu0 %1156 }
 0xaa0   : >> { %3428 = vadd.xlane.f32.xlu1 %v6611_v30  ;;  %v7289_v30 = vld [vmem:[#allocation58_spill] sm:$0xff] }
 0xaa1   : >> { %v6687_v60 = vpop.xlane.xlu1 %1158 }
 0xaa2   : >> { %3430 = vadd.xlane.f32.xlu0 %v6606_v39 }
 0xaa3   : >> { %v6690_v50 = vpop.xlane.xlu0 %1160 }
 0xaa4   : >> { %3424 = vadd.xlane.f32.xlu1 %v6585_v3  ;;  %v4825_v3 = vpop.eup %4824 }
 0xaa5   : >> { %v6693_v34 = vpop.xlane.xlu1 %1162  ;;  %v4827_v20 = vpop.eup %4826  ;;  %v1287_v52 = vmul.f32 %v4825_v3, %v7286_v57  ;;  %v7302_v57 = vld [vmem:[#allocation48_spill] sm:$0xff] }
 0xaa6   : >> { %3426 = vadd.xlane.f32.xlu0 %v6587_v47 }
 0xaa7   : >> { %v6696_v24 = vpop.xlane.xlu0 %1164 }
 0xaa8   : >> { %3436 = vadd.xlane.f32.xlu1 %v6629_v11 }
 0xaa9   : >> { %v1577_v0 = vpop.xlane.xlu1 %1576 }
 0xaaa   : >> { %4828 = vrcp.f32 %v1577_v0  ;;  %3438 = vadd.xlane.f32.xlu0 %v6624_v38 }
 0xaab   : >> { %4830 = vrcp.f32 %v1139_v23  ;;  %v1579_v29 = vpop.xlane.xlu0 %1578 }
 0xaac   : >> { %4832 = vrcp.f32 %v1579_v29  ;;  %3432 = vadd.xlane.f32.xlu1 %v6614_v31  ;;  %v7299_v29 = vld [vmem:[#allocation59_spill] sm:$0xff] }
 0xaad   : >> { %4834 = vrcp.f32 %v1141_v4  ;;  %v1581_v17 = vpop.xlane.xlu1 %1580 }
 0xaae   : >> { %4836 = vrcp.f32 %v1581_v17  ;;  %3434 = vadd.xlane.f32.xlu0 %v6609_v27  ;;  %v1288_v27 = vmul.f32 %v4827_v20, %v7288_v1  ;;  %v7301_v20 = vld [vmem:[#allocation61_spill] sm:$0xff]  ;;  %v7304_v1 = vld [vmem:[#allocation50_spill] sm:$0xff] }
 0xaaf   : >> { %4838 = vrcp.f32 %v1143_v28  ;;  %v1583_v5 = vpop.xlane.xlu0 %1582 }
 0xab0   : >> { %4840 = vrcp.f32 %v1583_v5  ;;  %3444 = vadd.xlane.f32.xlu1 %v6645_v22 }
 0xab1   : >> { %4842 = vrcp.f32 %v1145_v44  ;;  %v1585_v53 = vpop.xlane.xlu1 %1584  ;;  %v7296_v44 = vld [vmem:[#allocation46_spill] sm:$0xff] }
 0xab2   : >> { %4844 = vrcp.f32 %v1585_v53  ;;  %3446 = vadd.xlane.f32.xlu0 %v6640_v58  ;;  %v7293_v58 = vld [vmem:[#allocation57_spill] sm:$0xff] }
 0xab3   : >> { %4846 = vrcp.f32 %v1147_v48  ;;  %v1587_v62 = vpop.xlane.xlu0 %1586 }
 0xab4   : >> { %4848 = vrcp.f32 %v1587_v62  ;;  %3440 = vadd.xlane.f32.xlu1 %v6632_v41  ;;  %v7292_v41 = vld [vmem:[#allocation41_spill] sm:$0xff] }
 0xab5   : >> { %4850 = vrcp.f32 %v1149_v33  ;;  %v1589_v47 = vpop.xlane.xlu1 %1588  ;;  %v7297_v33 = vld [vmem:[#allocation62_spill] sm:$0xff]  ;;  %v7300_v62 = vld [vmem:[#allocation45_spill] sm:$0xff] }
 0xab6   : >> { %4852 = vrcp.f32 %v1589_v47  ;;  %3442 = vadd.xlane.f32.xlu0 %v6627_v14 }
 0xab7   : >> { %v4829_v32 = vpop.eup %4828  ;;  %4854 = vrcp.f32 %v1151_v51  ;;  %v1591_v12 = vpop.xlane.xlu0 %1590 }
 0xab8   : >> { %v4831_v40 = vpop.eup %4830  ;;  %v1761_v59 = vmul.f32 %v4829_v32, %v7287_v45  ;;  %4856 = vrcp.f32 %v1591_v12  ;;  %3448 = vadd.xlane.f32.xlu1 %v6648_v13 }
 0xab9   : >> { %v4833_v55 = vpop.eup %4832  ;;  %4858 = vrcp.f32 %v1153_v56  ;;  %v1593_v39 = vpop.xlane.xlu1 %1592  ;;  %v1289_v9 = vmul.f32 %v4831_v40, %v7290_v43 }
 0xaba   : >> { %v4835_v49 = vpop.eup %4834  ;;  %v6710_v36 = vadd.f32 %v1761_v59, %v1287_v52  ;;  %v1762_v8 = vmul.f32 %v4833_v55, %v7289_v30  ;;  %4860 = vrcp.f32 %v1593_v39  ;;  %3450 = vadd.xlane.f32.xlu0 %v6643_v63  ;;  %v7303_v59 = vld [vmem:[#allocation64_spill] sm:$0xff] }
 0xabb   : >> { %v4837_v25 = vpop.eup %4836  ;;  %4862 = vrcp.f32 %v1155_v35  ;;  %v1595_v31 = vpop.xlane.xlu0 %1594  ;;  %v1290_v15 = vmul.f32 %v4835_v49, %v7292_v41 }
 0xabc   : >> { %v4839_v42 = vpop.eup %4838  ;;  %v6715_v2 = vadd.f32 %v1762_v8, %v1288_v27  ;;  %v1763_v38 = vmul.f32 %v4837_v25, %v7291_v7  ;;  %4864 = vrcp.f32 %v1595_v31  ;;  %3452 = vadd.xlane.f32.xlu1 %v6659_v54  ;;  %v7305_v8 = vld [vmem:[#allocation66_spill] sm:$0xff] }
 0xabd   : >> { %v4841_v14 = vpop.eup %4840  ;;  %4866 = vrcp.f32 %v6684_v61  ;;  %v1597_v16 = vpop.xlane.xlu1 %1596  ;;  %v1291_v54 = vmul.f32 %v4839_v42, %v7294_v19  ;;  %v7298_v61 = vld [vmem:[#allocation43_spill] sm:$0xff] }
 0xabe   : >> { %v4843_v11 = vpop.eup %4842  ;;  %v6721_v6 = vadd.f32 %v1763_v38, %v1289_v9  ;;  %v1764_v63 = vmul.f32 %v4841_v14, %v7293_v58  ;;  %4868 = vrcp.f32 %v1597_v16  ;;  %3454 = vadd.xlane.f32.xlu0 %v6656_v46  ;;  %v7306_v9 = vld [vmem:[#allocation47_spill] sm:$0xff]  ;;  %v7308_v58 = vld [vmem:[#allocation49_spill] sm:$0xff] }
 0xabf   : >> { %v4845_v22 = vpop.eup %4844  ;;  %4870 = vrcp.f32 %v6687_v60  ;;  %v1599_v13 = vpop.xlane.xlu0 %1598  ;;  %v1292_v48 = vmul.f32 %v4843_v11, %v7296_v44  ;;  %v7307_v14 = vld [vmem:[#allocation63_spill] sm:$0xff] }
 0xac0   : >> { %v4847_v10 = vpop.eup %4846  ;;  %v6727_v21 = vadd.f32 %v1764_v63, %v1290_v15  ;;  %v1765_v26 = vmul.f32 %v4845_v22, %v7295_v18  ;;  %4872 = vrcp.f32 %v1599_v13  ;;  %v7309_v13 = vld [vmem:[#allocation65_spill] sm:$0xff] }
 0xac1   : >> { %v4849_v23 = vpop.eup %4848  ;;  %4874 = vrcp.f32 %v6690_v50  ;;  %v1601_v4 = vpop.xlane.xlu1 %1600  ;;  %v1293_v60 = vmul.f32 %v4847_v10, %v7298_v61  ;;  %v7313_v61 = vld [vmem:[#allocation70_spill] sm:$0xff] }
 0xac2   : >> { %v4851_v28 = vpop.eup %4850  ;;  %v6732_v46 = vadd.f32 %v1765_v26, %v1291_v54  ;;  %v1766_v51 = vmul.f32 %v4849_v23, %v7297_v33  ;;  %4876 = vrcp.f32 %v1601_v4  ;;  %v7310_v26 = vld [vmem:[#allocation52_spill] sm:$0xff] }
 0xac3   : >> { %v4853_v56 = vpop.eup %4852  ;;  %4878 = vrcp.f32 %v6693_v34  ;;  %v1603_v35 = vpop.xlane.xlu0 %1602  ;;  %v1294_v3 = vmul.f32 %v4851_v28, %v7300_v62  ;;  %v7311_v28 = vld [vmem:[#allocation68_spill] sm:$0xff]  ;;  %v7315_v62 = vld [vmem:[#allocation67_spill] sm:$0xff] }
 0xac4   : >> { %v4855_v37 = vpop.eup %4854  ;;  %v6737_v0 = vadd.f32 %v1766_v51, %v1292_v48  ;;  %v1767_v50 = vmul.f32 %v4853_v56, %v7299_v29  ;;  %4880 = vrcp.f32 %v1603_v35  ;;  %v7312_v56 = vld [vmem:[#allocation54_spill] sm:$0xff] }
 0xac5   : >> { %v4857_v17 = vpop.eup %4856  ;;  %4882 = vrcp.f32 %v6696_v24  ;;  %v1605_v5 = vpop.xlane.xlu1 %1604  ;;  %v1295_v52 = vmul.f32 %v4855_v37, %v7302_v57  ;;  %v7317_v57 = vld [vmem:[#allocation69_spill] sm:$0xff] }
 0xac6   : >> { %v4859_v53 = vpop.eup %4858  ;;  %v6742_v47 = vadd.f32 %v1767_v50, %v1293_v60  ;;  %v1768_v34 = vmul.f32 %v4857_v17, %v7301_v20  ;;  %4884 = vrcp.f32 %v1605_v5  ;;  %v7314_v17 = vld [vmem:[#allocation51_spill] sm:$0xff] }
 0xac7   : >> { %v4861_v32 = vpop.eup %4860  ;;  %v1607_v12 = vpop.xlane.xlu0 %1606  ;;  %v1296_v27 = vmul.f32 %v4859_v53, %v7304_v1 }
 0xac8   : >> { %v4863_v40 = vpop.eup %4862  ;;  %v6746_v45 = vadd.f32 %v1768_v34, %v1294_v3  ;;  %v1769_v55 = vmul.f32 %v4861_v32, %v7303_v59  ;;  %4886 = vrcp.f32 %v1607_v12  ;;  %v7316_v32 = vld [vmem:[#allocation53_spill] sm:$0xff] }
 0xac9   : >> { %v4865_v24 = vpop.eup %4864  ;;  %v2051_v39 = vpop.xlane.xlu1 %2050  ;;  %v1297_v7 = vmul.f32 %v4863_v40, %v7306_v9 }
 0xaca   : >> { %v4867_v49 = vpop.eup %4866  ;;  %v6750_v30 = vadd.f32 %v1769_v55, %v1295_v52  ;;  %v1770_v25 = vmul.f32 %v4865_v24, %v7305_v8  ;;  %4888 = vrcp.f32 %v2051_v39  ;;  %v7318_v39 = vld [vmem:[#allocation15_spill] sm:$0xff] }
 0xacb   : >> { %v4869_v31 = vpop.eup %4868  ;;  %v2053_v42 = vpop.xlane.xlu0 %2052  ;;  %v1298_v63 = vmul.f32 %v4867_v49, %v7308_v58 }
 0xacc   : >> { %v4871_v43 = vpop.eup %4870  ;;  %v6754_v38 = vadd.f32 %v1770_v25, %v1296_v27  ;;  %v1771_v16 = vmul.f32 %v4869_v31, %v7307_v14  ;;  %4890 = vrcp.f32 %v2053_v42  ;;  %v7319_v25 = vld [vmem:[#allocation12_spill] sm:$0xff] }
 0xacd   : >> { %v4873_v11 = vpop.eup %4872  ;;  %v2055_v41 = vpop.xlane.xlu1 %2054  ;;  %v1299_v23 = vmul.f32 %v4871_v43, %v7310_v26  ;;  %v7323_v26 = vld [vmem:[#allocation8_spill] sm:$0xff] }
 0xace   : >> { %v4875_v15 = vpop.eup %4874  ;;  %v6758_v22 = vadd.f32 %v1771_v16, %v1297_v7  ;;  %v1772_v10 = vmul.f32 %v4873_v11, %v7309_v13  ;;  %4892 = vrcp.f32 %v2055_v41  ;;  %v7320_v7 = vld [vmem:[#allocation16_spill] sm:$0xff] }
 0xacf   : >> { %v4877_v19 = vpop.eup %4876  ;;  %v2057_v54 = vpop.xlane.xlu0 %2056  ;;  %v1300_v35 = vmul.f32 %v4875_v15, %v7312_v56  ;;  %v7321_v15 = vld [vmem:[#allocation14_spill] sm:$0xff] }
 0xad0   : >> { %v4879_v18 = vpop.eup %4878  ;;  %v6762_v4 = vadd.f32 %v1772_v10, %v1298_v63  ;;  %v1773_v44 = vmul.f32 %v4877_v19, %v7311_v28  ;;  %4894 = vrcp.f32 %v2057_v54  ;;  %v7322_v10 = vld [vmem:[#allocation10_spill] sm:$0xff] }
 0xad1   : >> { %v4881_v48 = vpop.eup %4880  ;;  %v2059_v33 = vpop.xlane.xlu1 %2058  ;;  %v1301_v5 = vmul.f32 %v4879_v18, %v7314_v17 }
 0xad2   : >> { %v4883_v51 = vpop.eup %4882  ;;  %v6766_v37 = vadd.f32 %v1773_v44, %v1299_v23  ;;  %v1774_v60 = vmul.f32 %v4881_v48, %v7313_v61  ;;  %4896 = vrcp.f32 %v2059_v33  ;;  %v7324_v48 = vld [vmem:[#allocation13_spill] sm:$0xff] }
 0xad3   : >> { %v4885_v29 = vpop.eup %4884  ;;  %v2061_v50 = vpop.xlane.xlu0 %2060  ;;  %v1302_v12 = vmul.f32 %v4883_v51, %v7316_v32 }
 0xad4   : >> { %v6770_v53 = vadd.f32 %v1774_v60, %v1300_v35  ;;  %v1775_v3 = vmul.f32 %v4885_v29, %v7315_v62  ;;  %4898 = vrcp.f32 %v2061_v50  ;;  %v7325_v35 = vld [vmem:[#allocation11_spill] sm:$0xff]  ;;  %v7326_v50 = vld [vmem:[#allocation6_spill] sm:$0xff] }
 0xad5   : >> { %v4887_v20 = vpop.eup %4886  ;;  %v2063_v34 = vpop.xlane.xlu1 %2062 }
 0xad6   : >> { %v6774_v40 = vadd.f32 %v1775_v3, %v1301_v5  ;;  %v1776_v52 = vmul.f32 %v4887_v20, %v7317_v57  ;;  %4900 = vrcp.f32 %v2063_v34  ;;  %v7327_v3 = vld [vmem:[#allocation86_spill] sm:$0xff] }
 0xad7   : >> { %v4889_v59 = vpop.eup %4888  ;;  %v2065_v55 = vpop.xlane.xlu0 %2064 }
 0xad8   : >> { %v6777_v24 = vadd.f32 %v1776_v52, %v1302_v12  ;;  %v2227_v49 = vmul.f32 %v4889_v59, %v7318_v39  ;;  %4902 = vrcp.f32 %v2065_v55  ;;  %v7328_v12 = vld [vmem:[#allocation9_spill] sm:$0xff]  ;;  %v7329_v55 = vld [vmem:[#allocation7_spill] sm:$0xff] }
 0xad9   : >> { %v4891_v1 = vpop.eup %4890  ;;  %v2067_v27 = vpop.xlane.xlu1 %2066 }
 0xada   : >> { %v6781_v8 = vadd.f32 %v2227_v49, %v6710_v36  ;;  %v2228_v31 = vmul.f32 %v4891_v1, %v7319_v25  ;;  %4904 = vrcp.f32 %v2067_v27  ;;  %v7330_v27 = vld [vmem:[#allocation88_spill] sm:$0xff] }
 0xadb   : >> { %v4893_v42 = vpop.eup %4892  ;;  %v2069_v43 = vpop.xlane.xlu0 %2068 }
 0xadc   : >> { %v6785_v9 = vadd.f32 %v2228_v31, %v6715_v2  ;;  %v2229_v14 = vmul.f32 %v4893_v42, %v7320_v7  ;;  %4906 = vrcp.f32 %v2069_v43  ;;  %v7331_v43 = vld [vmem:[#allocation90_spill] sm:$0xff] }
 0xadd   : >> { %v4895_v16 = vpop.eup %4894  ;;  %v2071_v11 = vpop.xlane.xlu1 %2070 }
 0xade   : >> { %v6789_v41 = vadd.f32 %v2229_v14, %v6721_v6  ;;  %v2230_v58 = vmul.f32 %v4895_v16, %v7321_v15  ;;  %4908 = vrcp.f32 %v2071_v11  ;;  %v7332_v11 = vld [vmem:[#allocation87_spill] sm:$0xff] }
 0xadf   : >> { %v4897_v36 = vpop.eup %4896  ;;  %v2073_v63 = vpop.xlane.xlu0 %2072 }
 0xae0   : >> { %v6793_v13 = vadd.f32 %v2230_v58, %v6727_v21  ;;  %v2231_v19 = vmul.f32 %v4897_v36, %v7322_v10  ;;  %4910 = vrcp.f32 %v2073_v63  ;;  %v7333_v63 = vld [vmem:[#allocation89_spill] sm:$0xff] }
 0xae1   : >> { %v4899_v2 = vpop.eup %4898  ;;  %v2075_v54 = vpop.xlane.xlu1 %2074 }
 0xae2   : >> { %v6797_v18 = vadd.f32 %v2231_v19, %v6732_v46  ;;  %v2232_v23 = vmul.f32 %v4899_v2, %v7323_v26  ;;  %4912 = vrcp.f32 %v2075_v54  ;;  %v7334_v54 = vld [vmem:[#allocation92_spill] sm:$0xff] }
 0xae3   : >> { %v4901_v6 = vpop.eup %4900  ;;  %v2077_v28 = vpop.xlane.xlu0 %2076 }
 0xae4   : >> { %v6801_v44 = vadd.f32 %v2232_v23, %v6737_v0  ;;  %v2233_v33 = vmul.f32 %v4901_v6, %v7324_v48  ;;  %4914 = vrcp.f32 %v2077_v28  ;;  %v7335_v28 = vld [vmem:[#allocation94_spill] sm:$0xff] }
 0xae5   : >> { %v4903_v21 = vpop.eup %4902  ;;  %v2079_v51 = vpop.xlane.xlu1 %2078 }
 0xae6   : >> { %v6805_v56 = vadd.f32 %v2233_v33, %v6742_v47  ;;  %v2234_v61 = vmul.f32 %v4903_v21, %v7325_v35  ;;  %4916 = vrcp.f32 %v2079_v51 }
 0xae7   : >> { %v4905_v46 = vpop.eup %4904  ;;  %v2081_v60 = vpop.xlane.xlu0 %2080 }
 0xae8   : >> { %v6809_v29 = vadd.f32 %v2234_v61, %v6746_v45  ;;  %v2235_v17 = vmul.f32 %v4905_v46, %v7326_v50  ;;  %4918 = vrcp.f32 %v2081_v60 }
 0xae9   : >> { %v4907_v0 = vpop.eup %4906  ;;  %v2517_v5 = vpop.xlane.xlu1 %2516 }
 0xaea   : >> { %v2251_v62 = vadd.f32 %v2235_v17, %v6750_v30  ;;  %v2236_v20 = vmul.f32 %v4907_v0, %v7327_v3  ;;  %4920 = vrcp.f32 %v2517_v5 }
 0xaeb   : >> { %v4909_v47 = vpop.eup %4908  ;;  %v2519_v34 = vpop.xlane.xlu0 %2518 }
 0xaec   : >> { %v2252_v32 = vadd.f32 %v2236_v20, %v6754_v38  ;;  %v2237_v57 = vmul.f32 %v4909_v47, %v7328_v12  ;;  %4922 = vrcp.f32 %v2519_v34  ;;  %v7338_v47 = vld [vmem:[#allocation100_spill] sm:$0xff] }
 0xaed   : >> { %v4911_v52 = vpop.eup %4910  ;;  %v2521_v45 = vpop.xlane.xlu1 %2520 }
 0xaee   : >> { %v6817_v59 = vadd.f32 %v2237_v57, %v6758_v22  ;;  %v2238_v39 = vmul.f32 %v4911_v52, %v7329_v55  ;;  %v7339_v55 = vld [vmem:[#allocation102_spill] sm:$0xff] }
 0xaef   : >> { %v4913_v49 = vpop.eup %4912  ;;  %v2523_v1 = vpop.xlane.xlu0 %2522 }
 0xaf0   : >> { %v6821_v30 = vadd.f32 %v2238_v39, %v6762_v4  ;;  %v2239_v25 = vmul.f32 %v4913_v49, %v7330_v27 }
 0xaf1   : >> { %v4915_v31 = vpop.eup %4914  ;;  %v2525_v42 = vpop.xlane.xlu1 %2524 }
 0xaf2   : >> { %v6825_v38 = vadd.f32 %v2239_v25, %v6766_v37  ;;  %v2240_v7 = vmul.f32 %v4915_v31, %v7331_v43  ;;  %4924 = vrcp.f32 %v2525_v42 }
 0xaf3   : >> { %v4917_v14 = vpop.eup %4916  ;;  %v2527_v22 = vpop.xlane.xlu0 %2526 }
 0xaf4   : >> { %v6829_v16 = vadd.f32 %v2240_v7, %v6770_v53  ;;  %v2241_v15 = vmul.f32 %v4917_v14, %v7332_v11  ;;  %4926 = vrcp.f32 %v2527_v22 }
 0xaf5   : >> { %v4919_v4 = vpop.eup %4918  ;;  %v2529_v58 = vpop.xlane.xlu1 %2528 }
 0xaf6   : >> { %v6833_v36 = vadd.f32 %v2241_v15, %v6774_v40  ;;  %v2242_v10 = vmul.f32 %v4919_v4, %v7333_v63 }
 0xaf7   : >> { %v4921_v37 = vpop.eup %4920  ;;  %v2531_v19 = vpop.xlane.xlu0 %2530 }
 0xaf8   : >> { %v6837_v2 = vadd.f32 %v2242_v10, %v6777_v24  ;;  %v2693_v26 = vmul.f32 %v4921_v37, %v7334_v54  ;;  %v7336_v24 = vld [vmem:[#allocation96_spill] sm:$0xff] }
 0xaf9   : >> { %v4923_v23 = vpop.eup %4922  ;;  %v2533_v53 = vpop.xlane.xlu1 %2532 }
 0xafa   : >> { %v6841_v6 = vadd.f32 %v2693_v26, %v6781_v8  ;;  %v2694_v48 = vmul.f32 %v4923_v23, %v7335_v28  ;;  %4928 = vrcp.f32 %v2533_v53  ;;  %v7337_v8 = vld [vmem:[#allocation98_spill] sm:$0xff] }
 0xafb   : >> { %v2535_v33 = vpop.xlane.xlu0 %2534 }
 0xafc   : >> { %v6845_v40 = vadd.f32 %v2694_v48, %v6785_v9  ;;  %4930 = vrcp.f32 %v2535_v33 }
 0xafd   : >> { %v2537_v21 = vpop.xlane.xlu1 %2536  ;;  %4932 = vrcp.f32 %v2521_v45 }
 0xafe   : >> { %4934 = vrcp.f32 %v2523_v1 }
 0xaff   : >> { %v4925_v51 = vpop.eup %4924  ;;  %v2539_v35 = vpop.xlane.xlu0 %2538  ;;  %4936 = vrcp.f32 %v2529_v58 }
 0xb00   : >> { %v2697_v61 = vmul.f32 %v4925_v51, %v7336_v24  ;;  %4938 = vrcp.f32 %v2531_v19 }
 0xb01   : >> { %v4927_v46 = vpop.eup %4926  ;;  %v2541_v60 = vpop.xlane.xlu1 %2540  ;;  %4940 = vrcp.f32 %v2537_v21 }
 0xb02   : >> { %v6849_v50 = vadd.f32 %v2697_v61, %v6797_v18  ;;  %v2698_v17 = vmul.f32 %v4927_v46, %v7337_v8  ;;  %4942 = vrcp.f32 %v2539_v35 }
 0xb03   : >> { %v2543_v0 = vpop.xlane.xlu0 %2542  ;;  %4944 = vrcp.f32 %v2541_v60 }
 0xb04   : >> { %v6853_v5 = vadd.f32 %v2698_v17, %v6801_v44  ;;  %4946 = vrcp.f32 %v2543_v0  ;;  %v7340_v0 = vld [vmem:[#allocation91_spill] sm:$0xff] }
 0xb05   : >> { %v2545_v3 = vpop.xlane.xlu1 %2544 }
 0xb07   : >> { %v4929_v9 = vpop.eup %4928  ;;  %v2547_v20 = vpop.xlane.xlu0 %2546 }
 0xb08   : >> { %v2701_v34 = vmul.f32 %v4929_v9, %v7338_v47 }
 0xb09   : >> { %v4931_v12 = vpop.eup %4930  ;;  %v2983_v57 = vpop.xlane.xlu1 %2982 }
 0xb0a   : >> { %v6856_v52 = vadd.f32 %v2701_v34, %v2251_v62  ;;  %v2702_v39 = vmul.f32 %v4931_v12, %v7339_v55  ;;  %v4933_v10 = vpop.eup %4932  ;;  %v7341_v34 = vld [vmem:[#allocation93_spill] sm:$0xff] }
 0xb0b   : >> { %v2985_v49 = vpop.xlane.xlu0 %2984  ;;  %v4935_v54 = vpop.eup %4934 }
 0xb0c   : >> { %v6859_v18 = vadd.f32 %v2702_v39, %v2252_v32  ;;  %v4937_v26 = vpop.eup %4936  ;;  %v2696_v12 = vmul.f32 %v4935_v54, %v7341_v34  ;;  %v7347_v34 = vld [vmem:[#allocation97_spill] sm:$0xff] }
 0xb0d   : >> { %v2987_v27 = vpop.xlane.xlu1 %2986  ;;  %v4939_v28 = vpop.eup %4938 }
 0xb0e   : >> { %4948 = vrcp.f32 %v2987_v27  ;;  %v6885_v48 = vpop.eup %4940 }
 0xb0f   : >> { %v2989_v25 = vpop.xlane.xlu0 %2988  ;;  %4950 = vrcp.f32 %v2545_v3  ;;  %v6889_v51 = vpop.eup %4942  ;;  %v2695_v3 = vmul.f32 %v4933_v10, %v7340_v0 }
 0xb10   : >> { %4952 = vrcp.f32 %v2989_v25  ;;  %v6891_v35 = vpop.eup %4944 }
 0xb11   : >> { %v2991_v31 = vpop.xlane.xlu1 %2990  ;;  %4954 = vrcp.f32 %v2983_v57  ;;  %v6893_v61 = vpop.eup %4946  ;;  %v7342_v57 = vld [vmem:[#allocation108_spill] sm:$0xff] }
 0xb12   : >> { %4956 = vrcp.f32 %v2547_v20 }
 0xb13   : >> { %v2993_v42 = vpop.xlane.xlu0 %2992  ;;  %4958 = vrcp.f32 %v2985_v49 }
 0xb15   : >> { %v2995_v44 = vpop.xlane.xlu1 %2994 }
 0xb17   : >> { %v2997_v43 = vpop.xlane.xlu0 %2996 }
 0xb19   : >> { %v6861_v7 = vpop.xlane.xlu1 %2998 }
 0xb1b   : >> { %v6863_v14 = vpop.xlane.xlu0 %3000  ;;  %v4949_v46 = vpop.eup %4948 }
 0xb1c   : >> { %v6897_v17 = vpop.eup %4950  ;;  %v3137_v55 = vmul.f32 %v4949_v46, %v7342_v57  ;;  %v7345_v46 = vld [vmem:[#allocation95_spill] sm:$0xff] }
 0xb1d   : >> { %v3003_v22 = vpop.xlane.xlu1 %3002  ;;  %v4953_v9 = vpop.eup %4952 }
 0xb1e   : >> { %v4955_v47 = vpop.eup %4954 }
 0xb1f   : >> { %v3005_v62 = vpop.xlane.xlu0 %3004  ;;  %v6902_v39 = vpop.eup %4956 }
 0xb20   : >> { %v4959_v25 = vpop.eup %4958 }
 0xb21   : >> { %v6865_v32 = vpop.f32.mrf.mxu0  ;;  %v6867_v11 = vpop.xlane.xlu1 %3006 }
 0xb23   : >> { %v6869_v15 = vpop.xlane.xlu0 %3008  ;;  %v6871_v4 = vpop.f32.mrf.mxu0 }
 0xb25   : >> { %v6873_v45 = vpop.f32.mrf.mxu0  ;;  %v6875_v1 = vpop.xlane.xlu1 %3010 }
 0xb27   : >> { %v6877_v58 = vpop.xlane.xlu0 %3012  ;;  %v6879_v63 = vpop.f32.mrf.mxu0 }
 0xb29   : >> { %v6881_v37 = vpop.f32.mrf.mxu0  ;;  %v3429_v19 = vpop.xlane.xlu1 %3428 }
 0xb2a   : >> { %4960 = vrcp.f32 %v3429_v19 }
 0xb2b   : >> { %4962 = vrcp.f32 %v2995_v44  ;;  %v3431_v23 = vpop.xlane.xlu0 %3430  ;;  %v6883_v53 = vpop.f32.mrf.mxu0 }
 0xb2c   : >> { %4964 = vrcp.f32 %v3431_v23  ;;  %v2712_v23 = vadd.f32 %v2696_v12, %v6793_v13  ;;  %v2700_v12 = vmul.f32 %v4939_v28, %v7347_v34 }
 0xb2d   : >> { %4966 = vrcp.f32 %v2997_v43  ;;  %v6887_v33 = vpop.f32.mrf.mxu0  ;;  %v3425_v21 = vpop.xlane.xlu1 %3424 }
 0xb2e   : >> { %4968 = vrcp.f32 %v3425_v21 }
 0xb2f   : >> { %4970 = vrcp.f32 %v2991_v31  ;;  %v3427_v24 = vpop.xlane.xlu0 %3426  ;;  %v6895_v60 = vpop.f32.mrf.mxu0  ;;  %v2711_v31 = vadd.f32 %v2695_v3, %v6789_v41  ;;  %v2699_v41 = vmul.f32 %v4937_v26, %v7345_v46 }
 0xb30   : >> { %4972 = vrcp.f32 %v3427_v24 }
 0xb31   : >> { %4974 = vrcp.f32 %v2993_v42  ;;  %v3437_v8 = vpop.xlane.xlu1 %3436  ;;  %v6904_v49 = vpop.f32.mrf.mxu0  ;;  %v7343_v42 = vld [vmem:[#allocation110_spill] sm:$0xff]  ;;  %v3153_v21 = vadd.f32 %v3137_v55, %v2711_v31  ;;  %v7348_v55 = vld [vmem:[#allocation112_spill] sm:$0xff]  ;;  %v2715_v28 = vadd.f32 %v2699_v41, %v6805_v56 }
 0xb32   : >> { %4976 = vrcp.f32 %v3437_v8  ;;  %v3138_v44 = vmul.f32 %v4953_v9, %v7343_v42  ;;  %v7346_v8 = vld [vmem:[#allocation111_spill] sm:$0xff] }
 0xb33   : >> { %4978 = vrcp.f32 %v3003_v22  ;;  %v3439_v20 = vpop.xlane.xlu0 %3438  ;;  %v7344_v22 = vld [vmem:[#allocation109_spill] sm:$0xff]  ;;  %v3136_v0 = vmul.f32 %v4959_v25, %v7346_v8  ;;  %v6915_v3 = vpop.f32.mrf.mxu0 }
 0xb34   : >> { %4980 = vrcp.f32 %v3439_v20  ;;  %v3135_v10 = vmul.f32 %v4955_v47, %v7344_v22  ;;  %v3154_v20 = vadd.f32 %v3138_v44, %v2712_v23  ;;  %v7349_v25 = vld [vmem:[#allocation5_spill] sm:$0xff] }
 0xb35   : >> { %4982 = vrcp.f32 %v3005_v62  ;;  %v3433_v27 = vpop.xlane.xlu1 %3432 }
 0xb36   : >> { %4984 = vrcp.f32 %v3433_v27  ;;  %v3151_v57 = vadd.f32 %v3135_v10, %v6841_v6  ;;  %v3152_v6 = vadd.f32 %v3136_v0, %v6845_v40  ;;  %v2716_v40 = vadd.f32 %v2700_v12, %v6809_v29 }
 0xb37   : >> { %v4961_v43 = vpop.eup %4960  ;;  %4986 = vrcp.f32 %v6861_v7  ;;  %v3435_v19 = vpop.xlane.xlu0 %3434 }
 0xb38   : >> { %v4963_v54 = vpop.eup %4962  ;;  %v3611_v62 = vmul.f32 %v4961_v43, %v6865_v32  ;;  %4988 = vrcp.f32 %v3435_v19  ;;  %v7350_v43 = vld [vmem:[#allocation114_spill] sm:$0xff] }
 0xb39   : >> { %v4965_v24 = vpop.eup %4964  ;;  %4990 = vrcp.f32 %v6863_v14  ;;  %v3445_v7 = vpop.xlane.xlu1 %3444  ;;  %v3141_v26 = vmul.f32 %v4963_v54, %v7348_v55 }
 0xb3a   : >> { %v4967_v9 = vpop.eup %4966  ;;  %v3627_v47 = vadd.f32 %v3611_v62, %v3153_v21  ;;  %v3612_v13 = vmul.f32 %v4965_v24, %v6873_v45  ;;  %4992 = vrcp.f32 %v3445_v7  ;;  %v7351_v21 = vld [vmem:[#allocation113_spill] sm:$0xff]  ;;  %v7352_v7 = vld [vmem:[#allocation99_spill] sm:$0xff] }
 0xb3b   : >> { %v4969_v32 = vpop.eup %4968  ;;  %4994 = vrcp.f32 %v6867_v11  ;;  %v3447_v14 = vpop.xlane.xlu0 %3446  ;;  %v3142_v22 = vmul.f32 %v4967_v9, %v7350_v43  ;;  %v3157_v24 = vadd.f32 %v3141_v26, %v2715_v28  ;;  %v2703_v29 = vmul.f32 %v6885_v48, %v7352_v7  ;;  %v7353_v9 = vld [vmem:[#allocation115_spill] sm:$0xff]  ;;  %v7354_v48 = vld [vmem:[#allocation101_spill] sm:$0xff] }
 0xb3c   : >> { %v4971_v27 = vpop.eup %4970  ;;  %v3649_v31 = vadd.f32 %v7349_v25, %v3627_v47  ;;  %v3628_v42 = vadd.f32 %v3612_v13, %v3154_v20  ;;  %v3609_v45 = vmul.f32 %v4969_v32, %v6871_v4  ;;  %4996 = vrcp.f32 %v3447_v14  ;;  %v6933_v11 = vpop.f32.mrf.mxu0  ;;  %v7355_v14 = vld [vmem:[#allocation116_spill] sm:$0xff] }
 0xb3d   : >> { %v4973_v44 = vpop.eup %4972  ;;  %4998 = vrcp.f32 %v6869_v15  ;;  %v3441_v10 = vpop.xlane.xlu1 %3440  ;;  %v3139_v62 = vmul.f32 %v4971_v27, %v7351_v21  ;;  %v3158_v47 = vadd.f32 %v3142_v22, %v2716_v40  ;;  %v2704_v55 = vmul.f32 %v6889_v51, %v7354_v48 }
 0xb3e   : >> { %v4975_v19 = vpop.eup %4974  ;;  %3666 = vst.msk [vmem:[%s6925_s5 + $0x10] sm:$0xff] %vm266_vm0, %v3649_v31  ;;  %v3650_v54 = vadd.f32 %v7349_v25, %v3628_v42  ;;  %v3625_v4 = vadd.f32 %v3609_v45, %v3151_v57  ;;  %v3610_v23 = vmul.f32 %v4973_v44, %v6879_v63  ;;  %5000 = vrcp.f32 %v3441_v10 }
 0xb3f   : >> { %v4977_v56 = vpop.eup %4976  ;;  %5002 = vrcp.f32 %v6875_v1  ;;  %v3443_v15 = vpop.xlane.xlu0 %3442  ;;  %v3140_v20 = vmul.f32 %v4975_v19, %v7353_v9  ;;  %v3155_v26 = vadd.f32 %v3139_v62, %v6849_v50  ;;  %v2719_v28 = vadd.f32 %v2703_v29, %v6817_v59 }
 0xb40   : >> { %v4979_v46 = vpop.eup %4978  ;;  %3667 = vst.msk [vmem:[%s6925_s5 + $0x18] sm:$0xff] %vm266_vm0, %v3650_v54  ;;  %v3647_v41 = vadd.f32 %v7349_v25, %v3625_v4  ;;  %v3626_v8 = vadd.f32 %v3610_v23, %v3152_v6  ;;  %v3615_v0 = vmul.f32 %v4977_v56, %v6881_v37  ;;  %5004 = vrcp.f32 %v3443_v15  ;;  %v6950_v1 = vpop.f32.mrf.mxu0  ;;  %v7356_v6 = vld [vmem:[#allocation118_spill] sm:$0xff]  ;;  %v7357_v23 = vld [vmem:[#allocation117_spill] sm:$0xff] }
 0xb41   : >> { %v4981_v63 = vpop.eup %4980  ;;  %5006 = vrcp.f32 %v6877_v58  ;;  %v3449_v13 = vpop.xlane.xlu1 %3448  ;;  %v3145_v58 = vmul.f32 %v4979_v46, %v7355_v14  ;;  %v3156_v51 = vadd.f32 %v3140_v20, %v6853_v5  ;;  %v2720_v59 = vadd.f32 %v2704_v55, %v6821_v30  ;;  %v7358_v46 = vld [vmem:[#allocation104_spill] sm:$0xff]  ;;  %v7359_v30 = vld [vmem:[#allocation119_spill] sm:$0xff] }
 0xb42   : >> { %v4983_v32 = vpop.eup %4982  ;;  %3664 = vst.msk [vmem:[%s6925_s5] sm:$0xff] %vm266_vm0, %v3647_v41  ;;  %v3648_v34 = vadd.f32 %v7349_v25, %v3626_v8  ;;  %v3631_v37 = vadd.f32 %v3615_v0, %v3157_v24  ;;  %v3616_v12 = vmul.f32 %v4981_v63, %v6887_v33  ;;  %5008 = vrcp.f32 %v3449_v13  ;;  %v6967_v43 = vpop.f32.mrf.mxu0 }
 0xb43   : >> { %v4985_v57 = vpop.eup %4984  ;;  %v3451_v27 = vpop.xlane.xlu0 %3450  ;;  %v3146_v50 = vmul.f32 %v4983_v32, %v7356_v6  ;;  %v3161_v56 = vadd.f32 %v3145_v58, %v2719_v28  ;;  %v2705_v41 = vmul.f32 %v6891_v35, %v7358_v46  ;;  %v7361_v32 = vld [vmem:[#allocation121_spill] sm:$0xff] }
 0xb44   : >> { %v4987_v31 = vpop.eup %4986  ;;  %3665 = vst.msk [vmem:[%s6925_s5 + $0x8] sm:$0xff] %vm266_vm0, %v3648_v34  ;;  %v3653_v42 = vadd.f32 %v7349_v25, %v3631_v37  ;;  %v3632_v45 = vadd.f32 %v3616_v12, %v3158_v47  ;;  %v3613_v44 = vmul.f32 %v4985_v57, %v6883_v53  ;;  %5010 = vrcp.f32 %v3451_v27  ;;  %v3578_v0 = vpop.f32.mrf.mxu0 }
 0xb45   : >> { %v4989_v33 = vpop.eup %4988  ;;  %v3453_v22 = vpop.xlane.xlu1 %3452  ;;  %v3143_v5 = vmul.f32 %v4987_v31, %v7357_v23  ;;  %v3162_v7 = vadd.f32 %v3146_v50, %v2720_v59 }
 0xb46   : >> { %v4991_v10 = vpop.eup %4990  ;;  %3670 = vst.msk [vmem:[%s6925_s5 + $0x30] sm:$0xff] %vm266_vm0, %v3653_v42  ;;  %v3654_v19 = vadd.f32 %v7349_v25, %v3632_v45  ;;  %v3629_v54 = vadd.f32 %v3613_v44, %v3155_v26  ;;  %v3614_v53 = vmul.f32 %v4989_v33, %v6895_v60  ;;  %5012 = vrcp.f32 %v3453_v22  ;;  %v7362_v26 = vld [vmem:[#allocation103_spill] sm:$0xff]  ;;  %v4537_v27 = vpop.f32.mrf.mxu0  ;;  %v7364_v33 = vld [vmem:[#allocation105_spill] sm:$0xff] }
 0xb47   : >> { %v4993_v4 = vpop.eup %4992  ;;  %v3455_v40 = vpop.xlane.xlu0 %3454  ;;  %v3144_v8 = vmul.f32 %v4991_v10, %v7359_v30  ;;  %v3159_v37 = vadd.f32 %v3143_v5, %v6856_v52  ;;  %v2707_v14 = vmul.f32 %v6897_v17, %v7362_v26  ;;  %v2708_v17 = vmul.f32 %v6902_v39, %v7364_v33 }
 0xb48   : >> { %v4995_v21 = vpop.eup %4994  ;;  %3671 = vst.msk [vmem:[%s6925_s5 + $0x38] sm:$0xff] %vm266_vm0, %v3654_v19  ;;  %v3651_v62 = vadd.f32 %v7349_v25, %v3629_v54  ;;  %v3630_v24 = vadd.f32 %v3614_v53, %v3156_v51  ;;  %v3619_v15 = vmul.f32 %v4993_v4, %v6904_v49  ;;  %5014 = vrcp.f32 %v3455_v40  ;;  %v7360_v49 = vld [vmem:[#allocation106_spill] sm:$0xff]  ;;  %v7365_v51 = vld [vmem:[#allocation120_spill] sm:$0xff]  ;;  %v3581_v54 = vpop.f32.mrf.mxu0 }
 0xb49   : >> { %v4997_v60 = vpop.eup %4996  ;;  %v2706_v13 = vmul.f32 %v6893_v61, %v7360_v49  ;;  %v3147_v34 = vmul.f32 %v4995_v21, %v7361_v32  ;;  %v7363_v61 = vld [vmem:[#allocation123_spill] sm:$0xff]  ;;  %v3160_v52 = vadd.f32 %v3144_v8, %v6859_v18  ;;  %v2723_v19 = vadd.f32 %v2707_v14, %v6833_v36 }
 0xb4a   : >> { %v4999_v63 = vpop.eup %4998  ;;  %3668 = vst.msk [vmem:[%s6925_s5 + $0x20] sm:$0xff] %vm266_vm0, %v3651_v62  ;;  %v3652_v29 = vadd.f32 %v7349_v25, %v3630_v24  ;;  %v3635_v9 = vadd.f32 %v3619_v15, %v3161_v56  ;;  %v3620_v20 = vmul.f32 %v4997_v60, %v6933_v11  ;;  %v2721_v11 = vadd.f32 %v2705_v41, %v6825_v38 }
 0xb4b   : >> { %v5001_v47 = vpop.eup %5000  ;;  %v3148_v58 = vmul.f32 %v4999_v63, %v7363_v61  ;;  %v2722_v38 = vadd.f32 %v2706_v13, %v6829_v16  ;;  %v7366_v16 = vld [vmem:[#allocation122_spill] sm:$0xff]  ;;  %v2724_v5 = vadd.f32 %v2708_v17, %v6837_v2 }
 0xb4c   : >> { %v5003_v35 = vpop.eup %5002  ;;  %3669 = vst.msk [vmem:[%s6925_s5 + $0x28] sm:$0xff] %vm266_vm0, %v3652_v29  ;;  %v3657_v12 = vadd.f32 %v7349_v25, %v3635_v9  ;;  %v3636_v57 = vadd.f32 %v3620_v20, %v3162_v7  ;;  %v3617_v48 = vmul.f32 %v5001_v47, %v6915_v3  ;;  %v3163_v28 = vadd.f32 %v3147_v34, %v2721_v11 }
 0xb4d   : >> { %v5005_v55 = vpop.eup %5004  ;;  %v3149_v6 = vmul.f32 %v5003_v35, %v7365_v51 }
 0xb4e   : >> { %v5007_v31 = vpop.eup %5006  ;;  %3674 = vst.msk [vmem:[%s6925_s5 + $0x50] sm:$0xff] %vm266_vm0, %v3657_v12  ;;  %v3658_v42 = vadd.f32 %v7349_v25, %v3636_v57  ;;  %v3633_v45 = vadd.f32 %v3617_v48, %v3159_v37  ;;  %v3618_v3 = vmul.f32 %v5005_v55, %v6950_v1  ;;  %v3164_v1 = vadd.f32 %v3148_v58, %v2722_v38 }
 0xb4f   : >> { %v5009_v44 = vpop.eup %5008  ;;  %v3150_v53 = vmul.f32 %v5007_v31, %v7366_v16  ;;  %v3165_v56 = vadd.f32 %v3149_v6, %v2723_v19 }
 0xb50   : >> { %3675 = vst.msk [vmem:[%s6925_s5 + $0x58] sm:$0xff] %vm266_vm0, %v3658_v42  ;;  %v3655_v18 = vadd.f32 %v7349_v25, %v3633_v45  ;;  %v3634_v50 = vadd.f32 %v3618_v3, %v3160_v52  ;;  %v3621_v22 = vmul.f32 %v5009_v44, %v3578_v0 }
 0xb51   : >> { %v5011_v10 = vpop.eup %5010  ;;  %v3166_v24 = vadd.f32 %v3150_v53, %v2724_v5 }
 0xb52   : >> { %3672 = vst.msk [vmem:[%s6925_s5 + $0x40] sm:$0xff] %vm266_vm0, %v3655_v18  ;;  %v3656_v39 = vadd.f32 %v7349_v25, %v3634_v50  ;;  %v3637_v4 = vadd.f32 %v3621_v22, %v3163_v28  ;;  %v3622_v59 = vmul.f32 %v5011_v10, %v3581_v54 }
 0xb53   : >> { %v5013_v23 = vpop.eup %5012 }
 0xb54   : >> { %3673 = vst.msk [vmem:[%s6925_s5 + $0x48] sm:$0xff] %vm266_vm0, %v3656_v39  ;;  %v3659_v36 = vadd.f32 %v7349_v25, %v3637_v4  ;;  %v3638_v40 = vadd.f32 %v3622_v59, %v3164_v1  ;;  %v3623_v21 = vmul.f32 %v5013_v23, %v6967_v43 }
 0xb55   : >> { %v5015_v62 = vpop.eup %5014 }
 0xb56   : >> { %3676 = vst.msk [vmem:[%s6925_s5 + $0x60] sm:$0xff] %vm266_vm0, %v3659_v36  ;;  %v3660_v15 = vadd.f32 %v7349_v25, %v3638_v40  ;;  %v3639_v60 = vadd.f32 %v3623_v21, %v3165_v56  ;;  %v3624_v46 = vmul.f32 %v5015_v62, %v4537_v27 }
 0xb58   : >> { %3677 = vst.msk [vmem:[%s6925_s5 + $0x68] sm:$0xff] %vm266_vm0, %v3660_v15  ;;  %v3661_v2 = vadd.f32 %v7349_v25, %v3639_v60  ;;  %v3640_v41 = vadd.f32 %v3624_v46, %v3166_v24  ;;  %644 = sbr.rel (!%p642_p4) target bundleno = 246 (0xf6), region = 75 }
 0xb5a   : >> { %3678 = vst.msk [vmem:[%s6925_s5 + $0x70] sm:$0xff] %vm266_vm0, %v3661_v2  ;;  %v3662_v30 = vadd.f32 %v7349_v25, %v3640_v41 }
 0xb5c   : >> { %3679 = vst.msk [vmem:[%s6925_s5 + $0x78] sm:$0xff] %vm266_vm0, %v3662_v30 }
 0xb5d PF: > { %s14_s15 = sadd.s32 1, %s5038_s15  }
 0xb5e   : > { %p11_p5 = scmp.ge.s32.totalorder %s14_s15, 4  }
 0xb60   :  { %13 = sbr.rel (!%p11_p5) target bundleno = 1 (0x1), region = 86 }

</bundles_post_ra>
